<compile_context>
chip_gen: v7x
topology: tpu7x:2x2x1
jax: 0.10.0
libtpu: 0.0.40
codegen_flags: <defaults>
</compile_context>

<pallas_src>
import functools

import jax
import jax.numpy as jnp
from jax.experimental import pallas as pl
from jax.experimental.pallas import tpu as pltpu


# ----------------------------------------------------------------------------
# In-kernel helpers
# ----------------------------------------------------------------------------
def _erf(z):
    # Abramowitz & Stegun 7.1.26 rational approximation (abs err ~1e-7 with an
    # exact reciprocal; ~1e-3 with the EUP approx reciprocal -- well inside the
    # bf16-MXU tolerance of this kernel).
    a1, a2, a3, a4, a5 = (0.254829592, -0.284496736, 1.421413741,
                          -1.453152027, 1.061405429)
    p = 0.3275911
    sgn = jnp.where(z >= 0.0, 1.0, -1.0)
    az = jnp.abs(z)
    t = pl.reciprocal(1.0 + p * az, approx=True)        # EUP, not VALU divide
    poly = ((((a5 * t + a4) * t + a3) * t + a2) * t + a1) * t
    return sgn * (1.0 - poly * jnp.exp(-az * az))


def _gelu_exact(v):
    # PyTorch nn.GELU() default (erf-based), not the tanh approximation.
    return 0.5 * v * (1.0 + _erf(v * 0.7071067811865476))


def _layernorm(v, g, b, eps=1e-5):
    mu = jnp.mean(v, axis=-1, keepdims=True)
    d = v - mu
    var = jnp.mean(d * d, axis=-1, keepdims=True)
    return d * jax.lax.rsqrt(var + eps) * g + b


# ----------------------------------------------------------------------------
# Fused self-attention kernel (one grid step = Bt batch elements)
# ----------------------------------------------------------------------------
def _fused_sa_kernel(x_ref, vecs_ref, b_in_ref,
                     w_in_ref, w_out_ref, w1_ref, w2_ref,
                     o_ref, *, num_heads, head_dim):
    Bt, S, C = x_ref.shape
    M = Bt * S
    x = x_ref[...].reshape(M, C)                         # (M, C) fp32

    vecs = vecs_ref[...]                                 # (8, C) fp32
    ln_g, ln_b = vecs[0:1], vecs[1:2]
    b_out = vecs[2:3]
    ffln_g, ffln_b = vecs[3:4], vecs[4:5]
    b1, b2 = vecs[5:6], vecs[6:7]

    # --- LayerNorm -> qkv projection (bf16 MXU inputs, fp32 accumulation) ---
    # The 1/sqrt(head_dim) attention scale is pre-folded into the q columns of
    # w_in / b_in (wrapper-side, one time).
    x_ln = _layernorm(x, ln_g, ln_b)
    qkv = jnp.dot(x_ln.astype(jnp.bfloat16), w_in_ref[...],
                  preferred_element_type=jnp.float32) + b_in_ref[...]  # (M,3C)
    qkv = qkv.astype(jnp.bfloat16)          # cast once; head slices are bf16

    # --- per (batch, head) attention ----------------------------------------
    # Per-head AV results are re-concatenated along the lane axis so the
    # out-projection is a single K=C matmul (instead of num_heads K=hd ones).
    av_rows = []
    for b in range(Bt):
        rows = slice(b * S, (b + 1) * S)
        head_outs = []
        for h in range(num_heads):
            lo = h * head_dim
            hi = lo + head_dim
            qh = qkv[rows, lo:hi]                        # (S, hd) pre-scaled
            kh = qkv[rows, C + lo:C + hi]
            vh = qkv[rows, 2 * C + lo:2 * C + hi]

            s = jax.lax.dot_general(qh, kh, (((1,), (1,)), ((), ())),
                                    preferred_element_type=jnp.float32)
            m = jnp.max(s, axis=-1, keepdims=True)
            e = jnp.exp(s - m)
            p = e * pl.reciprocal(jnp.sum(e, axis=-1, keepdims=True),
                                  approx=True)
            head_outs.append(jnp.dot(p.astype(jnp.bfloat16), vh,
                                     preferred_element_type=jnp.float32))
        av_rows.append(jnp.concatenate(head_outs, axis=-1))       # (S, C)
    av = av_rows[0] if Bt == 1 else jnp.concatenate(av_rows, axis=0)  # (M, C)

    attn = jnp.dot(av.astype(jnp.bfloat16), w_out_ref[...],
                   preferred_element_type=jnp.float32) + b_out
    h1 = attn + x                                        # residual 1

    # --- feed-forward: LN -> Linear -> GELU -> Linear -> residual ------------
    f = _layernorm(h1, ffln_g, ffln_b)
    f = jnp.dot(f.astype(jnp.bfloat16), w1_ref[...],
                preferred_element_type=jnp.float32) + b1
    f = _gelu_exact(f)
    f = jnp.dot(f.astype(jnp.bfloat16), w2_ref[...],
                preferred_element_type=jnp.float32) + b2

    o_ref[...] = (f + h1).astype(o_ref.dtype).reshape(Bt, S, C)


# ----------------------------------------------------------------------------
# One-time parameter preparation (keep OUT of the per-call jitted path)
# ----------------------------------------------------------------------------
def prepare_sa_params(p, num_heads=4):
    C = p["out_w"].shape[0]
    hd = C // num_heads
    scale = 1.0 / float(hd) ** 0.5
    f32, bf16 = jnp.float32, jnp.bfloat16

    w_in = p["in_w"].T.astype(f32)                       # (C, 3C)
    w_in = w_in.at[:, :C].multiply(scale)                # fold scale into q
    b_in = p["in_b"].astype(f32)
    b_in = b_in.at[:C].multiply(scale)

    # Pack the seven (1, C) vectors into one (8, C) operand (row 7 is padding).
    vecs = jnp.zeros((8, C), f32)
    vecs = vecs.at[0].set(p["ln_g"]).at[1].set(p["ln_b"])
    vecs = vecs.at[2].set(p["out_b"])
    vecs = vecs.at[3].set(p["ff_ln_g"]).at[4].set(p["ff_ln_b"])
    vecs = vecs.at[5].set(p["ff_b1"]).at[6].set(p["ff_b2"])

    return dict(
        vecs=vecs,
        b_in=b_in.reshape(1, 3 * C),
        w_in=w_in.astype(bf16),
        w_out=p["out_w"].T.astype(bf16),
        w1=p["ff_w1"].T.astype(bf16),
        w2=p["ff_w2"].T.astype(bf16),
    )


def _pick_block_batch(B, S):
    # Aim for M = Bt*S >= 256 (fills the MXU sublanes on v6e/v7x) while keeping
    # at least two grid programs when B >= 2 so dimension_semantics=("parallel",)
    # can map work onto both v7x TensorCores.
    target = max(1, 256 // max(S, 1))
    if B >= 2:
        target = max(1, min(target, B // 2))
    target = min(target, B)
    for d in range(target, 0, -1):
        if B % d == 0:
            return d
    return 1


# ----------------------------------------------------------------------------
# Wrapper
# ----------------------------------------------------------------------------
@functools.partial(jax.jit, static_argnames=("num_heads",))
def self_attention_pallas(x, prepped, num_heads=4):
    """x: (B, C, H, W) fp32 -> (B, C, H, W) fp32, PyTorch SelfAttention fwd."""
    B, C, H, W = x.shape
    assert C % num_heads == 0
    S = H * W
    hd = C // num_heads
    Bt = _pick_block_batch(B, S)

    # Layout glue identical to the module's own .view/.swapaxes.
    x_seq = x.reshape(B, C, S).swapaxes(1, 2).astype(jnp.float32)     # (B,S,C)

    def const2(shape):  # weights / packed vectors: same block every grid step
        return pl.BlockSpec(shape, lambda b: (0, 0))

    kernel = functools.partial(_fused_sa_kernel, num_heads=num_heads,
                               head_dim=hd)

    out = pl.pallas_call(
        kernel,
        out_shape=jax.ShapeDtypeStruct((B, S, C), jnp.float32),
        grid=(B // Bt,),
        in_specs=[
            pl.BlockSpec((Bt, S, C), lambda b: (b, 0, 0)),  # x (lane dim = C)
            const2((8, C)),                                 # packed LN/bias vecs
            const2((1, 3 * C)),                             # in_proj bias
            const2((C, 3 * C)),                             # in_proj weight
            const2((C, C)),                                 # out_proj weight
            const2((C, C)),                                 # ff linear 1 weight
            const2((C, C)),                                 # ff linear 2 weight
        ],
        out_specs=pl.BlockSpec((Bt, S, C), lambda b: (b, 0, 0)),
        compiler_params=pltpu.CompilerParams(
            dimension_semantics=("parallel",)),             # batch across cores
    )(x_seq, prepped["vecs"], prepped["b_in"], prepped["w_in"],
      prepped["w_out"], prepped["w1"], prepped["w2"])

    return out.swapaxes(1, 2).reshape(B, C, H, W)


# ----------------------------------------------------------------------------
# Pure-JAX reference (mirrors the PyTorch module exactly, all fp32)
# ----------------------------------------------------------------------------
def self_attention_ref(x, p, num_heads=4):
    B, C, H, W = x.shape
    S = H * W
    hd = C // num_heads
    xs = x.reshape(B, C, S).swapaxes(1, 2)                            # (B,S,C)

    def ln(v, g, b):
        mu = v.mean(-1, keepdims=True)
        d = v - mu
        var = (d * d).mean(-1, keepdims=True)
        return d * jax.lax.rsqrt(var + 1e-5) * g + b

    x_ln = ln(xs, p["ln_g"], p["ln_b"])
    qkv = x_ln @ p["in_w"].T + p["in_b"]
    q, k, v = jnp.split(qkv, 3, axis=-1)

    def heads(m):
        return m.reshape(B, S, num_heads, hd).transpose(0, 2, 1, 3)

    qh, kh, vh = heads(q), heads(k), heads(v)
    s = jnp.einsum("bhqd,bhkd->bhqk", qh, kh) / jnp.sqrt(float(hd))
    a = jax.nn.softmax(s, axis=-1)
    av = jnp.einsum("bhqk,bhkd->bhqd", a, vh)
    av = av.transpose(0, 2, 1, 3).reshape(B, S, C)
    attn_out = av @ p["out_w"].T + p["out_b"]
    h1 = attn_out + xs
    f = ln(h1, p["ff_ln_g"], p["ff_ln_b"])
    f = f @ p["ff_w1"].T + p["ff_b1"]
    f = jax.nn.gelu(f, approximate=False)
    f = f @ p["ff_w2"].T + p["ff_b2"]
    out = f + h1
    return out.swapaxes(1, 2).reshape(B, C, H, W)


# ----------------------------------------------------------------------------
# Deterministic parameters
# ----------------------------------------------------------------------------
def make_sa_params(key, c):
    def g(i, shape, scale=0.02):
        return scale * jax.random.normal(jax.random.fold_in(key, i), shape,
                                         jnp.float32)
    return dict(
        ln_g=jnp.ones((c,), jnp.float32), ln_b=jnp.zeros((c,), jnp.float32),
        in_w=g(0, (3 * c, c)), in_b=g(1, (3 * c,)),
        out_w=g(2, (c, c)), out_b=g(3, (c,)),
        ff_ln_g=jnp.ones((c,), jnp.float32), ff_ln_b=jnp.zeros((c,), jnp.float32),
        ff_w1=g(4, (c, c)), ff_b1=g(5, (c,)),
        ff_w2=g(6, (c, c)), ff_b2=g(7, (c,)),
    )


# ----------------------------------------------------------------------------
if __name__ == "__main__":
    key = jax.random.PRNGKey(0)

    # SelfAttention(channels=128, size=8) -> B=2, C=128 (4 heads, hd=32), S=64.
    B, C, H, W = 2, 128, 8, 8
    params = make_sa_params(jax.random.fold_in(key, 1), C)
    x = jax.random.normal(jax.random.fold_in(key, 2), (B, C, H, W), jnp.float32)

    prepped = prepare_sa_params(params)                   # one-time weight prep
    out = self_attention_pallas(x, prepped)
    out = jax.block_until_ready(out)

    assert out.shape == (B, C, H, W), out.shape
    assert bool(jnp.all(jnp.isfinite(out)))

    # Loose tolerance: kernel uses bf16 MXU inputs + approx reciprocals.
    ref = self_attention_ref(x, params)
    max_err = float(jnp.max(jnp.abs(out - ref)))
    assert max_err < 5e-2, max_err

    print("KERNEL_OK")
</pallas_src>

<mosaic_0001>
module attributes {stable_mosaic.version = 11 : i64} {
  func.func @_fused_sa_kernel(%arg0: i32, %arg1: memref<1x64x128xf32, #tpu.memory_space<vmem>>, %arg2: memref<8x128xf32, #tpu.memory_space<vmem>>, %arg3: memref<1x384xf32, #tpu.memory_space<vmem>>, %arg4: memref<128x384xbf16, #tpu.memory_space<vmem>>, %arg5: memref<128x128xbf16, #tpu.memory_space<vmem>>, %arg6: memref<128x128xbf16, #tpu.memory_space<vmem>>, %arg7: memref<128x128xbf16, #tpu.memory_space<vmem>>, %arg8: memref<1x64x128xf32, #tpu.memory_space<vmem>>) attributes {dimension_semantics = [#tpu.dimension_semantics<parallel>], iteration_bounds = array<i64: 2>, scalar_prefetch = 0 : i64, scratch_operands = 0 : i64, tpu.core_type = #tpu.core_type<tc>, window_params = [{transform_indices = @transform_0, window_bounds = array<i64: 1, 64, 128>}, {pipeline_mode = #tpu.pipeline_mode<synchronous>, transform_indices = @transform_1, window_bounds = array<i64: 8, 128>}, {pipeline_mode = #tpu.pipeline_mode<synchronous>, transform_indices = @transform_2, window_bounds = array<i64: 1, 384>}, {pipeline_mode = #tpu.pipeline_mode<synchronous>, transform_indices = @transform_3, window_bounds = array<i64: 128, 384>}, {pipeline_mode = #tpu.pipeline_mode<synchronous>, transform_indices = @transform_4, window_bounds = array<i64: 128, 128>}, {pipeline_mode = #tpu.pipeline_mode<synchronous>, transform_indices = @transform_5, window_bounds = array<i64: 128, 128>}, {pipeline_mode = #tpu.pipeline_mode<synchronous>, transform_indices = @transform_6, window_bounds = array<i64: 128, 128>}, {transform_indices = @transform_7, window_bounds = array<i64: 1, 64, 128>}]} {
    %c0 = arith.constant 0 : index
    %c0_0 = arith.constant 0 : index
    %c0_1 = arith.constant 0 : index
    %0 = vector.load %arg1[%c0, %c0_0, %c0_1] : memref<1x64x128xf32, #tpu.memory_space<vmem>>, vector<1x64x128xf32>
    %1 = vector.shape_cast %0 : vector<1x64x128xf32> to vector<64x128xf32>
    %c0_2 = arith.constant 0 : index
    %c0_3 = arith.constant 0 : index
    %2 = vector.load %arg2[%c0_2, %c0_3] : memref<8x128xf32, #tpu.memory_space<vmem>>, vector<8x128xf32>
    %3 = vector.extract_strided_slice %2 {offsets = [0, 0], sizes = [1, 128], strides = [1, 1]} : vector<8x128xf32> to vector<1x128xf32>
    %4 = vector.extract_strided_slice %2 {offsets = [1, 0], sizes = [1, 128], strides = [1, 1]} : vector<8x128xf32> to vector<1x128xf32>
    %5 = vector.extract_strided_slice %2 {offsets = [2, 0], sizes = [1, 128], strides = [1, 1]} : vector<8x128xf32> to vector<1x128xf32>
    %6 = vector.extract_strided_slice %2 {offsets = [3, 0], sizes = [1, 128], strides = [1, 1]} : vector<8x128xf32> to vector<1x128xf32>
    %7 = vector.extract_strided_slice %2 {offsets = [4, 0], sizes = [1, 128], strides = [1, 1]} : vector<8x128xf32> to vector<1x128xf32>
    %8 = vector.extract_strided_slice %2 {offsets = [5, 0], sizes = [1, 128], strides = [1, 1]} : vector<8x128xf32> to vector<1x128xf32>
    %9 = vector.extract_strided_slice %2 {offsets = [6, 0], sizes = [1, 128], strides = [1, 1]} : vector<8x128xf32> to vector<1x128xf32>
    %cst = arith.constant dense<0.000000e+00> : vector<64xf32>
    %10 = vector.multi_reduction <add>, %1, %cst [1] : vector<64x128xf32> to vector<64xf32>
    %11 = vector.shape_cast %10 : vector<64xf32> to vector<64x1xf32>
    %cst_4 = arith.constant 1.280000e+02 : f32
    %12 = vector.broadcast %cst_4 : f32 to vector<64x1xf32>
    %13 = arith.divf %11, %12 : vector<64x1xf32>
    %14 = vector.broadcast %13 : vector<64x1xf32> to vector<64x128xf32>
    %15 = arith.subf %1, %14 : vector<64x128xf32>
    %16 = arith.mulf %15, %15 : vector<64x128xf32>
    %cst_5 = arith.constant dense<0.000000e+00> : vector<64xf32>
    %17 = vector.multi_reduction <add>, %16, %cst_5 [1] : vector<64x128xf32> to vector<64xf32>
    %18 = vector.shape_cast %17 : vector<64xf32> to vector<64x1xf32>
    %cst_6 = arith.constant 1.280000e+02 : f32
    %19 = vector.broadcast %cst_6 : f32 to vector<64x1xf32>
    %20 = arith.divf %18, %19 : vector<64x1xf32>
    %cst_7 = arith.constant 9.99999974E-6 : f32
    %21 = vector.broadcast %cst_7 : f32 to vector<64x1xf32>
    %22 = arith.addf %20, %21 : vector<64x1xf32>
    %23 = math.rsqrt %22 : vector<64x1xf32>
    %24 = vector.broadcast %23 : vector<64x1xf32> to vector<64x128xf32>
    %25 = arith.mulf %15, %24 : vector<64x128xf32>
    %26 = vector.broadcast %3 : vector<1x128xf32> to vector<64x128xf32>
    %27 = arith.mulf %25, %26 : vector<64x128xf32>
    %28 = vector.broadcast %4 : vector<1x128xf32> to vector<64x128xf32>
    %29 = arith.addf %27, %28 : vector<64x128xf32>
    %30 = arith.truncf %29 : vector<64x128xf32> to vector<64x128xbf16>
    %c0_8 = arith.constant 0 : index
    %c0_9 = arith.constant 0 : index
    %31 = vector.load %arg4[%c0_8, %c0_9] : memref<128x384xbf16, #tpu.memory_space<vmem>>, vector<128x384xbf16>
    %cst_10 = arith.constant dense<0.000000e+00> : vector<64x384xf32>
    %32 = tpu.matmul %30, %31, %cst_10 {dimension_numbers = #tpu.dot_dimension_numbers<[1], [0], [0], [1], [0, 0, 1, 1], [], []>} : vector<64x128xbf16>, vector<128x384xbf16>, vector<64x384xf32> -> vector<64x384xf32>
    %c0_11 = arith.constant 0 : index
    %c0_12 = arith.constant 0 : index
    %33 = vector.load %arg3[%c0_11, %c0_12] : memref<1x384xf32, #tpu.memory_space<vmem>>, vector<1x384xf32>
    %34 = vector.broadcast %33 : vector<1x384xf32> to vector<64x384xf32>
    %35 = arith.addf %32, %34 : vector<64x384xf32>
    %36 = arith.truncf %35 : vector<64x384xf32> to vector<64x384xbf16>
    %37 = vector.extract_strided_slice %36 {offsets = [0, 0], sizes = [64, 32], strides = [1, 1]} : vector<64x384xbf16> to vector<64x32xbf16>
    %38 = vector.extract_strided_slice %36 {offsets = [0, 128], sizes = [64, 32], strides = [1, 1]} : vector<64x384xbf16> to vector<64x32xbf16>
    %39 = vector.extract_strided_slice %36 {offsets = [0, 256], sizes = [64, 32], strides = [1, 1]} : vector<64x384xbf16> to vector<64x32xbf16>
    %cst_13 = arith.constant dense<0.000000e+00> : vector<64x64xf32>
    %40 = tpu.matmul %37, %38, %cst_13 {dimension_numbers = #tpu.dot_dimension_numbers<[1], [1], [0], [0], [0, 0, 1, 0], [], []>} : vector<64x32xbf16>, vector<64x32xbf16>, vector<64x64xf32> -> vector<64x64xf32>
    %cst_14 = arith.constant dense<0xFF800000> : vector<64xf32>
    %41 = vector.multi_reduction <maximumf>, %40, %cst_14 [1] : vector<64x64xf32> to vector<64xf32>
    %42 = vector.shape_cast %41 : vector<64xf32> to vector<64x1xf32>
    %43 = vector.broadcast %42 : vector<64x1xf32> to vector<64x64xf32>
    %44 = arith.subf %40, %43 : vector<64x64xf32>
    %45 = math.exp %44 : vector<64x64xf32>
    %cst_15 = arith.constant dense<0.000000e+00> : vector<64xf32>
    %46 = vector.multi_reduction <add>, %45, %cst_15 [1] : vector<64x64xf32> to vector<64xf32>
    %47 = vector.shape_cast %46 : vector<64xf32> to vector<64x1xf32>
    %48 = tpu.reciprocal %47 {approx = true} : vector<64x1xf32> -> vector<64x1xf32>
    %49 = vector.broadcast %48 : vector<64x1xf32> to vector<64x64xf32>
    %50 = arith.mulf %45, %49 : vector<64x64xf32>
    %51 = arith.truncf %50 : vector<64x64xf32> to vector<64x64xbf16>
    %cst_16 = arith.constant dense<0.000000e+00> : vector<64x32xf32>
    %52 = tpu.matmul %51, %39, %cst_16 {dimension_numbers = #tpu.dot_dimension_numbers<[1], [0], [0], [1], [0, 0, 1, 1], [], []>} : vector<64x64xbf16>, vector<64x32xbf16>, vector<64x32xf32> -> vector<64x32xf32>
    %53 = vector.extract_strided_slice %36 {offsets = [0, 32], sizes = [64, 32], strides = [1, 1]} : vector<64x384xbf16> to vector<64x32xbf16>
    %54 = vector.extract_strided_slice %36 {offsets = [0, 160], sizes = [64, 32], strides = [1, 1]} : vector<64x384xbf16> to vector<64x32xbf16>
    %55 = vector.extract_strided_slice %36 {offsets = [0, 288], sizes = [64, 32], strides = [1, 1]} : vector<64x384xbf16> to vector<64x32xbf16>
    %cst_17 = arith.constant dense<0.000000e+00> : vector<64x64xf32>
    %56 = tpu.matmul %53, %54, %cst_17 {dimension_numbers = #tpu.dot_dimension_numbers<[1], [1], [0], [0], [0, 0, 1, 0], [], []>} : vector<64x32xbf16>, vector<64x32xbf16>, vector<64x64xf32> -> vector<64x64xf32>
    %cst_18 = arith.constant dense<0xFF800000> : vector<64xf32>
    %57 = vector.multi_reduction <maximumf>, %56, %cst_18 [1] : vector<64x64xf32> to vector<64xf32>
    %58 = vector.shape_cast %57 : vector<64xf32> to vector<64x1xf32>
    %59 = vector.broadcast %58 : vector<64x1xf32> to vector<64x64xf32>
    %60 = arith.subf %56, %59 : vector<64x64xf32>
    %61 = math.exp %60 : vector<64x64xf32>
    %cst_19 = arith.constant dense<0.000000e+00> : vector<64xf32>
    %62 = vector.multi_reduction <add>, %61, %cst_19 [1] : vector<64x64xf32> to vector<64xf32>
    %63 = vector.shape_cast %62 : vector<64xf32> to vector<64x1xf32>
    %64 = tpu.reciprocal %63 {approx = true} : vector<64x1xf32> -> vector<64x1xf32>
    %65 = vector.broadcast %64 : vector<64x1xf32> to vector<64x64xf32>
    %66 = arith.mulf %61, %65 : vector<64x64xf32>
    %67 = arith.truncf %66 : vector<64x64xf32> to vector<64x64xbf16>
    %cst_20 = arith.constant dense<0.000000e+00> : vector<64x32xf32>
    %68 = tpu.matmul %67, %55, %cst_20 {dimension_numbers = #tpu.dot_dimension_numbers<[1], [0], [0], [1], [0, 0, 1, 1], [], []>} : vector<64x64xbf16>, vector<64x32xbf16>, vector<64x32xf32> -> vector<64x32xf32>
    %69 = vector.extract_strided_slice %36 {offsets = [0, 64], sizes = [64, 32], strides = [1, 1]} : vector<64x384xbf16> to vector<64x32xbf16>
    %70 = vector.extract_strided_slice %36 {offsets = [0, 192], sizes = [64, 32], strides = [1, 1]} : vector<64x384xbf16> to vector<64x32xbf16>
    %71 = vector.extract_strided_slice %36 {offsets = [0, 320], sizes = [64, 32], strides = [1, 1]} : vector<64x384xbf16> to vector<64x32xbf16>
    %cst_21 = arith.constant dense<0.000000e+00> : vector<64x64xf32>
    %72 = tpu.matmul %69, %70, %cst_21 {dimension_numbers = #tpu.dot_dimension_numbers<[1], [1], [0], [0], [0, 0, 1, 0], [], []>} : vector<64x32xbf16>, vector<64x32xbf16>, vector<64x64xf32> -> vector<64x64xf32>
    %cst_22 = arith.constant dense<0xFF800000> : vector<64xf32>
    %73 = vector.multi_reduction <maximumf>, %72, %cst_22 [1] : vector<64x64xf32> to vector<64xf32>
    %74 = vector.shape_cast %73 : vector<64xf32> to vector<64x1xf32>
    %75 = vector.broadcast %74 : vector<64x1xf32> to vector<64x64xf32>
    %76 = arith.subf %72, %75 : vector<64x64xf32>
    %77 = math.exp %76 : vector<64x64xf32>
    %cst_23 = arith.constant dense<0.000000e+00> : vector<64xf32>
    %78 = vector.multi_reduction <add>, %77, %cst_23 [1] : vector<64x64xf32> to vector<64xf32>
    %79 = vector.shape_cast %78 : vector<64xf32> to vector<64x1xf32>
    %80 = tpu.reciprocal %79 {approx = true} : vector<64x1xf32> -> vector<64x1xf32>
    %81 = vector.broadcast %80 : vector<64x1xf32> to vector<64x64xf32>
    %82 = arith.mulf %77, %81 : vector<64x64xf32>
    %83 = arith.truncf %82 : vector<64x64xf32> to vector<64x64xbf16>
    %cst_24 = arith.constant dense<0.000000e+00> : vector<64x32xf32>
    %84 = tpu.matmul %83, %71, %cst_24 {dimension_numbers = #tpu.dot_dimension_numbers<[1], [0], [0], [1], [0, 0, 1, 1], [], []>} : vector<64x64xbf16>, vector<64x32xbf16>, vector<64x32xf32> -> vector<64x32xf32>
    %85 = vector.extract_strided_slice %36 {offsets = [0, 96], sizes = [64, 32], strides = [1, 1]} : vector<64x384xbf16> to vector<64x32xbf16>
    %86 = vector.extract_strided_slice %36 {offsets = [0, 224], sizes = [64, 32], strides = [1, 1]} : vector<64x384xbf16> to vector<64x32xbf16>
    %87 = vector.extract_strided_slice %36 {offsets = [0, 352], sizes = [64, 32], strides = [1, 1]} : vector<64x384xbf16> to vector<64x32xbf16>
    %cst_25 = arith.constant dense<0.000000e+00> : vector<64x64xf32>
    %88 = tpu.matmul %85, %86, %cst_25 {dimension_numbers = #tpu.dot_dimension_numbers<[1], [1], [0], [0], [0, 0, 1, 0], [], []>} : vector<64x32xbf16>, vector<64x32xbf16>, vector<64x64xf32> -> vector<64x64xf32>
    %cst_26 = arith.constant dense<0xFF800000> : vector<64xf32>
    %89 = vector.multi_reduction <maximumf>, %88, %cst_26 [1] : vector<64x64xf32> to vector<64xf32>
    %90 = vector.shape_cast %89 : vector<64xf32> to vector<64x1xf32>
    %91 = vector.broadcast %90 : vector<64x1xf32> to vector<64x64xf32>
    %92 = arith.subf %88, %91 : vector<64x64xf32>
    %93 = math.exp %92 : vector<64x64xf32>
    %cst_27 = arith.constant dense<0.000000e+00> : vector<64xf32>
    %94 = vector.multi_reduction <add>, %93, %cst_27 [1] : vector<64x64xf32> to vector<64xf32>
    %95 = vector.shape_cast %94 : vector<64xf32> to vector<64x1xf32>
    %96 = tpu.reciprocal %95 {approx = true} : vector<64x1xf32> -> vector<64x1xf32>
    %97 = vector.broadcast %96 : vector<64x1xf32> to vector<64x64xf32>
    %98 = arith.mulf %93, %97 : vector<64x64xf32>
    %99 = arith.truncf %98 : vector<64x64xf32> to vector<64x64xbf16>
    %cst_28 = arith.constant dense<0.000000e+00> : vector<64x32xf32>
    %100 = tpu.matmul %99, %87, %cst_28 {dimension_numbers = #tpu.dot_dimension_numbers<[1], [0], [0], [1], [0, 0, 1, 1], [], []>} : vector<64x64xbf16>, vector<64x32xbf16>, vector<64x32xf32> -> vector<64x32xf32>
    %101 = tpu.concatenate %52, %68, %84, %100 in 1 : vector<64x32xf32>, vector<64x32xf32>, vector<64x32xf32>, vector<64x32xf32> -> vector<64x128xf32>
    %102 = arith.truncf %101 : vector<64x128xf32> to vector<64x128xbf16>
    %c0_29 = arith.constant 0 : index
    %c0_30 = arith.constant 0 : index
    %103 = vector.load %arg5[%c0_29, %c0_30] : memref<128x128xbf16, #tpu.memory_space<vmem>>, vector<128x128xbf16>
    %cst_31 = arith.constant dense<0.000000e+00> : vector<64x128xf32>
    %104 = tpu.matmul %102, %103, %cst_31 {dimension_numbers = #tpu.dot_dimension_numbers<[1], [0], [0], [1], [0, 0, 1, 1], [], []>} : vector<64x128xbf16>, vector<128x128xbf16>, vector<64x128xf32> -> vector<64x128xf32>
    %105 = vector.broadcast %5 : vector<1x128xf32> to vector<64x128xf32>
    %106 = arith.addf %104, %105 : vector<64x128xf32>
    %107 = arith.addf %106, %1 : vector<64x128xf32>
    %cst_32 = arith.constant dense<0.000000e+00> : vector<64xf32>
    %108 = vector.multi_reduction <add>, %107, %cst_32 [1] : vector<64x128xf32> to vector<64xf32>
    %109 = vector.shape_cast %108 : vector<64xf32> to vector<64x1xf32>
    %cst_33 = arith.constant 1.280000e+02 : f32
    %110 = vector.broadcast %cst_33 : f32 to vector<64x1xf32>
    %111 = arith.divf %109, %110 : vector<64x1xf32>
    %112 = vector.broadcast %111 : vector<64x1xf32> to vector<64x128xf32>
    %113 = arith.subf %107, %112 : vector<64x128xf32>
    %114 = arith.mulf %113, %113 : vector<64x128xf32>
    %cst_34 = arith.constant dense<0.000000e+00> : vector<64xf32>
    %115 = vector.multi_reduction <add>, %114, %cst_34 [1] : vector<64x128xf32> to vector<64xf32>
    %116 = vector.shape_cast %115 : vector<64xf32> to vector<64x1xf32>
    %cst_35 = arith.constant 1.280000e+02 : f32
    %117 = vector.broadcast %cst_35 : f32 to vector<64x1xf32>
    %118 = arith.divf %116, %117 : vector<64x1xf32>
    %cst_36 = arith.constant 9.99999974E-6 : f32
    %119 = vector.broadcast %cst_36 : f32 to vector<64x1xf32>
    %120 = arith.addf %118, %119 : vector<64x1xf32>
    %121 = math.rsqrt %120 : vector<64x1xf32>
    %122 = vector.broadcast %121 : vector<64x1xf32> to vector<64x128xf32>
    %123 = arith.mulf %113, %122 : vector<64x128xf32>
    %124 = vector.broadcast %6 : vector<1x128xf32> to vector<64x128xf32>
    %125 = arith.mulf %123, %124 : vector<64x128xf32>
    %126 = vector.broadcast %7 : vector<1x128xf32> to vector<64x128xf32>
    %127 = arith.addf %125, %126 : vector<64x128xf32>
    %128 = arith.truncf %127 : vector<64x128xf32> to vector<64x128xbf16>
    %c0_37 = arith.constant 0 : index
    %c0_38 = arith.constant 0 : index
    %129 = vector.load %arg6[%c0_37, %c0_38] : memref<128x128xbf16, #tpu.memory_space<vmem>>, vector<128x128xbf16>
    %cst_39 = arith.constant dense<0.000000e+00> : vector<64x128xf32>
    %130 = tpu.matmul %128, %129, %cst_39 {dimension_numbers = #tpu.dot_dimension_numbers<[1], [0], [0], [1], [0, 0, 1, 1], [], []>} : vector<64x128xbf16>, vector<128x128xbf16>, vector<64x128xf32> -> vector<64x128xf32>
    %131 = vector.broadcast %8 : vector<1x128xf32> to vector<64x128xf32>
    %132 = arith.addf %130, %131 : vector<64x128xf32>
    %cst_40 = arith.constant 5.000000e-01 : f32
    %133 = vector.broadcast %cst_40 : f32 to vector<64x128xf32>
    %134 = arith.mulf %133, %132 : vector<64x128xf32>
    %cst_41 = arith.constant 0.707106769 : f32
    %135 = vector.broadcast %cst_41 : f32 to vector<64x128xf32>
    %136 = arith.mulf %132, %135 : vector<64x128xf32>
    %cst_42 = arith.constant 0.000000e+00 : f32
    %137 = vector.broadcast %cst_42 : f32 to vector<64x128xf32>
    %138 = arith.cmpf oge, %136, %137 : vector<64x128xf32>
    %cst_43 = arith.constant 1.000000e+00 : f32
    %cst_44 = arith.constant -1.000000e+00 : f32
    %139 = vector.broadcast %cst_43 : f32 to vector<64x128xf32>
    %140 = vector.broadcast %cst_44 : f32 to vector<64x128xf32>
    %141 = arith.select %138, %139, %140 : vector<64x128xi1>, vector<64x128xf32>
    %142 = math.absf %136 : vector<64x128xf32>
    %cst_45 = arith.constant 0.327591091 : f32
    %143 = vector.broadcast %cst_45 : f32 to vector<64x128xf32>
    %144 = arith.mulf %143, %142 : vector<64x128xf32>
    %cst_46 = arith.constant 1.000000e+00 : f32
    %145 = vector.broadcast %cst_46 : f32 to vector<64x128xf32>
    %146 = arith.addf %145, %144 : vector<64x128xf32>
    %147 = tpu.reciprocal %146 {approx = true} : vector<64x128xf32> -> vector<64x128xf32>
    %cst_47 = arith.constant 1.06140542 : f32
    %148 = vector.broadcast %cst_47 : f32 to vector<64x128xf32>
    %149 = arith.mulf %148, %147 : vector<64x128xf32>
    %cst_48 = arith.constant -1.45315206 : f32
    %150 = vector.broadcast %cst_48 : f32 to vector<64x128xf32>
    %151 = arith.addf %149, %150 : vector<64x128xf32>
    %152 = arith.mulf %151, %147 : vector<64x128xf32>
    %cst_49 = arith.constant 1.42141378 : f32
    %153 = vector.broadcast %cst_49 : f32 to vector<64x128xf32>
    %154 = arith.addf %152, %153 : vector<64x128xf32>
    %155 = arith.mulf %154, %147 : vector<64x128xf32>
    %cst_50 = arith.constant -0.284496725 : f32
    %156 = vector.broadcast %cst_50 : f32 to vector<64x128xf32>
    %157 = arith.addf %155, %156 : vector<64x128xf32>
    %158 = arith.mulf %157, %147 : vector<64x128xf32>
    %cst_51 = arith.constant 0.254829586 : f32
    %159 = vector.broadcast %cst_51 : f32 to vector<64x128xf32>
    %160 = arith.addf %158, %159 : vector<64x128xf32>
    %161 = arith.mulf %160, %147 : vector<64x128xf32>
    %cst_52 = arith.constant 0.000000e+00 : f32
    %162 = vector.broadcast %cst_52 : f32 to vector<64x128xf32>
    %163 = arith.subf %162, %142 : vector<64x128xf32>
    %164 = arith.mulf %163, %142 : vector<64x128xf32>
    %165 = math.exp %164 : vector<64x128xf32>
    %166 = arith.mulf %161, %165 : vector<64x128xf32>
    %cst_53 = arith.constant 1.000000e+00 : f32
    %167 = vector.broadcast %cst_53 : f32 to vector<64x128xf32>
    %168 = arith.subf %167, %166 : vector<64x128xf32>
    %169 = arith.mulf %141, %168 : vector<64x128xf32>
    %cst_54 = arith.constant 1.000000e+00 : f32
    %170 = vector.broadcast %cst_54 : f32 to vector<64x128xf32>
    %171 = arith.addf %170, %169 : vector<64x128xf32>
    %172 = arith.mulf %134, %171 : vector<64x128xf32>
    %173 = arith.truncf %172 : vector<64x128xf32> to vector<64x128xbf16>
    %c0_55 = arith.constant 0 : index
    %c0_56 = arith.constant 0 : index
    %174 = vector.load %arg7[%c0_55, %c0_56] : memref<128x128xbf16, #tpu.memory_space<vmem>>, vector<128x128xbf16>
    %cst_57 = arith.constant dense<0.000000e+00> : vector<64x128xf32>
    %175 = tpu.matmul %173, %174, %cst_57 {dimension_numbers = #tpu.dot_dimension_numbers<[1], [0], [0], [1], [0, 0, 1, 1], [], []>} : vector<64x128xbf16>, vector<128x128xbf16>, vector<64x128xf32> -> vector<64x128xf32>
    %176 = vector.broadcast %9 : vector<1x128xf32> to vector<64x128xf32>
    %177 = arith.addf %175, %176 : vector<64x128xf32>
    %178 = arith.addf %177, %107 : vector<64x128xf32>
    %179 = vector.shape_cast %178 : vector<64x128xf32> to vector<1x64x128xf32>
    %c0_58 = arith.constant 0 : index
    %c0_59 = arith.constant 0 : index
    %c0_60 = arith.constant 0 : index
    %180 = vector.load %arg8[%c0_58, %c0_59, %c0_60] : memref<1x64x128xf32, #tpu.memory_space<vmem>>, vector<1x64x128xf32>
    tpu.vector_store %arg8[%c0_58, %c0_59, %c0_60], %179 {strides = array<i32>} : memref<1x64x128xf32, #tpu.memory_space<vmem>>, vector<1x64x128xf32>,
    return
  }
  func.func @transform_0(%arg0: i32) -> (i32, i32, i32) {
    %c0_i32 = arith.constant 0 : i32
    %c0_i32_0 = arith.constant 0 : i32
    %c0_i32_1 = arith.constant 0 : i32
    return %arg0, %c0_i32, %c0_i32_0 : i32, i32, i32
  }
  func.func @transform_1(%arg0: i32) -> (i32, i32) {
    %c0_i32 = arith.constant 0 : i32
    %c0_i32_0 = arith.constant 0 : i32
    %c0_i32_1 = arith.constant 0 : i32
    return %c0_i32, %c0_i32_0 : i32, i32
  }
  func.func @transform_2(%arg0: i32) -> (i32, i32) {
    %c0_i32 = arith.constant 0 : i32
    %c0_i32_0 = arith.constant 0 : i32
    %c0_i32_1 = arith.constant 0 : i32
    return %c0_i32, %c0_i32_0 : i32, i32
  }
  func.func @transform_3(%arg0: i32) -> (i32, i32) {
    %c0_i32 = arith.constant 0 : i32
    %c0_i32_0 = arith.constant 0 : i32
    %c0_i32_1 = arith.constant 0 : i32
    return %c0_i32, %c0_i32_0 : i32, i32
  }
  func.func @transform_4(%arg0: i32) -> (i32, i32) {
    %c0_i32 = arith.constant 0 : i32
    %c0_i32_0 = arith.constant 0 : i32
    %c0_i32_1 = arith.constant 0 : i32
    return %c0_i32, %c0_i32_0 : i32, i32
  }
  func.func @transform_5(%arg0: i32) -> (i32, i32) {
    %c0_i32 = arith.constant 0 : i32
    %c0_i32_0 = arith.constant 0 : i32
    %c0_i32_1 = arith.constant 0 : i32
    return %c0_i32, %c0_i32_0 : i32, i32
  }
  func.func @transform_6(%arg0: i32) -> (i32, i32) {
    %c0_i32 = arith.constant 0 : i32
    %c0_i32_0 = arith.constant 0 : i32
    %c0_i32_1 = arith.constant 0 : i32
    return %c0_i32, %c0_i32_0 : i32, i32
  }
  func.func @transform_7(%arg0: i32) -> (i32, i32, i32) {
    %c0_i32 = arith.constant 0 : i32
    %c0_i32_0 = arith.constant 0 : i32
    %c0_i32_1 = arith.constant 0 : i32
    return %arg0, %c0_i32, %c0_i32_0 : i32, i32, i32
  }
}

</mosaic_0001>

<bundles_post_ra>
// kernel: self_attention_pallas.1
= control target key start
LH: loop header
LB: loop body
LE: loop exit
PB: predicated region body
PF: predicated region fallthrough
CT: control target
= control target key end

     0   :  { %12 = vsyncpa [#allocation3], 0  ;;  %s5289_s0 = inlined_call_operand.hbm [shape: f32[2,64,128], index: 0, kind: input, shape index: {}]   ;;  %s5290_s1 = inlined_call_operand.vmem [shape: f32[8,128], index: 1, kind: input, shape index: {}]   ;;  %s5291_s2 = inlined_call_operand.vmem [shape: f32[1,384], index: 2, kind: input, shape index: {}]   ;;  %s5292_s3 = inlined_call_operand.hbm [shape: bf16[128,384], index: 3, kind: input, shape index: {}]   ;;  %s5293_s4 = inlined_call_operand.hbm [shape: bf16[128,128], index: 4, kind: input, shape index: {}]   ;;  %s5294_s5 = inlined_call_operand.hbm [shape: bf16[128,128], index: 5, kind: input, shape index: {}]   ;;  %s5295_s6 = inlined_call_operand.hbm [shape: bf16[128,128], index: 6, kind: input, shape index: {}]   ;;  %s5296_s7 = inlined_call_operand.hbm [shape: f32[2,64,128], index: 7, kind: output, shape index: {}]  }
   0x1   :  { %14 = vsyncpa [#allocation3 + $0x1], 0 }
   0x2   :  { %15 = vsyncpa [#allocation6], 0 }
   0x3   :  { %16 = vsyncpa [#allocation9], 0 }
   0x4   :  { %17 = vsyncpa [#allocation4], 0 }
   0x5   :  { %19 = vsyncpa [#allocation4 + $0x1], 0  ;;  %s4090_s24 = smov 0   ;;  %s4092_s25 = smov 0  }
   0x6   :  { %s4094_s26 = smov 0   ;;  %s4096_s27 = smov 0  }
   0x7 LB: > { %5302 = sst [smem:[#allocation16_spill]] %s4017_s24  ;;  %s4111_s28 = sadd.s32 4294967295, %s4029_s27   ;;  %s4029_s27 = sphi %s4096_s27, %s5325_s27   ;;  %s4025_s26 = sphi %s4094_s26, %s5324_s26   ;;  %s4021_s25 = sphi %s4092_s25, %s5323_s25   ;;  %s4017_s24 = sphi %s4090_s24, %s5322_s24  }
   0x8   : > { %s2940_s29 = sadd.s32 4294967294, %s4029_s27   ;;  %p45_p0 = scmp.ne.s32.totalorder %s4021_s25, %s4017_s24 }
   0x9   : > { %p5297_p1 = scmp.eq.s32.totalorder %s4111_s28, 0  ;;  %p201_p3 = scmp.eq.s32.totalorder %s2940_s29, 1 }
   0xa   : > { %p2941_p5 = scmp.ge.s32.totalorder %s4029_s27, 1  ;;  %p208_p7 = scmp.lt.s32.totalorder %s4029_s27, 3 }
   0xb   : > { %p4120_p4 = por %p5297_p1, %p45_p0  ;;  %p4125_p6 = por %p201_p3, %p45_p0 }
   0xc   : > { %p4130_p8 = pnand %p2941_p5, %p208_p7  ;;  %s4031_s10 = smov [#allocation5]  }
   0xd   : > { %s5303_s30 = scalar_select %p4120_p4, 1, 0 }
   0xe   : > { %s5304_s8 = scalar_select %p4125_p6, 1, 0 }
   0xf   : > { %s5306_s9 = scalar_select %p4130_p8, 1, 0 }
  0x10   : > { %5305 = sst [smem:[#allocation17_spill]] %s5304_s8  ;;  %s226_s11 = sshll.u32 %s4031_s10, 4  ;;  %s227_s11 = int_to_ptr.vmem [resolvable:$true] %s226_s11 }
  0x11   : > { %p3416_p9 = pneg %p4130_p8  ;;  %s4032_s13 = smov [#allocation8]  }
  0x12   : > { %s252_s14 = sshll.u32 %s4032_s13, 4  ;;  %s3813_s17 = scalar_lea.hbm %s5292_s3, 3072  ;;  %s253_s14 = int_to_ptr.vmem [resolvable:$true] %s252_s14 }
  0x13   : > { %p4139_p11 = pnand %p3416_p9, %p5297_p1  ;;  %p3814_p12 = scmp.ne.s32.totalorder %s5292_s3, %s3813_s17 }
  0x14   : > { %p3820_p5 = scmp.lt.u32.totalorder %s3813_s17, %s5292_s3 }
  0x15   : > { %p4151_p13 = pneg %p4139_p11 }
  0x17   : > { %p3816_p0 = pnand %p4151_p13, %p3814_p12 }
  0x19   : > { %p3817_p3 = pneg %p3816_p0 }
  0x1b   : > { %p3822_p7 = pnand %p3820_p5, %p3817_p3 }
  0x1d   : > { %3825 = shalt.err (!%p3822_p7)
}
  0x1e   : > { %s3826_s23 = scalar_lea.vmem %s227_s11, 3072  ;;  %p3834_p2 = scmp.lt.s32.totalorder %s227_s11, %s227_s11 }
  0x1f   : > { %p3827_p9 = scmp.ne.s32.totalorder %s227_s11, %s3826_s23  ;;  %p3835_p6 = scmp.lt.s32.totalorder %s3826_s23, %s3826_s23 }
  0x21   : > { %p3829_p10 = pnand %p3827_p9, %p4151_p13  ;;  %p3836_p4 = por %p3835_p6, %p3834_p2 }
  0x23   : > { %p3830_p1 = pneg %p3829_p10 }
  0x25   : > { %p3837_p8 = pnand %p3836_p4, %p3830_p1 }
  0x27   : > { %3840 = shalt.err (!%p3837_p8)
}
  0x28   : > { %s4033_s29 = smov 192   ;;  %s4034_s10 = smov 12  }
  0x29   : > { %3419 = dma.hbm_to_vmem [thread:$0]  (!%p4139_p11), %s5292_s3, 3072, %s227_s11, [#allocation6], %s4033_s29, %s4033_s29, %s4034_s10  }
  0x2a   : > { %s4035_s16 = smov [#allocation7]   ;;  %s3841_s21 = scalar_lea.hbm %s5294_s5, 1024 }
  0x2b   : > { %s239_s17 = sshll.u32 %s4035_s16, 4  ;;  %p3842_p1 = scmp.ne.s32.totalorder %s5294_s5, %s3841_s21  ;;  %s240_s17 = int_to_ptr.vmem [resolvable:$true] %s239_s17 }
  0x2c   : > { %p3848_p6 = scmp.lt.u32.totalorder %s3841_s21, %s5294_s5 }
  0x2d   : > { %p3844_p2 = pnand %p3842_p1, %p4151_p13 }
  0x2f   : > { %p3845_p4 = pneg %p3844_p2 }
  0x31   : > { %p3850_p8 = pnand %p3848_p6, %p3845_p4 }
  0x33   : > { %3853 = shalt.err (!%p3850_p8)
}
  0x34   : > { %s3854_s11 = scalar_lea.vmem %s253_s14, 1024  ;;  %p3862_p3 = scmp.lt.s32.totalorder %s253_s14, %s253_s14 }
  0x35   : > { %p3855_p10 = scmp.ne.s32.totalorder %s253_s14, %s3854_s11  ;;  %p3863_p5 = scmp.lt.s32.totalorder %s3854_s11, %s3854_s11 }
  0x37   : > { %p3857_p12 = pnand %p3855_p10, %p4151_p13  ;;  %p3864_p7 = por %p3863_p5, %p3862_p3 }
  0x39   : > { %p3858_p0 = pneg %p3857_p12 }
  0x3b   : > { %p3865_p9 = pnand %p3864_p7, %p3858_p0 }
  0x3d   : > { %3868 = shalt.err (!%p3865_p9)
}
  0x3e   : > { %s4036_s29 = smov 64   ;;  %s4037_s10 = smov 4  }
  0x3f   : > { %3425 = dma.hbm_to_vmem [thread:$0]  (!%p4139_p11), %s5294_s5, 1024, %s253_s14, [#allocation9], %s4036_s29, %s4036_s29, %s4037_s10  }
  0x40   : > { %s3869_s16 = scalar_lea.hbm %s5293_s4, 1024 }
  0x41   : > { %p3870_p1 = scmp.ne.s32.totalorder %s5293_s4, %s3869_s16  ;;  %p3876_p6 = scmp.lt.u32.totalorder %s3869_s16, %s5293_s4 }
  0x43   : > { %p3872_p2 = pnand %p3870_p1, %p4151_p13 }
  0x45   : > { %p3873_p4 = pneg %p3872_p2 }
  0x47   : > { %p3878_p8 = pnand %p3876_p6, %p3873_p4 }
  0x49   : > { %3881 = shalt.err (!%p3878_p8)
}
  0x4a   : > { %s3882_s23 = scalar_lea.vmem %s240_s17, 1024  ;;  %p3890_p3 = scmp.lt.s32.totalorder %s240_s17, %s240_s17 }
  0x4b   : > { %p3883_p10 = scmp.ne.s32.totalorder %s240_s17, %s3882_s23  ;;  %p3891_p5 = scmp.lt.s32.totalorder %s3882_s23, %s3882_s23 }
  0x4d   : > { %p3885_p12 = pnand %p3883_p10, %p4151_p13  ;;  %p3892_p7 = por %p3891_p5, %p3890_p3 }
  0x4f   : > { %p3886_p0 = pneg %p3885_p12 }
  0x51   : > { %p3893_p9 = pnand %p3892_p7, %p3886_p0 }
  0x53   : > { %3896 = shalt.err (!%p3893_p9)
}
  0x54   : > { %3422 = dma.hbm_to_vmem [thread:$0]  (!%p4139_p11), %s5293_s4, 1024, %s240_s17, [#allocation6], %s4036_s29, %s4036_s29, %s4037_s10  }
  0x55   : > { %s4038_s24 = smov [#allocation10]   ;;  %s3897_s16 = scalar_lea.hbm %s5295_s6, 1024 }
  0x56   : > { %s265_s8 = sshll.u32 %s4038_s24, 4  ;;  %p3898_p1 = scmp.ne.s32.totalorder %s5295_s6, %s3897_s16  ;;  %s266_s8 = int_to_ptr.vmem [resolvable:$true] %s265_s8 }
  0x57   : > { %p3904_p6 = scmp.lt.u32.totalorder %s3897_s16, %s5295_s6 }
  0x58   : > { %p3900_p2 = pnand %p3898_p1, %p4151_p13 }
  0x5a   : > { %p3901_p4 = pneg %p3900_p2 }
  0x5c   : > { %p3906_p8 = pnand %p3904_p6, %p3901_p4 }
  0x5e   : > { %3909 = shalt.err (!%p3906_p8)
}
  0x5f   : > { %s3910_s17 = scalar_lea.vmem %s266_s8, 1024  ;;  %p3918_p3 = scmp.lt.s32.totalorder %s266_s8, %s266_s8 }
  0x60   : > { %p3911_p10 = scmp.ne.s32.totalorder %s266_s8, %s3910_s17  ;;  %p3919_p5 = scmp.lt.s32.totalorder %s3910_s17, %s3910_s17 }
  0x62   : > { %p3913_p12 = pnand %p3911_p10, %p4151_p13  ;;  %p3920_p7 = por %p3919_p5, %p3918_p3 }
  0x64   : > { %p3914_p0 = pneg %p3913_p12 }
  0x66   : > { %p3921_p9 = pnand %p3920_p7, %p3914_p0 }
  0x68   : > { %3924 = shalt.err (!%p3921_p9)
}
  0x69   : > { %3428 = dma.hbm_to_vmem [thread:$0]  (!%p4139_p11), %s5295_s6, 1024, %s266_s8, [#allocation9], %s4036_s29, %s4036_s29, %s4037_s10  }
  0x6a   : > { %s4231_s20 = sadd.s32 1, %s4029_s27   ;;  %s32_s12 = sadd.s32 1, %s4025_s26 }
  0x6b   : > { %s29_s11 = ssub.s32 %s4029_s27, %s4231_s20  ;;  %p39_p13 = scmp.ne.s32.totalorder %s4025_s26, %s4021_s25 }
  0x6c   : > { %p30_p1 = scmp.eq.s32.totalorder %s29_s11, 0  ;;  %p40_p2 = scmp.eq.s32.totalorder %s4029_s27, 0 }
  0x6d   : > { %p5309_p4 = scmp.eq.s32.totalorder %s4111_s28, 1  ;;  %p3441_p8 = scmp.lt.s32.totalorder %s4029_s27, 2 }
  0x6e   : > { %s4247_s13 = scalar_select %p30_p1, %s4025_s26, %s32_s12  }
  0x6f   : > { %p4241_p6 = por %p5309_p4, %p39_p13  ;;  %p41_p10 = por %p40_p2, %p39_p13 }
  0x70   : > { %s279_s15 = sand.u32 1, %s4025_s26   ;;  %s3042_s29 = sshll.u32 %s4029_s27, 10 }
  0x71   : > { %s2947_s16 = sshll.u32 %s279_s15, 6  ;;  %s4254_s18 = scalar_lea.hbm %s5289_s0, %s3042_s29 }
  0x72   : > { %s283_s19 = scalar_lea.vmem [#allocation2], %s2947_s16  ;;  %p4258_p11 = pnand %p3441_p8, %p41_p10 }
  0x73   : > { %s290_s21 = sshll.u32 %s283_s19, 4  ;;  %s4262_s17 = scalar_lea.sflag [#allocation3], %s279_s15  ;;  %s4256_s21 = int_to_ptr.vmem [resolvable:$true] %s290_s21 }
  0x74   : > { %s3925_s23 = scalar_lea.hbm %s4254_s18, 1024  ;;  %p3927_p0 = pneg %p4258_p11 }
  0x75   : > { %p3926_p12 = scmp.ne.s32.totalorder %s4254_s18, %s3925_s23  ;;  %s3930_s11 = scalar_lea.hbm %s5289_s0, 2048 }
  0x76   : > { %p3931_p7 = scmp.lt.u32.totalorder %s4254_s18, %s5289_s0  ;;  %p3932_p9 = scmp.lt.u32.totalorder %s3930_s11, %s3925_s23 }
  0x77   : > { %p3928_p3 = pnand %p3927_p0, %p3926_p12  ;;  %p3934_p1 = scmp.lt.u32.totalorder %s3925_s23, %s4254_s18 }
  0x78   : > { %p3933_p13 = por %p3932_p9, %p3931_p7 }
  0x79   : > { %p3929_p5 = pneg %p3928_p3 }
  0x7a   : > { %p3935_p2 = por %p3934_p1, %p3933_p13 }
  0x7c   : > { %p3936_p4 = pnand %p3935_p2, %p3929_p5 }
  0x7e   : > { %3939 = shalt.err (!%p3936_p4)
}
  0x7f   : > { %s3940_s15 = scalar_lea.vmem %s4256_s21, 1024  ;;  %s4039_s10 = smov [#allocation2]  }
  0x80   : > { %p3941_p8 = scmp.ne.s32.totalorder %s4256_s21, %s3940_s15  ;;  %s3945_s8 = sshll.u32 %s4039_s10, 4  ;;  %s3946_s8 = int_to_ptr.vmem [resolvable:$false] %s3945_s8 }
  0x81   : > { %s3947_s19 = scalar_lea.vmem %s3946_s8, 2048  ;;  %p3948_p3 = scmp.lt.s32.totalorder %s4256_s21, %s3946_s8 }
  0x82   : > { %p3943_p10 = pnand %p3941_p8, %p3927_p0  ;;  %p3949_p7 = scmp.lt.s32.totalorder %s3947_s19, %s3940_s15 }
  0x84   : > { %p3944_p12 = pneg %p3943_p10  ;;  %p3950_p9 = por %p3949_p7, %p3948_p3 }
  0x86   : > { %p3951_p13 = pnand %p3950_p9, %p3944_p12 }
  0x88   : > { %3954 = shalt.err (!%p3951_p13)
}
  0x89   : > { %s4040_s23 = smov 128   ;;  %s4041_s14 = smov 8  }
  0x8a   : > { %3432 = dma.hbm_to_vmem [thread:$0]  (!%p4258_p11), %s4254_s18, 1024, %s4256_s21, %s4262_s17, %s4040_s23, %s4040_s23, %s4041_s14  }
  0x8b   : > { %p5312_p0 = scmp.ne.s32.totalorder %s5306_s9, 0 }
  0x8c   : > { %s4293_s12 = sand.u32 (!%p5312_p0), 1, %s4021_s25   ;;  %p5313_p5 = scmp.ne.s32.totalorder (!%p5312_p0), %s5303_s30, 0 }
  0x8d   : > { %302 = sbr.rel (%p5312_p0) target bundleno = 4134 (0x1026), region = 48  ;;  %s2951_s11 = sshll.u32 (!%p5312_p0), %s4293_s12, 6 }
  0x8e   : > { %s305_s16 = scalar_lea.sflag (!%p5312_p0), [#allocation3], %s4293_s12  ;;  %s4299_s29 = scalar_lea.vmem (!%p5312_p0), [#allocation2], %s2951_s11 }
  0x94   : > { %4000 = dma.done.wait (%p5313_p5), %s305_s16, 1024  }
  0x95   : > { %4002 = vsyncadd (%p5313_p5), %s305_s16, 4294966272  ;;  %p5314_p11 = scmp.eq.s32.totalorder %s4111_s28, 0 }
  0x97   : > { %4004 = dma.done.wait (%p5314_p11), [#allocation6], 4096   ;;  %p5315_p1 = pmov %p5314_p11 }
  0x99   : > { %4006 = vsyncadd (%p5315_p1), [#allocation6], 4294963200  ;;  %p5316_p2 = pmov %p5315_p1 }
  0x9a   : > { %p5317_p4 = pmov %p5315_p1 }
  0x9b   : > { %4008 = dma.done.wait (%p5316_p2), [#allocation9], 2048  }
  0x9c   : > { %4010 = vsyncadd (%p5317_p4), [#allocation9], 4294965248  ;;  %v356_v0 = vld [vmem:[%s4299_s29] sm:$0xff]  ;;  %v358_v1 = vld [vmem:[%s4299_s29 + $0x10] sm:$0xff]  ;;  %v4042_v63 = vmov 0   ;;  %vm809_vm0 = vcmask 261120  }
  0x9d   : > { %365 = vadd.xlane.f32.xlu0 %v356_v0  ;;  %369 = vadd.xlane.f32.xlu1 %v358_v1  ;;  %v357_v2 = vld [vmem:[%s4299_s29 + $0x8] sm:$0xff]  ;;  %v359_v3 = vld [vmem:[%s4299_s29 + $0x18] sm:$0xff]  ;;  %v360_v4 = vld [vmem:[%s4299_s29 + $0x20] sm:$0xff]  ;;  %vm899_vm1 = vcmask 523264   ;;  %s4043_s22 = smov 96   ;;  %s4044_s17 = smov 64  }
  0x9e   : > { %v361_v5 = vld [vmem:[%s4299_s29 + $0x28] sm:$0xff]  ;;  %v362_v6 = vld [vmem:[%s4299_s29 + $0x30] sm:$0xff]  ;;  %v363_v7 = vld [vmem:[%s4299_s29 + $0x38] sm:$0xff]  ;;  %691 = vmatprep.mubr.bf16.mxu0 %v4042_v63  ;;  %s4045_s15 = smov 32   ;;  %vm2051_vm2 = vcmask 785408   ;;  %s354_s19 = scalar_lea.vmem [#allocation11], %s2951_s11 }
  0x9f   : > { %v3556_v8 = vld [vmem:[#allocation5 + $0x4] ss:$12 sps:$4 sm:$0xff]   ;;  %v3558_v9 = vld [vmem:[#allocation5] ss:$12 sps:$4 sm:$0xff]   ;;  %v3559_v10 = vld [vmem:[#allocation5 + $0x1c] ss:$12 sps:$4 sm:$0xff]  }
  0xa0   : > { %v3561_v11 = vld [vmem:[#allocation5 + $0x8] ss:$12 sps:$4 sm:$0xff]   ;;  %659 = vmatprep.subr.bf16.mxu0 %v3556_v8  ;;  %v3562_v44 = vld [vmem:[#allocation5 + $0x18] ss:$12 sps:$4 sm:$0xff]   ;;  %v3565_v46 = vld [vmem:[#allocation5 + $0x20] ss:$12 sps:$4 sm:$0xff]  }
  0xa1   : > { %367 = vadd.xlane.f32.xlu0 %v357_v2  ;;  %371 = vadd.xlane.f32.xlu1 %v359_v3  ;;  %v3563_v45 = vld [vmem:[#allocation5 + $0x34] ss:$12 sps:$4 sm:$0xff]   ;;  %v3566_v47 = vld [vmem:[#allocation5 + $0x30] ss:$12 sps:$4 sm:$0xff]   ;;  %v3567_v48 = vld [vmem:[#allocation5 + $0x4c] ss:$12 sps:$4 sm:$0xff]  }
  0xa2   : > { %660 = vmatpush1.bf16.msra.mxu0 %v3558_v9  ;;  %3156 = vmatprep.subr.bf16.mxu1 %v3561_v11  ;;  %v3569_v49 = vld [vmem:[#allocation5 + $0x38] ss:$12 sps:$4 sm:$0xff]   ;;  %v3570_v50 = vld [vmem:[#allocation5 + $0x48] ss:$12 sps:$4 sm:$0xff]   ;;  %v3573_v52 = vld [vmem:[#allocation5 + $0x50] ss:$12 sps:$4 sm:$0xff]  }
  0xa3   : > { %661 = vmatprep.subr.bf16.mxu0 %v3559_v10  ;;  %3157 = vmatpush3.bf16.msra.mxu1 %v3561_v11  ;;  %v3571_v51 = vld [vmem:[#allocation5 + $0x64] ss:$12 sps:$4 sm:$0xff]   ;;  %v3574_v53 = vld [vmem:[#allocation5 + $0x60] ss:$12 sps:$4 sm:$0xff]   ;;  %v3575_v54 = vld [vmem:[#allocation5 + $0x7c] ss:$12 sps:$4 sm:$0xff]  }
  0xa4   : > { %3158 = vmatprep.subr.bf16.mxu1 %v3565_v46  ;;  %v3577_v55 = vld [vmem:[#allocation5 + $0x68] ss:$12 sps:$4 sm:$0xff]   ;;  %v3578_v56 = vld [vmem:[#allocation5 + $0x78] ss:$12 sps:$4 sm:$0xff]   ;;  %v3581_v58 = vld [vmem:[#allocation5 + $0x80] ss:$12 sps:$4 sm:$0xff]  }
  0xa5   : > { %373 = vadd.xlane.f32.xlu0 %v360_v4  ;;  %375 = vadd.xlane.f32.xlu1 %v361_v5  ;;  %v3579_v57 = vld [vmem:[#allocation5 + $0x94] ss:$12 sps:$4 sm:$0xff]   ;;  %v3582_v59 = vld [vmem:[#allocation5 + $0x90] ss:$12 sps:$4 sm:$0xff]   ;;  %v3583_v60 = vld [vmem:[#allocation5 + $0xac] ss:$12 sps:$4 sm:$0xff]  }
  0xa6   : > { %662 = vmatpush1.bf16.msra.mxu0 %v3562_v44  ;;  %v3585_v61 = vld [vmem:[#allocation5 + $0x98] ss:$12 sps:$4 sm:$0xff]   ;;  %v3586_v62 = vld [vmem:[#allocation5 + $0xa8] ss:$12 sps:$4 sm:$0xff]   ;;  %s2829_s23 = sshll.u32 %s354_s19, 4  ;;  %s3043_s14 = sshll.u32 %s4111_s28, 10  ;;  %s5237_s23 = int_to_ptr.vmem [resolvable:$true] %s2829_s23 }
  0xa7   : > { %663 = vmatprep.subr.bf16.mxu0 %v3563_v45  ;;  %3159 = vmatpush3.bf16.msra.mxu1 %v3565_v46  ;;  %s5244_s28 = scalar_lea.hbm %s5296_s7, %s3043_s14  ;;  %s3955_s30 = scalar_lea.vmem %s5237_s23, 1024 }
  0xa8   : > { %3160 = vmatprep.subr.bf16.mxu1 %v3569_v49  ;;  %p3956_p8 = scmp.ne.s32.totalorder %s5237_s23, %s3955_s30  ;;  %s4047_s9 = smov [#allocation11]  }
  0xa9   : > { %377 = vadd.xlane.f32.xlu0 %v362_v6  ;;  %379 = vadd.xlane.f32.xlu1 %v363_v7  ;;  %s3959_s18 = sshll.u32 %s4047_s9, 4  ;;  %s3960_s18 = int_to_ptr.vmem [resolvable:$false] %s3959_s18 }
  0xaa   : > { %664 = vmatpush1.bf16.msra.mxu0 %v3566_v47  ;;  %p3957_p10 = pnand %p3956_p8, %p4241_p6  ;;  %s3961_s21 = scalar_lea.vmem %s3960_s18, 2048 }
  0xab   : > { %665 = vmatprep.subr.bf16.mxu0 %v3567_v48  ;;  %3161 = vmatpush3.bf16.msra.mxu1 %v3569_v49  ;;  %p3962_p3 = scmp.lt.s32.totalorder %s5237_s23, %s3960_s18  ;;  %p3963_p7 = scmp.lt.s32.totalorder %s3961_s21, %s3955_s30 }
  0xac   : > { %3162 = vmatprep.subr.bf16.mxu1 %v3573_v52  ;;  %p3958_p12 = pneg %p3957_p10 }
  0xad   : > { %p3964_p9 = por %p3963_p7, %p3962_p3 }
  0xae   : > { %666 = vmatpush1.bf16.msra.mxu0 %v3570_v50 }
  0xaf   : > { %667 = vmatprep.subr.bf16.mxu0 %v3571_v51  ;;  %3163 = vmatpush3.bf16.msra.mxu1 %v3573_v52  ;;  %p3965_p13 = pnand %p3964_p9, %p3958_p12 }
  0xb0   : > { %3164 = vmatprep.subr.bf16.mxu1 %v3577_v55 }
  0xb2   : > { %668 = vmatpush1.bf16.msra.mxu0 %v3574_v53 }
  0xb3   : > { %669 = vmatprep.subr.bf16.mxu0 %v3575_v54  ;;  %3165 = vmatpush3.bf16.msra.mxu1 %v3577_v55 }
  0xb4   : > { %3166 = vmatprep.subr.bf16.mxu1 %v3581_v58 }
  0xb6   : > { %670 = vmatpush1.bf16.msra.mxu0 %v3578_v56 }
  0xb7   : > { %671 = vmatprep.subr.bf16.mxu0 %v3579_v57  ;;  %3167 = vmatpush3.bf16.msra.mxu1 %v3581_v58 }
  0xb8   : > { %3168 = vmatprep.subr.bf16.mxu1 %v3585_v61 }
  0xba   : > { %672 = vmatpush1.bf16.msra.mxu0 %v3582_v59 }
  0xbb   : > { %673 = vmatprep.subr.bf16.mxu0 %v3583_v60  ;;  %3169 = vmatpush3.bf16.msra.mxu1 %v3585_v61 }
  0xbe   : > { %674 = vmatpush1.bf16.msra.mxu0 %v3586_v62 }
 0x12a   : > { %v366_v12 = vpop.xlane.xlu0 %365  ;;  %v370_v13 = vpop.xlane.xlu1 %369 }
 0x12b   : > { %v382_v14 = vmul.f32 0.0078125, %v366_v12  ;;  %v384_v15 = vmul.f32 0.0078125, %v370_v13 }
 0x12d   : > { %v4321_v16 = vsub.f32 %v356_v0, %v382_v14  ;;  %v4323_v17 = vsub.f32 %v358_v1, %v384_v15  ;;  %v3587_v0 = vld [vmem:[#allocation5 + $0xb0] ss:$12 sps:$4 sm:$0xff]  }
 0x12e   : > { %v368_v18 = vpop.xlane.xlu0 %367  ;;  %v372_v19 = vpop.xlane.xlu1 %371  ;;  %3170 = vmatprep.subr.bf16.mxu1 %v3587_v0 }
 0x12f   : > { %v383_v20 = vmul.f32 0.0078125, %v368_v18  ;;  %v398_v21 = vmul.f32 %v4321_v16, %v4321_v16  ;;  %v385_v22 = vmul.f32 0.0078125, %v372_v19  ;;  %v400_v23 = vmul.f32 %v4323_v17, %v4323_v17  ;;  %3171 = vmatpush3.bf16.msra.mxu1 %v3587_v0 }
 0x131   : > { %406 = vadd.xlane.f32.xlu0 %v398_v21  ;;  %v4329_v24 = vsub.f32 %v357_v2, %v383_v20  ;;  %v4331_v25 = vsub.f32 %v359_v3, %v385_v22 }
 0x132   : > { %v374_v26 = vpop.xlane.xlu0 %373  ;;  %v376_v27 = vpop.xlane.xlu1 %375 }
 0x133   : > { %v386_v28 = vmul.f32 0.0078125, %v374_v26  ;;  %v399_v29 = vmul.f32 %v4329_v24, %v4329_v24  ;;  %v387_v30 = vmul.f32 0.0078125, %v376_v27  ;;  %v401_v31 = vmul.f32 %v4331_v25, %v4331_v25  ;;  %v364_v27 = vld [vmem:[%s5290_s1] sm:$0xff] }
 0x135   : > { %410 = vadd.xlane.f32.xlu0 %v400_v23  ;;  %408 = vadd.xlane.f32.xlu1 %v399_v29  ;;  %v4337_v32 = vsub.f32 %v360_v4, %v386_v28  ;;  %v4339_v33 = vsub.f32 %v361_v5, %v387_v30 }
 0x136   : > { %v378_v34 = vpop.xlane.xlu0 %377  ;;  %v380_v35 = vpop.xlane.xlu1 %379 }
 0x137   : > { %v388_v36 = vmul.f32 0.0078125, %v378_v34  ;;  %v402_v37 = vmul.f32 %v4337_v32, %v4337_v32  ;;  %v389_v38 = vmul.f32 0.0078125, %v380_v35  ;;  %v403_v39 = vmul.f32 %v4339_v33, %v4339_v33 }
 0x139   : > { %412 = vadd.xlane.f32.xlu1 %v401_v31  ;;  %414 = vadd.xlane.f32.xlu0 %v402_v37  ;;  %v4345_v40 = vsub.f32 %v362_v6, %v388_v36  ;;  %v4347_v41 = vsub.f32 %v363_v7, %v389_v38  ;;  %v454_v6 = vlaneseq }
 0x13b   : > { %v404_v42 = vmul.f32 %v4345_v40, %v4345_v40  ;;  %v405_v43 = vmul.f32 %v4347_v41, %v4347_v41  ;;  %v4354_v13 = vshrl.u32 %v454_v6, 7 }
 0x13d   : > { %416 = vadd.xlane.f32.xlu1 %v403_v39  ;;  %418 = vadd.xlane.f32.xlu0 %v404_v42  ;;  %v456_v22 = vsub.s32 0, %v4354_v13  ;;  %v468_v36 = vsub.s32 1, %v4354_v13 }
 0x13f   : > { %v457_v35 = vrot.slane %v364_v27, %v456_v22  ;;  %v469_v45 = vrot.slane %v364_v27, %v468_v36 }
 0x141   : > { %420 = vadd.xlane.f32.xlu1 %v405_v43 }
 0x1be   : > { %v407_v1 = vpop.xlane.xlu0 %406 }
 0x1bf   : > { %v422_v2 = vmul.f32 0.0078125, %v407_v1 }
 0x1c1   : > { %v430_v3 = vadd.f32 1e-05, %v422_v2 }
 0x1c2   : > { %v409_v4 = vpop.xlane.xlu1 %408  ;;  %v411_v5 = vpop.xlane.xlu0 %410 }
 0x1c3   : > { %3612 = vrsqrt.f32 %v430_v3  ;;  %v423_v7 = vmul.f32 0.0078125, %v409_v4  ;;  %v424_v8 = vmul.f32 0.0078125, %v411_v5 }
 0x1c5   : > { %v431_v9 = vadd.f32 1e-05, %v423_v7  ;;  %v432_v10 = vadd.f32 1e-05, %v424_v8  ;;  %v526_v7 = vsub.s32 2, %v4354_v13 }
 0x1c6   : > { %v413_v11 = vpop.xlane.xlu1 %412  ;;  %v415_v12 = vpop.xlane.xlu0 %414 }
 0x1c7   : > { %3614 = vrsqrt.f32 %v431_v9  ;;  %v425_v14 = vmul.f32 0.0078125, %v413_v11  ;;  %v426_v15 = vmul.f32 0.0078125, %v415_v12 }
 0x1c8   : > { %3616 = vrsqrt.f32 %v432_v10 }
 0x1c9   : > { %v433_v18 = vadd.f32 1e-05, %v425_v14  ;;  %v434_v19 = vadd.f32 1e-05, %v426_v15 }
 0x1ca   : > { %v417_v20 = vpop.xlane.xlu1 %416  ;;  %v419_v21 = vpop.xlane.xlu0 %418 }
 0x1cb   : > { %3618 = vrsqrt.f32 %v433_v18  ;;  %v427_v23 = vmul.f32 0.0078125, %v417_v20  ;;  %v428_v26 = vmul.f32 0.0078125, %v419_v21 }
 0x1cc   : > { %3620 = vrsqrt.f32 %v434_v19 }
 0x1cd   : > { %v3613_v28 = vpop.eup %3612  ;;  %v435_v29 = vadd.f32 1e-05, %v427_v23  ;;  %v436_v30 = vadd.f32 1e-05, %v428_v26 }
 0x1ce   : > { %v421_v31 = vpop.xlane.xlu1 %420  ;;  %v446_v34 = vmul.f32 %v3613_v28, %v4321_v16 }
 0x1cf   : > { %3622 = vrsqrt.f32 %v435_v29  ;;  %v429_v37 = vmul.f32 0.0078125, %v421_v31 }
 0x1d0   : > { %3624 = vrsqrt.f32 %v436_v30  ;;  %v458_v44 = vmul.f32 %v457_v35, %v446_v34 }
 0x1d1   : > { %v3615_v38 = vpop.eup %3614  ;;  %v437_v39 = vadd.f32 1e-05, %v429_v37 }
 0x1d2   : > { %v3617_v42 = vpop.eup %3616  ;;  %v447_v43 = vmul.f32 %v3615_v38, %v4329_v24  ;;  %v470_v50 = vadd.f32 %v469_v45, %v458_v44 }
 0x1d3   : > { %3626 = vrsqrt.f32 %v437_v39  ;;  %v448_v46 = vmul.f32 %v3617_v42, %v4323_v17 }
 0x1d4   : > { %v459_v47 = vmul.f32 %v457_v35, %v447_v43 }
 0x1d5   : > { %v3619_v16 = vpop.eup %3618  ;;  %v460_v48 = vmul.f32 %v457_v35, %v448_v46 }
 0x1d6   : > { %v3621_v49 = vpop.eup %3620  ;;  %v471_v51 = vadd.f32 %v469_v45, %v459_v47  ;;  %v449_v52 = vmul.f32 %v3619_v16, %v4331_v25 }
 0x1d7   : > { %v450_v53 = vmul.f32 %v3621_v49, %v4337_v32  ;;  %v472_v57 = vadd.f32 %v469_v45, %v460_v48 }
 0x1d8   : > { %v478_v54 = vpack.c.bf16 %v471_v51, %v470_v50  ;;  %v461_v55 = vmul.f32 %v457_v35, %v449_v52 }
 0x1d9   : > { %v3623_v56 = vpop.eup %3622  ;;  %v462_v59 = vmul.f32 %v457_v35, %v450_v53 }
 0x1da   : > { %v3625_v24 = vpop.eup %3624  ;;  %692 = vmatmul.mubr.bf16.vlgmr.msra.gmra.mrb[0].mxu0 %v478_v54  ;;  %3172 = vmatprep.mubr.bf16.mxu1 %v478_v54  ;;  %v473_v58 = vadd.f32 %v469_v45, %v461_v55  ;;  %v451_v17 = vmul.f32 %v3623_v56, %v4339_v33 }
 0x1db   : > { %701 = vmatprep.mubr.bf16.mxu0 %v4042_v63  ;;  %v452_v60 = vmul.f32 %v3625_v24, %v4345_v40  ;;  %v474_v32 = vadd.f32 %v469_v45, %v462_v59  ;;  %v514_v40 = vld [vmem:[%s5291_s2] sm:$0x7] }
 0x1dc   : > { %v479_v61 = vpack.c.bf16 %v473_v58, %v472_v57  ;;  %v463_v62 = vmul.f32 %v457_v35, %v451_v17  ;;  %v4382_v9 = vrot.slane %v514_v40, %v468_v36  ;;  %v527_v15 = vrot.slane %v514_v40, %v526_v7 }
 0x1dd   : > { %v3627_v25 = vpop.eup %3626  ;;  %v464_v2 = vmul.f32 %v457_v35, %v452_v60 }
 0x1de   : > { %3173 = vmatmul.mubr.bf16.vlgmr.msra.gmra.mrb[0].mxu1 %v479_v61  ;;  %v475_v0 = vadd.f32 %v469_v45, %v463_v62  ;;  %v453_v1 = vmul.f32 %v3627_v25, %v4347_v41  ;;  %v4379_v41 = vrot.slane %v514_v40, %v456_v22 }
 0x1df   : > { %v476_v5 = vadd.f32 %v469_v45, %v464_v2 }
 0x1e0   : > { %v480_v3 = vpack.c.bf16 %v475_v0, %v474_v32  ;;  %v465_v4 = vmul.f32 %v457_v35, %v453_v1 }
 0x1e2   : > { %702 = vmatmul.mubr.bf16.gmra.mrb[4].mxu0 %v479_v61  ;;  %3176 = vmatprep.mubr.bf16.mxu1 %v480_v3  ;;  %v477_v33 = vadd.f32 %v469_v45, %v465_v4 }
 0x1e3   : > { %711 = vmatprep.mubr.bf16.mxu0 %v4042_v63 }
 0x1e4   : > { %v481_v6 = vpack.c.bf16 %v477_v33, %v476_v5 }
 0x1e6   : > { %3177 = vmatmul.mubr.bf16.gmra.mrb[4].mxu1 %v481_v6 }
 0x1ea   : > { %712 = vmatmul.mubr.bf16.gmra.mrb[8].mxu0 %v480_v3 }
 0x1eb   : > { %721 = vmatprep.mubr.bf16.mxu0 %v4042_v63 }
 0x1f2   : > { %722 = vmatmul.mubr.bf16.gmra.mrb[12].mxu0 %v481_v6 }
 0x2ad   : > { %v693_v8 = vpop.f32.mrb[0].mxu0 }
 0x2ae   : > { %v694_v10 = vadd.f32 %v693_v8, %v4379_v41  ;;  %v695_v11 = vpop.f32.mrb[1].mxu0 }
 0x2af   : > { %v697_v12 = vpop.f32.mrb[2].mxu0  ;;  %v696_v18 = vadd.f32 %v695_v11, %v4382_v9 }
 0x2b0   : > { %v698_v63 = vadd.f32 %v697_v12, %v4379_v41  ;;  %v699_v14 = vpop.f32.mrb[3].mxu0 }
 0x2b1   : > { %v700_v19 = vadd.f32 %v699_v14, %v4382_v9  ;;  %v3174_v20 = vpop.f32.mrb[0].mxu1 }
 0x2b2   : > { %v4390_v21 = vpack.c.bf16 %v698_v63, %v694_v10  ;;  %v766_v22 = vpop.f32.mrb[1].mxu1  ;;  %v775_v27 = vadd.f32 %v3174_v20, %v527_v15 }
 0x2b3   : > { %v4392_v23 = vpack.c.bf16 %v700_v19, %v696_v18  ;;  %v3175_v26 = vpop.f32.mrb[2].mxu1  ;;  %v767_v30 = vadd.f32 %v766_v22, %v527_v15 }
 0x2b4   : > { %v778_v28 = vadd.f32 %v3175_v26, %v527_v15  ;;  %v769_v29 = vpop.f32.mrb[3].mxu1  ;;  %3188 = vmatprep.mubr.msk.bf16.mxu0 %vm809_vm0, %v4390_v21 }
 0x2b5   : > { %v770_v31 = vadd.f32 %v769_v29, %v527_v15  ;;  %v703_v34 = vpop.f32.mrb[4].mxu0  ;;  %3380 = vmatprep.subr.msk.bf16.mxu0 %vm809_vm0, %v4392_v23  ;;  %v823_v35 = vsel %vm809_vm0, %v4392_v23, 0 }
 0x2b6   : > { %v4400_v36 = vpack.c.bf16 %v778_v28, %v775_v27  ;;  %v704_v37 = vadd.f32 %v703_v34, %v4379_v41  ;;  %v705_v38 = vpop.f32.mrb[5].mxu0  ;;  %3181 = vmatpush3.bf16.xpose.msra.mxu0 %v823_v35 }
 0x2b7   : > { %v4403_v39 = vpack.c.bf16 %v770_v31, %v767_v30  ;;  %v707_v42 = vpop.f32.mrb[6].mxu0  ;;  %v706_v45 = vadd.f32 %v705_v38, %v4382_v9 }
 0x2b8   : > { %v708_v43 = vadd.f32 %v707_v42, %v4379_v41  ;;  %v709_v44 = vpop.f32.mrb[7].mxu0 }
 0x2b9   : > { %v710_v46 = vadd.f32 %v709_v44, %v4382_v9  ;;  %v3178_v47 = vpop.f32.mrb[4].mxu1  ;;  %3196 = vmatprep.subr.bf16.mxu1 %v4403_v39 }
 0x2ba   : > { %v4409_v16 = vpack.c.bf16 %v708_v43, %v704_v37  ;;  %v782_v48 = vpop.f32.mrb[5].mxu1  ;;  %3197 = vmatpush3.bf16.msra.mxu1 %v4403_v39  ;;  %v791_v51 = vadd.f32 %v3178_v47, %v527_v15 }
 0x2bb   : > { %v4412_v49 = vpack.c.bf16 %v710_v46, %v706_v45  ;;  %v3179_v50 = vpop.f32.mrb[6].mxu1  ;;  %3198 = vmatprep.subr.bf16.mxu1 %v4400_v36  ;;  %v783_v54 = vadd.f32 %v782_v48, %v527_v15 }
 0x2bc   : > { %v794_v52 = vadd.f32 %v3179_v50, %v527_v15  ;;  %v785_v53 = vpop.f32.mrb[7].mxu1 }
 0x2bd   : > { %v786_v55 = vadd.f32 %v785_v53, %v527_v15  ;;  %v713_v56 = vpop.f32.mrb[8].mxu0  ;;  %3381 = vmatprep.subr.msk.bf16.mxu0 %vm809_vm0, %v4412_v49  ;;  %v826_v57 = vsel %vm809_vm0, %v4412_v49, 0 }
 0x2be   : > { %v4419_v24 = vpack.c.bf16 %v794_v52, %v791_v51  ;;  %v714_v58 = vadd.f32 %v713_v56, %v4379_v41  ;;  %v715_v17 = vpop.f32.mrb[9].mxu0  ;;  %3183 = vmatpush3.bf16.xpose.msra.mxu0 %v826_v57  ;;  %3199 = vmatpush3.bf16.msra.mxu1 %v4400_v36 }
 0x2bf   : > { %v4423_v59 = vpack.c.bf16 %v786_v55, %v783_v54  ;;  %v717_v60 = vpop.f32.mrb[10].mxu0  ;;  %v716_v25 = vadd.f32 %v715_v17, %v4382_v9 }
 0x2c0   : > { %v718_v61 = vadd.f32 %v717_v60, %v4379_v41  ;;  %v719_v62 = vpop.f32.mrb[11].mxu0 }
 0x2c1   : > { %v720_v32 = vadd.f32 %v719_v62, %v4382_v9  ;;  %3200 = vmatprep.subr.bf16.mxu1 %v4423_v59 }
 0x2c2   : > { %v4429_v0 = vpack.c.bf16 %v718_v61, %v714_v58  ;;  %3201 = vmatpush3.bf16.msra.mxu1 %v4423_v59 }
 0x2c3   : > { %v4432_v1 = vpack.c.bf16 %v720_v32, %v716_v25  ;;  %3202 = vmatprep.subr.bf16.mxu1 %v4419_v24 }
 0x2c5   : > { %v723_v2 = vpop.f32.mrb[12].mxu0  ;;  %3382 = vmatprep.subr.msk.bf16.mxu0 %vm809_vm0, %v4432_v1  ;;  %v829_v3 = vsel %vm809_vm0, %v4432_v1, 0 }
 0x2c6   : > { %v724_v4 = vadd.f32 %v723_v2, %v4379_v41  ;;  %v725_v5 = vpop.f32.mrb[13].mxu0  ;;  %3185 = vmatpush3.bf16.xpose.msra.mxu0 %v829_v3  ;;  %3203 = vmatpush3.bf16.msra.mxu1 %v4419_v24 }
 0x2c7   : > { %v727_v33 = vpop.f32.mrb[14].mxu0  ;;  %v726_v8 = vadd.f32 %v725_v5, %v4382_v9 }
 0x2c8   : > { %v728_v6 = vadd.f32 %v727_v33, %v4379_v41  ;;  %v729_v40 = vpop.f32.mrb[15].mxu0 }
 0x2c9   : > { %v730_v10 = vadd.f32 %v729_v40, %v4382_v9 }
 0x2ca   : > { %v4444_v11 = vpack.c.bf16 %v728_v6, %v724_v4 }
 0x2cb   : > { %v4446_v12 = vpack.c.bf16 %v730_v10, %v726_v8 }
 0x2cd   : > { %3383 = vmatprep.subr.msk.bf16.mxu0 %vm809_vm0, %v4446_v12  ;;  %v832_v63 = vsel %vm809_vm0, %v4446_v12, 0 }
 0x2ce   : > { %3187 = vmatpush3.bf16.xpose.msra.mxu0 %v832_v63 }
 0x2d5   : > { %3189 = vmatmul.mubr.msk.bf16.vlgmr.msra.gmra.mrb[16].mxu0 %vm809_vm0, %v4409_v16 }
 0x2d6   : > { %3192 = vmatprep.mubr.msk.bf16.mxu0 %vm809_vm0, %v4429_v0 }
 0x2dd   : > { %3193 = vmatmul.mubr.msk.bf16.gmra.mrb[20].mxu0 %vm809_vm0, %v4444_v11 }
 0x3a8   : > { %v3190_v41 = vpop.f32.mrb[16].mxu0 }
 0x3a9   : > { %v868_v9 = vpop.f32.mrb[17].mxu0  ;;  %v906_v20 = vsel %vm899_vm1, %v3190_v41, -inf }
 0x3aa   : > { %v3191_v14 = vpop.f32.mrb[18].mxu0  ;;  %v900_v15 = vsel %vm899_vm1, %v868_v9, -inf }
 0x3ab   : > { %901 = vmax.xlane.f32.xlu0 %v900_v15  ;;  %v871_v18 = vpop.f32.mrb[19].mxu0  ;;  %v909_v19 = vsel %vm899_vm1, %v3191_v14, -inf }
 0x3ac   : > { %910 = vmax.xlane.f32.xlu1 %v909_v19  ;;  %v903_v22 = vsel %vm899_vm1, %v871_v18, -inf }
 0x3af   : > { %907 = vmax.xlane.f32.xlu0 %v906_v20 }
 0x3b0   : > { %904 = vmax.xlane.f32.xlu1 %v903_v22  ;;  %v3194_v26 = vpop.f32.mrb[20].mxu0 }
 0x3b1   : > { %v884_v27 = vpop.f32.mrb[21].mxu0  ;;  %v918_v34 = vsel %vm899_vm1, %v3194_v26, -inf }
 0x3b2   : > { %v3195_v28 = vpop.f32.mrb[22].mxu0  ;;  %v912_v29 = vsel %vm899_vm1, %v884_v27, -inf }
 0x3b3   : > { %913 = vmax.xlane.f32.xlu0 %v912_v29  ;;  %v887_v30 = vpop.f32.mrb[23].mxu0  ;;  %v921_v31 = vsel %vm899_vm1, %v3195_v28, -inf }
 0x3b4   : > { %922 = vmax.xlane.f32.xlu1 %v921_v31  ;;  %v915_v35 = vsel %vm899_vm1, %v887_v30, -inf }
 0x3b7   : > { %919 = vmax.xlane.f32.xlu0 %v918_v34 }
 0x3b8   : > { %916 = vmax.xlane.f32.xlu1 %v915_v35 }
 0x3c9   : > { %1087 = vrot.lane.b32.xlu1 %v4412_v49, %s4043_s22 }
 0x3cd   : > { %1089 = vrot.lane.b32.xlu1 %v4432_v1, %s4043_s22 }
 0x438   : > { %v902_v37 = vpop.xlane.xlu0 %901 }
 0x439   : > { %v911_v38 = vpop.xlane.xlu1 %910  ;;  %v924_v43 = vsub.f32 %v868_v9, %v902_v37 }
 0x43a   : > { %v927_v42 = vsub.f32 %v3191_v14, %v911_v38 }
 0x43b   : > { %v932_v50 = vmul.f32 1.442695, %v924_v43 }
 0x43c   : > { %v938_v44 = vmul.f32 1.442695, %v927_v42  ;;  %v908_v45 = vpop.xlane.xlu0 %907 }
 0x43d   : > { %v926_v46 = vsub.f32 %v3190_v41, %v908_v45  ;;  %v905_v47 = vpop.xlane.xlu1 %904 }
 0x43e   : > { %3628 = vpow2.f32 %v938_v44  ;;  %v925_v48 = vsub.f32 %v871_v18, %v905_v47 }
 0x43f   : > { %v936_v51 = vmul.f32 1.442695, %v926_v46 }
 0x440   : > { %v934_v52 = vmul.f32 1.442695, %v925_v48  ;;  %v914_v61 = vpop.xlane.xlu0 %913 }
 0x441   : > { %3630 = vpow2.f32 %v936_v51  ;;  %v923_v62 = vpop.xlane.xlu1 %922  ;;  %v928_v33 = vsub.f32 %v884_v27, %v914_v61 }
 0x442   : > { %3632 = vpow2.f32 %v934_v52  ;;  %v931_v25 = vsub.f32 %v3195_v28, %v923_v62 }
 0x443   : > { %3634 = vpow2.f32 %v932_v50  ;;  %v940_v8 = vmul.f32 1.442695, %v928_v33 }
 0x444   : > { %v920_v32 = vpop.xlane.xlu0 %919  ;;  %v946_v4 = vmul.f32 1.442695, %v931_v25 }
 0x445   : > { %v917_v2 = vpop.xlane.xlu1 %916  ;;  %v930_v3 = vsub.f32 %v3194_v26, %v920_v32 }
 0x446   : > { %v929_v5 = vsub.f32 %v887_v30, %v917_v2  ;;  %3636 = vpow2.f32 %v946_v4 }
 0x447   : > { %v944_v6 = vmul.f32 1.442695, %v930_v3 }
 0x448   : > { %v4470_v53 = vpop.eup %3628  ;;  %v942_v40 = vmul.f32 1.442695, %v929_v5 }
 0x449   : > { %v957_v54 = vsel %vm899_vm1, %v4470_v53, 0.0  ;;  %3638 = vpow2.f32 %v944_v6  ;;  %v1088_v20 = vpop.permute.xlu1 %1087 }
 0x44a   : > { %958 = vadd.xlane.f32.xlu1 %v957_v54  ;;  %3640 = vpow2.f32 %v942_v40  ;;  %v1109_v51 = vsel %vm809_vm0, %v1088_v20, 0 }
 0x44b   : > { %v4474_v55 = vpop.eup %3630  ;;  %3642 = vpow2.f32 %v940_v8 }
 0x44c   : > { %v4476_v56 = vpop.eup %3632  ;;  %v954_v57 = vsel %vm899_vm1, %v4474_v55, 0.0 }
 0x44d   : > { %v4480_v58 = vpop.eup %3634  ;;  %955 = vadd.xlane.f32.xlu0 %v954_v57  ;;  %v951_v17 = vsel %vm899_vm1, %v4476_v56, 0.0  ;;  %v1090_v22 = vpop.permute.xlu1 %1089 }
 0x44e   : > { %952 = vadd.xlane.f32.xlu1 %v951_v17  ;;  %v948_v60 = vsel %vm899_vm1, %v4480_v58, 0.0  ;;  %v1112_v52 = vsel %vm809_vm0, %v1090_v22, 0 }
 0x450   : > { %v4490_v10 = vpop.eup %3636 }
 0x451   : > { %949 = vadd.xlane.f32.xlu0 %v948_v60  ;;  %v969_v41 = vsel %vm899_vm1, %v4490_v10, 0.0 }
 0x453   : > { %v4492_v63 = vpop.eup %3638 }
 0x454   : > { %v4496_v9 = vpop.eup %3640  ;;  %v966_v14 = vsel %vm899_vm1, %v4492_v63, 0.0 }
 0x455   : > { %v4500_v15 = vpop.eup %3642  ;;  %v963_v18 = vsel %vm899_vm1, %v4496_v9, 0.0 }
 0x456   : > { %v960_v19 = vsel %vm899_vm1, %v4500_v15, 0.0 }
 0x45f   : > { %1375 = vrot.lane.b32.xlu1 %v4392_v23, %s4044_s17 }
 0x467   : > { %1085 = vrot.lane.b32.xlu0 %v4392_v23, %s4043_s22 }
 0x483   : > { %970 = vadd.xlane.f32.xlu1 %v969_v41 }
 0x486   : > { %967 = vadd.xlane.f32.xlu0 %v966_v14 }
 0x487   : > { %964 = vadd.xlane.f32.xlu1 %v963_v18 }
 0x48a   : > { %961 = vadd.xlane.f32.xlu0 %v960_v19 }
 0x498   : > { %1377 = vrot.lane.b32.xlu1 %v4412_v49, %s4044_s17 }
 0x49c   : > { %1075 = vrot.lane.b32.xlu1 %v4409_v16, %s4043_s22 }
 0x4a0   : > { %1091 = vrot.lane.b32.xlu0 %v4446_v12, %s4043_s22  ;;  %1077 = vrot.lane.b32.xlu1 %v4429_v0, %s4043_s22 }
 0x4a4   : > { %1073 = vrot.lane.b32.xlu0 %v4390_v21, %s4043_s22  ;;  %1381 = vrot.lane.b32.xlu1 %v4446_v12, %s4044_s17 }
 0x4a8   : > { %1379 = vrot.lane.b32.xlu0 %v4432_v1, %s4044_s17  ;;  %1369 = vrot.lane.b32.xlu1 %v4409_v16, %s4044_s17 }
 0x4ac   : > { %1079 = vrot.lane.b32.xlu0 %v4444_v11, %s4043_s22  ;;  %1373 = vrot.lane.b32.xlu1 %v4444_v11, %s4044_s17 }
 0x4b0   : > { %1367 = vrot.lane.b32.xlu0 %v4390_v21, %s4044_s17 }
 0x4b4   : > { %1371 = vrot.lane.b32.xlu0 %v4429_v0, %s4044_s17 }
 0x4d7   : > { %v959_v26 = vpop.xlane.xlu1 %958 }
 0x4da   : > { %v956_v27 = vpop.xlane.xlu0 %955 }
 0x4db   : > { %v953_v28 = vpop.xlane.xlu1 %952  ;;  %3644 = vrcp.f32 %v956_v27 }
 0x4dc   : > { %3646 = vrcp.f32 %v953_v28 }
 0x4dd   : > { %3648 = vrcp.f32 %v959_v26 }
 0x4de   : > { %v950_v29 = vpop.xlane.xlu0 %949 }
 0x4df   : > { %3650 = vrcp.f32 %v950_v29  ;;  %v1376_v30 = vpop.permute.xlu1 %1375 }
 0x4e0   : > { %3388 = vmatprep.subr.msk.bf16.mxu0 %vm809_vm0, %v1376_v30  ;;  %v1396_v31 = vsel %vm809_vm0, %v1376_v30, 0 }
 0x4e1   : > { %3245 = vmatpush3.bf16.xpose.msra.mxu0 %v1396_v31 }
 0x4e2   : > { %v1086_v34 = vpop.permute.xlu0 %1085 }
 0x4e3   : > { %3384 = vmatprep.subr.msk.bf16.mxu1 %vm809_vm0, %v1086_v34  ;;  %v1106_v50 = vsel %vm809_vm0, %v1086_v34, 0 }
 0x4e5   : > { %v3645_v35 = vpop.eup %3644 }
 0x4e6   : > { %v3647_v37 = vpop.eup %3646  ;;  %v982_v43 = vmul.f32 %v3645_v35, %v4474_v55 }
 0x4e7   : > { %v3649_v38 = vpop.eup %3648  ;;  %v981_v45 = vmul.f32 %v3647_v37, %v4476_v56 }
 0x4e8   : > { %v983_v46 = vmul.f32 %v3649_v38, %v4470_v53 }
 0x4e9   : > { %v3651_v42 = vpop.eup %3650 }
 0x4ea   : > { %v980_v44 = vmul.f32 %v3651_v42, %v4480_v58  ;;  %v989_v48 = vpack.c.bf16 %v983_v46, %v982_v43 }
 0x4ec   : > { %v988_v47 = vpack.c.bf16 %v981_v45, %v980_v44 }
 0x4ee   : > { %3204 = vmatprep.mubr.msk.bf16.mxu1 %vm899_vm1, %v988_v47 }
 0x4ef   : > { %3205 = vmatmul.mubr.msk.bf16.vlgmr.msra.gmra.mrb[8].mxu1 %vm899_vm1, %v989_v48 }
 0x4f0   : > { %3213 = vmatpush3.bf16.xpose.msra.mxu1 %v1106_v50 }
 0x4f1   : > { %3385 = vmatprep.subr.msk.bf16.mxu1 %vm809_vm0, %v1088_v20 }
 0x4f8   : > { %3215 = vmatpush3.bf16.xpose.msra.mxu1 %v1109_v51 }
 0x4f9   : > { %3386 = vmatprep.subr.msk.bf16.mxu1 %vm809_vm0, %v1090_v22 }
 0x500   : > { %3217 = vmatpush3.bf16.xpose.msra.mxu1 %v1112_v52 }
 0x510   : > { %v971_v53 = vpop.xlane.xlu1 %970 }
 0x513   : > { %v968_v54 = vpop.xlane.xlu0 %967 }
 0x514   : > { %v965_v55 = vpop.xlane.xlu1 %964  ;;  %3652 = vrcp.f32 %v968_v54 }
 0x515   : > { %3654 = vrcp.f32 %v965_v55 }
 0x516   : > { %3656 = vrcp.f32 %v971_v53 }
 0x517   : > { %v962_v56 = vpop.xlane.xlu0 %961 }
 0x518   : > { %3658 = vrcp.f32 %v962_v56  ;;  %v1378_v57 = vpop.permute.xlu1 %1377 }
 0x519   : > { %3389 = vmatprep.subr.msk.bf16.mxu0 %vm809_vm0, %v1378_v57  ;;  %v1399_v58 = vsel %vm809_vm0, %v1378_v57, 0 }
 0x51a   : > { %3247 = vmatpush3.bf16.xpose.msra.mxu0 %v1399_v58 }
 0x51b   : > { %v1092_v17 = vpop.permute.xlu0 %1091 }
 0x51c   : > { %3387 = vmatprep.subr.msk.bf16.mxu1 %vm809_vm0, %v1092_v17  ;;  %v1076_v60 = vpop.permute.xlu1 %1075  ;;  %v1115_v61 = vsel %vm809_vm0, %v1092_v17, 0 }
 0x51d   : > { %3219 = vmatpush3.bf16.xpose.msra.mxu1 %v1115_v61 }
 0x51e   : > { %v3653_v62 = vpop.eup %3652 }
 0x51f   : > { %v1074_v25 = vpop.permute.xlu0 %1073  ;;  %v3655_v32 = vpop.eup %3654  ;;  %v986_v5 = vmul.f32 %v3653_v62, %v4492_v63 }
 0x520   : > { %v1078_v2 = vpop.permute.xlu1 %1077  ;;  %v3657_v3 = vpop.eup %3656  ;;  %v985_v40 = vmul.f32 %v3655_v32, %v4496_v9 }
 0x521   : > { %v987_v14 = vmul.f32 %v3657_v3, %v4490_v10 }
 0x522   : > { %v3659_v4 = vpop.eup %3658 }
 0x523   : > { %v1380_v33 = vpop.permute.xlu0 %1379  ;;  %v984_v6 = vmul.f32 %v3659_v4, %v4500_v15  ;;  %v991_v19 = vpack.c.bf16 %v987_v14, %v986_v5 }
 0x524   : > { %3390 = vmatprep.subr.msk.bf16.mxu0 %vm809_vm0, %v1380_v33  ;;  %v1382_v8 = vpop.permute.xlu1 %1381  ;;  %v1402_v41 = vsel %vm809_vm0, %v1380_v33, 0 }
 0x525   : > { %3249 = vmatpush3.bf16.xpose.msra.mxu0 %v1402_v41  ;;  %v990_v18 = vpack.c.bf16 %v985_v40, %v984_v6  ;;  %v1405_v9 = vsel %vm809_vm0, %v1382_v8, 0 }
 0x526   : > { %3391 = vmatprep.subr.msk.bf16.mxu0 %vm809_vm0, %v1382_v8 }
 0x527   : > { %v1080_v20 = vpop.permute.xlu0 %1079  ;;  %3208 = vmatprep.mubr.msk.bf16.mxu1 %vm899_vm1, %v990_v18 }
 0x528   : > { %3209 = vmatmul.mubr.msk.bf16.gmra.mrb[12].mxu1 %vm899_vm1, %v991_v19  ;;  %v1370_v10 = vpop.permute.xlu1 %1369 }
 0x529   : > { %3220 = vmatprep.mubr.msk.bf16.mxu1 %vm809_vm0, %v1074_v25 }
 0x52b   : > { %v1368_v63 = vpop.permute.xlu0 %1367 }
 0x52c   : > { %3252 = vmatprep.mubr.msk.bf16.mxu0 %vm809_vm0, %v1368_v63  ;;  %v1374_v22 = vpop.permute.xlu1 %1373 }
 0x52d   : > { %3251 = vmatpush3.bf16.xpose.msra.mxu0 %v1405_v9 }
 0x52f   : > { %v1372_v15 = vpop.permute.xlu0 %1371 }
 0x530   : > { %3221 = vmatmul.mubr.msk.bf16.vlgmr.msra.gmra.mrb[16].mxu1 %vm809_vm0, %v1076_v60 }
 0x531   : > { %3224 = vmatprep.mubr.msk.bf16.mxu1 %vm809_vm0, %v1078_v2 }
 0x534   : > { %3253 = vmatmul.mubr.msk.bf16.vlgmr.msra.gmra.mrb[24].mxu0 %vm809_vm0, %v1370_v10 }
 0x535   : > { %3256 = vmatprep.mubr.msk.bf16.mxu0 %vm809_vm0, %v1372_v15 }
 0x538   : > { %3225 = vmatmul.mubr.msk.bf16.gmra.mrb[20].mxu1 %vm809_vm0, %v1080_v20 }
 0x53c   : > { %3257 = vmatmul.mubr.msk.bf16.gmra.mrb[28].mxu0 %vm809_vm0, %v1374_v22 }
 0x5c2   : > { %v4566_v26 = vpop.f32.mrb[8].mxu1 }
 0x5c3   : > { %v4568_v27 = vpop.f32.mrb[9].mxu1 }
 0x5c4   : > { %v4570_v28 = vpop.f32.mrb[10].mxu1 }
 0x5c5   : > { %v4572_v29 = vpop.f32.mrb[11].mxu1 }
 0x5fb   : > { %v4574_v30 = vpop.f32.mrb[12].mxu1 }
 0x5fc   : > { %v4576_v31 = vpop.f32.mrb[13].mxu1 }
 0x5fd   : > { %v4578_v34 = vpop.f32.mrb[14].mxu1 }
 0x5fe   : > { %v4580_v35 = vpop.f32.mrb[15].mxu1 }
 0x603   : > { %v4582_v37 = vpop.f32.mrb[16].mxu1 }
 0x604   : > { %v4584_v38 = vpop.f32.mrb[17].mxu1  ;;  %v1188_v2 = vsel %vm899_vm1, %v4582_v37, -inf }
 0x605   : > { %v4586_v42 = vpop.f32.mrb[18].mxu1  ;;  %v1182_v4 = vsel %vm899_vm1, %v4584_v38, -inf }
 0x606   : > { %v4588_v43 = vpop.f32.mrb[19].mxu1  ;;  %v1191_v5 = vsel %vm899_vm1, %v4586_v42, -inf }
 0x607   : > { %v3254_v44 = vpop.f32.mrb[24].mxu0  ;;  %v1185_v3 = vsel %vm899_vm1, %v4588_v43, -inf }
 0x608   : > { %v1441_v45 = vpop.f32.mrb[25].mxu0  ;;  %v1478_v54 = vsel %vm899_vm1, %v3254_v44, -inf }
 0x609   : > { %v3255_v46 = vpop.f32.mrb[26].mxu0  ;;  %v1472_v47 = vsel %vm899_vm1, %v1441_v45, -inf }
 0x60a   : > { %1473 = vmax.xlane.f32.xlu0 %v1472_v47  ;;  %v1444_v48 = vpop.f32.mrb[27].mxu0  ;;  %v1481_v57 = vsel %vm899_vm1, %v3255_v46, -inf }
 0x60b   : > { %v4591_v50 = vpop.f32.mrb[20].mxu1  ;;  %v1475_v51 = vsel %vm899_vm1, %v1444_v48, -inf }
 0x60c   : > { %v4594_v52 = vpop.f32.mrb[21].mxu1  ;;  %1476 = vmax.xlane.f32.xlu1 %v1475_v51  ;;  %v1200_v33 = vsel %vm899_vm1, %v4591_v50, -inf }
 0x60d   : > { %v4596_v53 = vpop.f32.mrb[22].mxu1  ;;  %v1194_v6 = vsel %vm899_vm1, %v4594_v52, -inf }
 0x60e   : > { %v4599_v55 = vpop.f32.mrb[23].mxu1  ;;  %1479 = vmax.xlane.f32.xlu0 %v1478_v54 }
 0x60f   : > { %v4601_v56 = vpop.f32.mrb[28].mxu0 }
 0x610   : > { %1482 = vmax.xlane.f32.xlu1 %v1481_v57  ;;  %v4604_v58 = vpop.f32.mrb[29].mxu0  ;;  %v1490_v25 = vsel %vm899_vm1, %v4601_v56, -inf }
 0x611   : > { %v4606_v17 = vpop.f32.mrb[30].mxu0  ;;  %v1484_v60 = vsel %vm899_vm1, %v4604_v58, -inf }
 0x612   : > { %1485 = vmax.xlane.f32.xlu0 %v1484_v60  ;;  %v4610_v61 = vpop.f32.mrb[31].mxu0  ;;  %v1493_v32 = vsel %vm899_vm1, %v4606_v17, -inf }
 0x613   : > { %v1487_v62 = vsel %vm899_vm1, %v4610_v61, -inf }
 0x614   : > { %1488 = vmax.xlane.f32.xlu1 %v1487_v62 }
 0x616   : > { %1491 = vmax.xlane.f32.xlu0 %v1490_v25 }
 0x618   : > { %1494 = vmax.xlane.f32.xlu1 %v1493_v32 }
 0x629   : > { %1280 = vrot.lane.b32.xlu1 %v4400_v36, %s4043_s22 }
 0x62c   : > { %1278 = vrot.lane.b32.xlu0 %v4403_v39, %s4043_s22 }
 0x64b   : > { %1189 = vmax.xlane.f32.xlu0 %v1188_v2 }
 0x64d   : > { %1186 = vmax.xlane.f32.xlu1 %v1185_v3 }
 0x64f   : > { %1183 = vmax.xlane.f32.xlu0 %v1182_v4 }
 0x653   : > { %1192 = vmax.xlane.f32.xlu0 %v1191_v5 }
 0x657   : > { %1201 = vmax.xlane.f32.xlu0 %v1200_v33 }
 0x65b   : > { %1195 = vmax.xlane.f32.xlu0 %v1194_v6 }
 0x671   : > { %1282 = vrot.lane.b32.xlu0 %v4423_v59, %s4043_s22 }
 0x697   : > { %v1474_v40 = vpop.xlane.xlu0 %1473 }
 0x698   : > { %v1496_v8 = vsub.f32 %v1441_v45, %v1474_v40 }
 0x699   : > { %v1477_v41 = vpop.xlane.xlu1 %1476 }
 0x69a   : > { %v1504_v14 = vmul.f32 1.442695, %v1496_v8  ;;  %v1497_v18 = vsub.f32 %v1444_v48, %v1477_v41 }
 0x69b   : > { %v1480_v19 = vpop.xlane.xlu0 %1479 }
 0x69c   : > { %3660 = vpow2.f32 %v1504_v14  ;;  %v1506_v20 = vmul.f32 1.442695, %v1497_v18  ;;  %v1498_v63 = vsub.f32 %v3254_v44, %v1480_v19  ;;  %v1203_v18 = vsel %vm899_vm1, %v4596_v53, -inf }
 0x69d   : > { %v1483_v9 = vpop.xlane.xlu1 %1482 }
 0x69e   : > { %3662 = vpow2.f32 %v1506_v20  ;;  %v1508_v10 = vmul.f32 1.442695, %v1498_v63  ;;  %v1499_v15 = vsub.f32 %v3255_v46, %v1483_v9  ;;  %v1197_v9 = vsel %vm899_vm1, %v4599_v55, -inf }
 0x69f   : > { %v4636_v22 = vpop.xlane.xlu0 %1485 }
 0x6a0   : > { %3664 = vpow2.f32 %v1508_v10  ;;  %v1510_v47 = vmul.f32 1.442695, %v1499_v15  ;;  %v1500_v51 = vsub.f32 %v4604_v58, %v4636_v22 }
 0x6a1   : > { %v4640_v54 = vpop.xlane.xlu1 %1488 }
 0x6a2   : > { %v1501_v45 = vsub.f32 %v4610_v61, %v4640_v54  ;;  %3666 = vpow2.f32 %v1510_v47 }
 0x6a3   : > { %v4644_v48 = vpop.xlane.xlu0 %1491 }
 0x6a4   : > { %v1502_v44 = vsub.f32 %v4601_v56, %v4644_v48 }
 0x6a5   : > { %v4648_v57 = vpop.xlane.xlu1 %1494 }
 0x6a6   : > { %v4650_v46 = vpop.eup %3660  ;;  %v1503_v60 = vsub.f32 %v4606_v17, %v4648_v57 }
 0x6a7   : > { %v1279_v62 = vpop.permute.xlu0 %1278  ;;  %v1520_v25 = vsel %vm899_vm1, %v4650_v46, 0.0 }
 0x6a8   : > { %v4656_v32 = vpop.eup %3662  ;;  %3228 = vmatprep.subr.bf16.mxu1 %v1279_v62  ;;  %1521 = vadd.xlane.f32.xlu1 %v1520_v25  ;;  %v1518_v58 = vmul.f32 1.442695, %v1503_v60 }
 0x6a9   : > { %3229 = vmatpush3.bf16.msra.mxu1 %v1279_v62  ;;  %v1281_v2 = vpop.permute.xlu1 %1280  ;;  %v1523_v3 = vsel %vm899_vm1, %v4656_v32, 0.0 }
 0x6aa   : > { %v4660_v4 = vpop.eup %3664  ;;  %1524 = vadd.xlane.f32.xlu0 %v1523_v3  ;;  %3230 = vmatprep.subr.bf16.mxu1 %v1281_v2 }
 0x6ab   : > { %v1526_v5 = vsel %vm899_vm1, %v4660_v4, 0.0 }
 0x6ac   : > { %v4664_v33 = vpop.eup %3666 }
 0x6ad   : > { %3231 = vmatpush3.bf16.msra.mxu1 %v1281_v2  ;;  %v1529_v6 = vsel %vm899_vm1, %v4664_v33, 0.0 }
 0x6ae   : > { %1527 = vadd.xlane.f32.xlu0 %v1526_v5 }
 0x6b2   : > { %1530 = vadd.xlane.f32.xlu0 %v1529_v6 }
 0x6b9   : > { %1284 = vrot.lane.b32.xlu1 %v4419_v24, %s4043_s22 }
 0x6d8   : > { %v1190_v40 = vpop.xlane.xlu0 %1189 }
 0x6d9   : > { %v1208_v8 = vsub.f32 %v4582_v37, %v1190_v40 }
 0x6da   : > { %v1187_v3 = vpop.xlane.xlu1 %1186 }
 0x6db   : > { %v1218_v41 = vmul.f32 1.442695, %v1208_v8  ;;  %v1207_v5 = vsub.f32 %v4588_v43, %v1187_v3  ;;  %v1516_v43 = vmul.f32 1.442695, %v1502_v44 }
 0x6dc   : > { %v1184_v14 = vpop.xlane.xlu0 %1183 }
 0x6dd   : > { %3668 = vpow2.f32 %v1218_v41  ;;  %v1206_v19 = vsub.f32 %v4584_v38, %v1184_v14  ;;  %1204 = vmax.xlane.f32.xlu1 %v1203_v18  ;;  %v1216_v8 = vmul.f32 1.442695, %v1207_v5 }
 0x6df   : > { %v1214_v20 = vmul.f32 1.442695, %v1206_v19  ;;  %v1512_v19 = vmul.f32 1.442695, %v1500_v51 }
 0x6e0   : > { %v1193_v63 = vpop.xlane.xlu0 %1192 }
 0x6e1   : > { %3670 = vpow2.f32 %v1214_v20  ;;  %1198 = vmax.xlane.f32.xlu1 %v1197_v9  ;;  %v1209_v2 = vsub.f32 %v4586_v42, %v1193_v63 }
 0x6e3   : > { %v1220_v6 = vmul.f32 1.442695, %v1209_v2 }
 0x6e4   : > { %v1202_v10 = vpop.xlane.xlu0 %1201 }
 0x6e5   : > { %v1212_v40 = vsub.f32 %v4591_v50, %v1202_v10  ;;  %3672 = vpow2.f32 %v1220_v6 }
 0x6e6   : > { %3674 = vpow2.f32 %v1216_v8 }
 0x6e7   : > { %v4676_v15 = vpop.eup %3668  ;;  %v1226_v14 = vmul.f32 1.442695, %v1212_v40 }
 0x6e8   : > { %v1196_v37 = vpop.xlane.xlu0 %1195  ;;  %v1236_v47 = vsel %vm899_vm1, %v4676_v15, 0.0 }
 0x6e9   : > { %1237 = vadd.xlane.f32.xlu0 %v1236_v47  ;;  %v1210_v41 = vsub.f32 %v4594_v52, %v1196_v37  ;;  %3676 = vpow2.f32 %v1226_v14 }
 0x6eb   : > { %v4680_v62 = vpop.eup %3670  ;;  %v1222_v18 = vmul.f32 1.442695, %v1210_v41 }
 0x6ec   : > { %v1283_v25 = vpop.permute.xlu0 %1282  ;;  %v1230_v38 = vsel %vm899_vm1, %v4680_v62, 0.0 }
 0x6ed   : > { %1231 = vadd.xlane.f32.xlu0 %v1230_v38  ;;  %3232 = vmatprep.subr.bf16.mxu1 %v1283_v25  ;;  %3678 = vpow2.f32 %v1222_v18 }
 0x6ee   : > { %3233 = vmatpush3.bf16.msra.mxu1 %v1283_v25  ;;  %3680 = vpow2.f32 %v1512_v19 }
 0x6ef   : > { %v4697_v42 = vpop.eup %3672  ;;  %3682 = vpow2.f32 %v1516_v43 }
 0x6f0   : > { %v1239_v50 = vsel %vm899_vm1, %v4697_v42, 0.0  ;;  %v4704_v52 = vpop.eup %3674  ;;  %3684 = vpow2.f32 %v1518_v58 }
 0x6f1   : > { %v1233_v51 = vsel %vm899_vm1, %v4704_v52, 0.0 }
 0x6f2   : > { %1566 = vrot.lane.b32.xlu1 %v4400_v36, %s4044_s17 }
 0x6f3   : > { %v4709_v22 = vpop.eup %3676 }
 0x6f4   : > { %v1248_v48 = vsel %vm899_vm1, %v4709_v22, 0.0 }
 0x6f6   : > { %1568 = vrot.lane.b32.xlu1 %v4423_v59, %s4044_s17 }
 0x6f7   : > { %v4713_v20 = vpop.eup %3678 }
 0x6f8   : > { %v1242_v56 = vsel %vm899_vm1, %v4713_v20, 0.0  ;;  %v4719_v44 = vpop.eup %3680 }
 0x6f9   : > { %v1532_v17 = vsel %vm899_vm1, %v4719_v44, 0.0  ;;  %v4723_v57 = vpop.eup %3682 }
 0x6fa   : > { %v1538_v60 = vsel %vm899_vm1, %v4723_v57, 0.0  ;;  %v4727_v63 = vpop.eup %3684 }
 0x6fb   : > { %v1541_v9 = vsel %vm899_vm1, %v4727_v63, 0.0 }
 0x703   : > { %1564 = vrot.lane.b32.xlu0 %v4403_v39, %s4044_s17 }
 0x71a   : > { %1240 = vadd.xlane.f32.xlu1 %v1239_v50 }
 0x71e   : > { %1234 = vadd.xlane.f32.xlu1 %v1233_v51 }
 0x722   : > { %1243 = vadd.xlane.f32.xlu0 %v1242_v56  ;;  %1249 = vadd.xlane.f32.xlu1 %v1248_v48  ;;  %v1514_v48 = vmul.f32 1.442695, %v1501_v45 }
 0x726   : > { %1533 = vadd.xlane.f32.xlu0 %v1532_v17 }
 0x72a   : > { %1539 = vadd.xlane.f32.xlu0 %v1538_v60 }
 0x72e   : > { %1542 = vadd.xlane.f32.xlu0 %v1541_v9 }
 0x735   : > { %v1522_v10 = vpop.xlane.xlu1 %1521 }
 0x736   : > { %3686 = vrcp.f32 %v1522_v10 }
 0x737   : > { %v1525_v37 = vpop.xlane.xlu0 %1524 }
 0x738   : > { %3688 = vrcp.f32 %v1525_v37 }
 0x739   : > { %v1285_v47 = vpop.permute.xlu1 %1284 }
 0x73a   : > { %3234 = vmatprep.subr.bf16.mxu1 %v1285_v47 }
 0x73b   : > { %v1528_v25 = vpop.xlane.xlu0 %1527  ;;  %3235 = vmatpush3.bf16.msra.mxu1 %v1285_v47 }
 0x73c   : > { %3690 = vrcp.f32 %v1528_v25 }
 0x73f   : > { %v1531_v38 = vpop.xlane.xlu0 %1530 }
 0x740   : > { %v3687_v2 = vpop.eup %3686  ;;  %3692 = vrcp.f32 %v1531_v38 }
 0x741   : > { %v4732_v5 = vmul.f32 %v3687_v2, %v4650_v46 }
 0x742   : > { %v3689_v3 = vpop.eup %3688 }
 0x743   : > { %v4735_v6 = vmul.f32 %v3689_v3, %v4656_v32 }
 0x744   : > { %1661 = vrot.lane.b32.xlu0 %v4392_v23, %s4045_s15 }
 0x745   : > { %v1560_v40 = vpack.c.bf16 %v4735_v6, %v4732_v5 }
 0x746   : > { %v3691_v8 = vpop.eup %3690 }
 0x747   : > { %v4744_v14 = vmul.f32 %v3691_v8, %v4660_v4 }
 0x748   : > { %1653 = vrot.lane.b32.xlu0 %v4390_v21, %s4045_s15 }
 0x74a   : > { %v3693_v41 = vpop.eup %3692 }
 0x74b   : > { %v4747_v46 = vmul.f32 %v3693_v41, %v4664_v33 }
 0x74c   : > { %1657 = vrot.lane.b32.xlu0 %v4429_v0, %s4045_s15 }
 0x74d   : > { %v1561_v23 = vpack.c.bf16 %v4747_v46, %v4744_v14 }
 0x76a   : > { %v1205_v32 = vpop.xlane.xlu1 %1204 }
 0x76b   : > { %v1213_v18 = vsub.f32 %v4596_v53, %v1205_v32 }
 0x76d   : > { %v1228_v19 = vmul.f32 1.442695, %v1213_v18 }
 0x76e   : > { %v1199_v43 = vpop.xlane.xlu1 %1198 }
 0x76f   : > { %3694 = vpow2.f32 %v1228_v19  ;;  %v1211_v21 = vsub.f32 %v4599_v55, %v1199_v43 }
 0x771   : > { %v1224_v50 = vmul.f32 1.442695, %v1211_v21 }
 0x772   : > { %v1567_v55 = vpop.permute.xlu1 %1566 }
 0x773   : > { %3696 = vpow2.f32 %v1224_v50 }
 0x774   : > { %3698 = vpow2.f32 %v1514_v48 }
 0x776   : > { %v1238_v4 = vpop.xlane.xlu0 %1237  ;;  %v1569_v17 = vpop.permute.xlu1 %1568 }
 0x779   : > { %v4755_v58 = vpop.eup %3694 }
 0x77a   : > { %v1232_v33 = vpop.xlane.xlu0 %1231  ;;  %v1251_v0 = vsel %vm899_vm1, %v4755_v58, 0.0 }
 0x77b   : > { %1252 = vadd.xlane.f32.xlu1 %v1251_v0 }
 0x77d   : > { %v4759_v51 = vpop.eup %3696 }
 0x77e   : > { %v1565_v56 = vpop.permute.xlu0 %1564  ;;  %v1245_v53 = vsel %vm899_vm1, %v4759_v51, 0.0  ;;  %v4768_v10 = vpop.eup %3698 }
 0x77f   : > { %3260 = vmatprep.subr.bf16.mxu1 %v1565_v56  ;;  %1246 = vadd.xlane.f32.xlu1 %v1245_v53  ;;  %v1535_v47 = vsel %vm899_vm1, %v4768_v10, 0.0 }
 0x790   : > { %1570 = vrot.lane.b32.xlu1 %v4419_v24, %s4044_s17 }
 0x7a7   : > { %v1241_v60 = vpop.xlane.xlu1 %1240 }
 0x7a8   : > { %3700 = vrcp.f32 %v1241_v60 }
 0x7a9   : > { %3702 = vrcp.f32 %v1232_v33 }
 0x7aa   : > { %3704 = vrcp.f32 %v1238_v4 }
 0x7ab   : > { %v1235_v9 = vpop.xlane.xlu1 %1234 }
 0x7ac   : > { %3706 = vrcp.f32 %v1235_v9 }
 0x7b2   : > { %v3701_v37 = vpop.eup %3700 }
 0x7b3   : > { %v3703_v25 = vpop.eup %3702  ;;  %v1265_v61 = vmul.f32 %v3701_v37, %v4697_v42  ;;  %v1250_v42 = vpop.xlane.xlu1 %1249 }
 0x7b4   : > { %1536 = vadd.xlane.f32.xlu1 %v1535_v47  ;;  %v3705_v38 = vpop.eup %3704  ;;  %v1262_v54 = vmul.f32 %v3703_v25, %v4680_v62 }
 0x7b5   : > { %v1264_v3 = vmul.f32 %v3705_v38, %v4676_v15  ;;  %v1244_v15 = vpop.xlane.xlu0 %1243 }
 0x7b6   : > { %v3707_v2 = vpop.eup %3706 }
 0x7b7   : > { %v1263_v45 = vmul.f32 %v3707_v2, %v4704_v52  ;;  %v1271_v41 = vpack.c.bf16 %v1265_v61, %v1264_v3 }
 0x7b9   : > { %v1270_v8 = vpack.c.bf16 %v1263_v45, %v1262_v54  ;;  %v1534_v62 = vpop.xlane.xlu0 %1533 }
 0x7bb   : > { %3236 = vmatprep.mubr.msk.bf16.mxu1 %vm899_vm1, %v1270_v8 }
 0x7bc   : > { %3237 = vmatmul.mubr.msk.bf16.vlgmr.msra.gmra.mrb[24].mxu1 %vm899_vm1, %v1271_v41 }
 0x7bd   : > { %3261 = vmatpush3.bf16.msra.mxu1 %v1565_v56  ;;  %v1540_v52 = vpop.xlane.xlu0 %1539 }
 0x7be   : > { %3262 = vmatprep.subr.bf16.mxu1 %v1567_v55 }
 0x7c1   : > { %3263 = vmatpush3.bf16.msra.mxu1 %v1567_v55 }
 0x7c2   : > { %3264 = vmatprep.subr.bf16.mxu1 %v1569_v17 }
 0x7c5   : > { %3265 = vmatpush3.bf16.msra.mxu1 %v1569_v17  ;;  %1663 = vrot.lane.b32.xlu1 %v4412_v49, %s4045_s15  ;;  %v1543_v49 = vpop.xlane.xlu0 %1542 }
 0x7c9   : > { %1665 = vrot.lane.b32.xlu1 %v4432_v1, %s4045_s15 }
 0x7cd   : > { %1667 = vrot.lane.b32.xlu1 %v4446_v12, %s4045_s15  ;;  %v1662_v12 = vpop.permute.xlu0 %1661 }
 0x7ce   : > { %v1682_v53 = vsel %vm809_vm0, %v1662_v12, 0 }
 0x7d1   : > { %1655 = vrot.lane.b32.xlu1 %v4409_v16, %s4045_s15  ;;  %v1654_v47 = vpop.permute.xlu0 %1653 }
 0x7d5   : > { %1659 = vrot.lane.b32.xlu1 %v4444_v11, %s4045_s15 }
 0x808   : > { %v1253_v32 = vpop.xlane.xlu1 %1252 }
 0x809   : > { %3708 = vrcp.f32 %v1253_v32 }
 0x80a   : > { %3710 = vrcp.f32 %v1244_v15 }
 0x80b   : > { %3712 = vrcp.f32 %v1250_v42 }
 0x80c   : > { %v1247_v18 = vpop.xlane.xlu1 %1246 }
 0x80d   : > { %3714 = vrcp.f32 %v1247_v18 }
 0x80e   : > { %3716 = vrcp.f32 %v1543_v49 }
 0x80f   : > { %3718 = vrcp.f32 %v1534_v62 }
 0x810   : > { %v1571_v1 = vpop.permute.xlu1 %1570  ;;  %3720 = vrcp.f32 %v1540_v52 }
 0x811   : > { %3266 = vmatprep.subr.bf16.mxu1 %v1571_v1 }
 0x812   : > { %3267 = vmatpush3.bf16.msra.mxu1 %v1571_v1 }
 0x813   : > { %3392 = vmatprep.subr.msk.bf16.mxu1 %vm809_vm0, %v1662_v12  ;;  %v3709_v16 = vpop.eup %3708 }
 0x814   : > { %v3711_v19 = vpop.eup %3710  ;;  %v1269_v21 = vmul.f32 %v3709_v16, %v4755_v58 }
 0x815   : > { %v3713_v11 = vpop.eup %3712  ;;  %v1266_v50 = vmul.f32 %v3711_v19, %v4713_v20 }
 0x816   : > { %v1268_v33 = vmul.f32 %v3713_v11, %v4709_v22 }
 0x817   : > { %v3715_v43 = vpop.eup %3714 }
 0x818   : > { %v1267_v4 = vmul.f32 %v3715_v43, %v4759_v51  ;;  %v1273_v56 = vpack.c.bf16 %v1269_v21, %v1268_v33  ;;  %v3717_v5 = vpop.eup %3716 }
 0x81a   : > { %v1272_v0 = vpack.c.bf16 %v1267_v4, %v1266_v50 }
 0x81c   : > { %3240 = vmatprep.mubr.msk.bf16.mxu1 %vm899_vm1, %v1272_v0 }
 0x81d   : > { %3241 = vmatmul.mubr.msk.bf16.gmra.mrb[28].mxu1 %vm899_vm1, %v1273_v56 }
 0x81e   : > { %3268 = vmatprep.mubr.msk.bf16.mxu1 %vm899_vm1, %v1560_v40  ;;  %v3719_v40 = vpop.eup %3718 }
 0x81f   : > { %v3721_v14 = vpop.eup %3720  ;;  %v1556_v51 = vmul.f32 %v3719_v40, %v4719_v44 }
 0x820   : > { %v1558_v17 = vmul.f32 %v3721_v14, %v4723_v57 }
 0x825   : > { %3269 = vmatmul.mubr.msk.bf16.vlgmr.msra.gmra.mrb[32].mxu1 %vm899_vm1, %v1561_v23  ;;  %v1559_v23 = vmul.f32 %v3717_v5, %v4727_v63 }
 0x826   : > { %3277 = vmatpush3.bf16.xpose.msra.mxu1 %v1682_v53 }
 0x827   : > { %v1563_v37 = vpack.c.bf16 %v1559_v23, %v1558_v17 }
 0x841   : > { %v1537_v22 = vpop.xlane.xlu1 %1536 }
 0x842   : > { %3722 = vrcp.f32 %v1537_v22 }
 0x845   : > { %v1664_v20 = vpop.permute.xlu1 %1663 }
 0x846   : > { %v1685_v58 = vsel %vm809_vm0, %v1664_v20, 0  ;;  %3393 = vmatprep.subr.msk.bf16.mxu1 %vm809_vm0, %v1664_v20 }
 0x847   : > { %3279 = vmatpush3.bf16.xpose.msra.mxu1 %v1685_v58 }
 0x849   : > { %v1666_v6 = vpop.permute.xlu1 %1665 }
 0x84a   : > { %3394 = vmatprep.subr.msk.bf16.mxu1 %vm809_vm0, %v1666_v6  ;;  %v1688_v48 = vsel %vm809_vm0, %v1666_v6, 0 }
 0x84c   : > { %v3723_v46 = vpop.eup %3722 }
 0x84d   : > { %v1557_v55 = vmul.f32 %v3723_v46, %v4768_v10  ;;  %v1668_v60 = vpop.permute.xlu1 %1667  ;;  %v1658_v10 = vpop.permute.xlu0 %1657 }
 0x84e   : > { %v1691_v44 = vsel %vm809_vm0, %v1668_v60, 0 }
 0x84f   : > { %3281 = vmatpush3.bf16.xpose.msra.mxu1 %v1688_v48  ;;  %v1562_v9 = vpack.c.bf16 %v1557_v55, %v1556_v51 }
 0x850   : > { %3395 = vmatprep.subr.msk.bf16.mxu1 %vm809_vm0, %v1668_v60 }
 0x851   : > { %3272 = vmatprep.mubr.msk.bf16.mxu1 %vm899_vm1, %v1562_v9  ;;  %v1656_v63 = vpop.permute.xlu1 %1655 }
 0x852   : > { %3273 = vmatmul.mubr.msk.bf16.gmra.mrb[36].mxu1 %vm899_vm1, %v1563_v37 }
 0x853   : > { %3284 = vmatprep.mubr.msk.bf16.mxu1 %vm809_vm0, %v1654_v47 }
 0x855   : > { %v1660_v57 = vpop.permute.xlu1 %1659 }
 0x857   : > { %3283 = vmatpush3.bf16.xpose.msra.mxu1 %v1691_v44 }
 0x85e   : > { %3285 = vmatmul.mubr.msk.bf16.vlgmr.msra.gmra.mrb[40].mxu1 %vm809_vm0, %v1656_v63 }
 0x85f   : > { %3288 = vmatprep.mubr.msk.bf16.mxu1 %vm809_vm0, %v1658_v10 }
 0x866   : > { %3289 = vmatmul.mubr.msk.bf16.gmra.mrb[44].mxu1 %vm809_vm0, %v1660_v57 }
 0x88f   : > { %v4820_v25 = vpop.f32.mrb[24].mxu1 }
 0x890   : > { %v4822_v38 = vpop.f32.mrb[25].mxu1 }
 0x891   : > { %v4824_v2 = vpop.f32.mrb[26].mxu1 }
 0x892   : > { %v3501_v61 = vpack.i.bf16 %v4824_v2, %v4820_v25  ;;  %v4828_v54 = vpop.f32.mrb[27].mxu1 }
 0x893   : > { %v3496_v45 = vpack.i.bf16 %v4828_v54, %v4822_v38 }
 0x8f0   : > { %v4832_v3 = vpop.f32.mrb[28].mxu1 }
 0x8f1   : > { %v4834_v8 = vpop.f32.mrb[29].mxu1 }
 0x8f2   : > { %v4836_v41 = vpop.f32.mrb[30].mxu1 }
 0x8f3   : > { %v3521_v15 = vpack.i.bf16 %v4836_v41, %v4832_v3  ;;  %v4840_v62 = vpop.f32.mrb[31].mxu1 }
 0x8f4   : > { %v3516_v42 = vpack.i.bf16 %v4840_v62, %v4834_v8 }
 0x8f8   : > { %v4844_v52 = vpop.f32.mrb[32].mxu1 }
 0x8f9   : > { %v4846_v32 = vpop.f32.mrb[33].mxu1 }
 0x8fa   : > { %v4848_v49 = vpop.f32.mrb[34].mxu1 }
 0x8fb   : > { %v3511_v18 = vpack.i.bf16 %v4848_v49, %v4844_v52  ;;  %v4852_v1 = vpop.f32.mrb[35].mxu1 }
 0x8fc   : > { %v3506_v12 = vpack.i.bf16 %v4852_v1, %v4846_v32 }
 0x925   : > { %v4856_v16 = vpop.f32.mrb[36].mxu1 }
 0x926   : > { %v4858_v19 = vpop.f32.mrb[37].mxu1 }
 0x927   : > { %v4860_v11 = vpop.f32.mrb[38].mxu1 }
 0x928   : > { %v3541_v43 = vpack.i.bf16 %v4860_v11, %v4856_v16  ;;  %v4864_v21 = vpop.f32.mrb[39].mxu1 }
 0x929   : > { %v3536_v50 = vpack.i.bf16 %v4864_v21, %v4858_v19 }
 0x931   : > { %v3286_v4 = vpop.f32.mrb[40].mxu1 }
 0x932   : > { %v1727_v33 = vpop.f32.mrb[41].mxu1  ;;  %v1764_v20 = vsel %vm899_vm1, %v3286_v4, -inf }
 0x933   : > { %v3287_v0 = vpop.f32.mrb[42].mxu1  ;;  %v1758_v56 = vsel %vm899_vm1, %v1727_v33, -inf }
 0x934   : > { %1759 = vmax.xlane.f32.xlu0 %v1758_v56  ;;  %v1730_v53 = vpop.f32.mrb[43].mxu1  ;;  %v1767_v40 = vsel %vm899_vm1, %v3287_v0, -inf }
 0x935   : > { %v1761_v22 = vsel %vm899_vm1, %v1730_v53, -inf }
 0x936   : > { %1762 = vmax.xlane.f32.xlu1 %v1761_v22 }
 0x938   : > { %1765 = vmax.xlane.f32.xlu0 %v1764_v20 }
 0x939   : > { %v3290_v58 = vpop.f32.mrb[44].mxu1 }
 0x93a   : > { %v1743_v5 = vpop.f32.mrb[45].mxu1  ;;  %v1776_v55 = vsel %vm899_vm1, %v3290_v58, -inf }
 0x93b   : > { %v4871_v6 = vpop.f32.mrb[46].mxu1  ;;  %v1770_v23 = vsel %vm899_vm1, %v1743_v5, -inf }
 0x93c   : > { %1768 = vmax.xlane.f32.xlu0 %v1767_v40  ;;  %v1746_v14 = vpop.f32.mrb[47].mxu1  ;;  %v1779_v51 = vsel %vm899_vm1, %v4871_v6, -inf }
 0x93d   : > { %v1773_v46 = vsel %vm899_vm1, %v1746_v14, -inf }
 0x93e   : > { %1774 = vmax.xlane.f32.xlu1 %v1773_v46 }
 0x940   : > { %1771 = vmax.xlane.f32.xlu0 %v1770_v23 }
 0x942   : > { %1780 = vmax.xlane.f32.xlu1 %v1779_v51 }
 0x944   : > { %1777 = vmax.xlane.f32.xlu0 %v1776_v55 }
 0x9c1   : > { %v1760_v48 = vpop.xlane.xlu0 %1759 }
 0x9c2   : > { %v1782_v17 = vsub.f32 %v1727_v33, %v1760_v48 }
 0x9c3   : > { %v1763_v60 = vpop.xlane.xlu1 %1762 }
 0x9c4   : > { %v1790_v47 = vmul.f32 1.442695, %v1782_v17  ;;  %v1783_v44 = vsub.f32 %v1730_v53, %v1763_v60 }
 0x9c5   : > { %v1766_v9 = vpop.xlane.xlu0 %1765 }
 0x9c6   : > { %v1784_v37 = vsub.f32 %v3286_v4, %v1766_v9  ;;  %v1792_v56 = vmul.f32 1.442695, %v1783_v44 }
 0x9c8   : > { %v1794_v63 = vmul.f32 1.442695, %v1784_v37 }
 0x9c9   : > { %v1769_v10 = vpop.xlane.xlu0 %1768 }
 0x9ca   : > { %3724 = vpow2.f32 %v1794_v63  ;;  %v1785_v57 = vsub.f32 %v3287_v0, %v1769_v10 }
 0x9cb   : > { %3726 = vpow2.f32 %v1790_v47  ;;  %v1775_v44 = vpop.xlane.xlu1 %1774 }
 0x9cc   : > { %v1796_v22 = vmul.f32 1.442695, %v1785_v57 }
 0x9cd   : > { %v1772_v20 = vpop.xlane.xlu0 %1771 }
 0x9ce   : > { %3728 = vpow2.f32 %v1796_v22  ;;  %v1786_v40 = vsub.f32 %v1743_v5, %v1772_v20 }
 0x9cf   : > { %3730 = vpow2.f32 %v1792_v56  ;;  %v1781_v63 = vpop.xlane.xlu1 %1780 }
 0x9d0   : > { %v1798_v33 = vmul.f32 1.442695, %v1786_v40  ;;  %v1789_v10 = vsub.f32 %v4871_v6, %v1781_v63  ;;  %v3595_v63 = vld [vmem:[#allocation7 + $0x38] sm:$0xff]  }
 0x9d1   : > { %v1778_v46 = vpop.xlane.xlu0 %1777 }
 0x9d2   : > { %v1788_v23 = vsub.f32 %v3290_v58, %v1778_v46  ;;  %v1804_v57 = vmul.f32 1.442695, %v1789_v10 }
 0x9d4   : > { %v4879_v51 = vpop.eup %3724  ;;  %v1802_v55 = vmul.f32 1.442695, %v1788_v23 }
 0x9d5   : > { %v1812_v4 = vsel %vm899_vm1, %v4879_v51, 0.0  ;;  %v3727_v53 = vpop.eup %3726 }
 0x9d6   : > { %3732 = vpow2.f32 %v1802_v55  ;;  %1813 = vadd.xlane.f32.xlu0 %v1812_v4  ;;  %v1806_v48 = vsel %vm899_vm1, %v3727_v53, 0.0 }
 0x9d7   : > { %3734 = vpow2.f32 %v1798_v33 }
 0x9d8   : > { %v4883_v0 = vpop.eup %3728  ;;  %3736 = vpow2.f32 %v1804_v57 }
 0x9d9   : > { %v1815_v5 = vsel %vm899_vm1, %v4883_v0, 0.0  ;;  %v3731_v17 = vpop.eup %3730 }
 0x9da   : > { %1807 = vadd.xlane.f32.xlu0 %v1806_v48  ;;  %1816 = vadd.xlane.f32.xlu1 %v1815_v5  ;;  %v1809_v58 = vsel %vm899_vm1, %v3731_v17, 0.0 }
 0x9de   : > { %1810 = vadd.xlane.f32.xlu1 %v1809_v58  ;;  %v3589_v58 = vld [vmem:[#allocation7 + $0x8] sm:$0xff]  }
 0x9e0   : > { %v4889_v60 = vpop.eup %3732 }
 0x9e1   : > { %v1824_v9 = vsel %vm899_vm1, %v4889_v60, 0.0  ;;  %v4893_v37 = vpop.eup %3734 }
 0x9e2   : > { %1825 = vadd.xlane.f32.xlu0 %v1824_v9  ;;  %v1818_v47 = vsel %vm899_vm1, %v4893_v37, 0.0  ;;  %v3590_v9 = vld [vmem:[#allocation7 + $0x10] sm:$0xff]  }
 0x9e6   : > { %1819 = vadd.xlane.f32.xlu0 %v1818_v47  ;;  %v3591_v47 = vld [vmem:[#allocation7 + $0x18] sm:$0xff]  }
 0x9ef   : > { %1852 = vrot.lane.b32.xlu1 %v4400_v36, %s4045_s15  ;;  %v1787_v36 = vsub.f32 %v1746_v14, %v1775_v44  ;;  %v3594_v44 = vld [vmem:[#allocation7 + $0x30] sm:$0xff]  }
 0x9f3   : > { %1854 = vrot.lane.b32.xlu1 %v4423_v59, %s4045_s15  ;;  %v3737_v59 = vpop.eup %3736 }
 0x9f4   : > { %v1827_v38 = vsel %vm899_vm1, %v3737_v59, 0.0 }
 0x9fc   : > { %1850 = vrot.lane.b32.xlu0 %v4403_v39, %s4045_s15  ;;  %v1800_v39 = vmul.f32 1.442695, %v1787_v36 }
 0x9fe   : > { %3738 = vpow2.f32 %v1800_v39 }
 0xa00   : > { %3497 = vrot.lane.b32.xlu0 %v3496_v45, %s4045_s15 }
 0xa04   : > { %3507 = vrot.lane.b32.xlu0 %v3506_v12, %s4044_s17 }
 0xa08   : > { %3517 = vrot.lane.b32.xlu0 %v3516_v42, %s4045_s15  ;;  %v3739_v54 = vpop.eup %3738 }
 0xa09   : > { %v1821_v45 = vsel %vm899_vm1, %v3739_v54, 0.0 }
 0xa17   : > { %1828 = vadd.xlane.f32.xlu1 %v1827_v38 }
 0xa1b   : > { %1822 = vadd.xlane.f32.xlu1 %v1821_v45 }
 0xa2c   : > { %1856 = vrot.lane.b32.xlu1 %v4419_v24, %s4045_s15 }
 0xa30   : > { %3502 = vrot.lane.b32.xlu1 %v3501_v61, %s4045_s15 }
 0xa34   : > { %3512 = vrot.lane.b32.xlu1 %v3511_v18, %s4044_s17 }
 0xa38   : > { %3522 = vrot.lane.b32.xlu1 %v3521_v15, %s4045_s15 }
 0xa63   : > { %v1814_v8 = vpop.xlane.xlu0 %1813 }
 0xa67   : > { %v1808_v62 = vpop.xlane.xlu0 %1807  ;;  %v1817_v42 = vpop.xlane.xlu1 %1816 }
 0xa68   : > { %3740 = vrcp.f32 %v1808_v62 }
 0xa6b   : > { %v1811_v24 = vpop.xlane.xlu1 %1810 }
 0xa6c   : > { %3742 = vrcp.f32 %v1811_v24 }
 0xa6d   : > { %3744 = vrcp.f32 %v1817_v42 }
 0xa6e   : > { %3746 = vrcp.f32 %v1814_v8 }
 0xa6f   : > { %v1826_v32 = vpop.xlane.xlu0 %1825  ;;  %v1853_v61 = vpop.permute.xlu1 %1852 }
 0xa72   : > { %v3741_v25 = vpop.eup %3740 }
 0xa73   : > { %v1820_v1 = vpop.xlane.xlu0 %1819  ;;  %v1838_v6 = vmul.f32 %v3741_v25, %v3727_v53  ;;  %v1855_v3 = vpop.permute.xlu1 %1854 }
 0xa76   : > { %v3743_v2 = vpop.eup %3742 }
 0xa77   : > { %v1851_v12 = vpop.permute.xlu0 %1850  ;;  %v1839_v52 = vmul.f32 %v3743_v2, %v3731_v17  ;;  %v3745_v15 = vpop.eup %3744 }
 0xa78   : > { %3292 = vmatprep.subr.bf16.mxu0 %v1851_v12  ;;  %v3747_v14 = vpop.eup %3746  ;;  %v1841_v56 = vmul.f32 %v3745_v15, %v4883_v0 }
 0xa79   : > { %3293 = vmatpush3.bf16.msra.mxu0 %v1851_v12  ;;  %v1846_v49 = vpack.c.bf16 %v1839_v52, %v1838_v6  ;;  %v1840_v20 = vmul.f32 %v3747_v14, %v4879_v51  ;;  %v3588_v51 = vld [vmem:[#allocation7] sm:$0xff]  }
 0xa7a   : > { %3294 = vmatprep.subr.bf16.mxu0 %v1853_v61 }
 0xa7b   : > { %3300 = vmatprep.mubr.msk.bf16.mxu0 %vm899_vm1, %v1846_v49  ;;  %v1847_v40 = vpack.c.bf16 %v1841_v56, %v1840_v20 }
 0xa7d   : > { %3295 = vmatpush3.bf16.msra.mxu0 %v1853_v61 }
 0xa7e   : > { %3296 = vmatprep.subr.bf16.mxu0 %v1855_v3 }
 0xa81   : > { %3297 = vmatpush3.bf16.msra.mxu0 %v1855_v3 }
 0xaa4   : > { %v1829_v41 = vpop.xlane.xlu1 %1828 }
 0xaa5   : > { %3748 = vrcp.f32 %v1829_v41 }
 0xaa6   : > { %3750 = vrcp.f32 %v1820_v1  ;;  %v3498_v1 = vpop.permute.xlu0 %3497 }
 0xaa7   : > { %3752 = vrcp.f32 %v1826_v32  ;;  %v3499_v16 = vunpack.i.l.bf16 %v3498_v1  ;;  %v3500_v11 = vunpack.i.h.bf16 %v3498_v1 }
 0xaa8   : > { %v1823_v18 = vpop.xlane.xlu1 %1822 }
 0xaa9   : > { %3754 = vrcp.f32 %v1823_v18  ;;  %v2035_v52 = vsel %vm809_vm0, %v4568_v27, %v3499_v16  ;;  %v2036_v3 = vsel %vm809_vm0, %v4572_v29, %v3500_v11 }
 0xaaa   : > { %v3508_v2 = vpop.permute.xlu0 %3507 }
 0xaab   : > { %v3510_v49 = vunpack.i.h.bf16 %v3508_v2 }
 0xaac   : > { %v1857_v22 = vpop.permute.xlu1 %1856 }
 0xaad   : > { %3298 = vmatprep.subr.bf16.mxu0 %v1857_v22  ;;  %v2044_v29 = vsel %vm899_vm1, %v2036_v3, %v3510_v49  ;;  %v3807_v3 = vld [vmem:[%s4299_s29 + $0x10] sm:$0xff] }
 0xaae   : > { %3299 = vmatpush3.bf16.msra.mxu0 %v1857_v22  ;;  %v3518_v12 = vpop.permute.xlu0 %3517 }
 0xaaf   : > { %v3749_v46 = vpop.eup %3748  ;;  %3308 = vmatprep.subr.bf16.mxu0 %v3588_v51 }
 0xab0   : > { %v3751_v23 = vpop.eup %3750  ;;  %v1845_v4 = vmul.f32 %v3749_v46, %v3737_v59  ;;  %v3503_v32 = vpop.permute.xlu1 %3502 }
 0xab1   : > { %3301 = vmatmul.mubr.msk.bf16.vlgmr.msra.gmra.mrb[32].mxu0 %vm899_vm1, %v1847_v40  ;;  %v3753_v33 = vpop.eup %3752  ;;  %v1842_v53 = vmul.f32 %v3751_v23, %v4893_v37  ;;  %v3592_v37 = vld [vmem:[#allocation7 + $0x20] sm:$0xff]   ;;  %v3505_v6 = vunpack.i.h.bf16 %v3503_v32  ;;  %v3504_v19 = vunpack.i.l.bf16 %v3503_v32 }
 0xab2   : > { %v1844_v5 = vmul.f32 %v3753_v33, %v4889_v60  ;;  %3309 = vmatpush3.bf16.msra.mxu0 %v3588_v51  ;;  %v3593_v60 = vld [vmem:[#allocation7 + $0x28] sm:$0xff]   ;;  %v3520_v33 = vunpack.i.h.bf16 %v3518_v12 }
 0xab3   : > { %v3755_v55 = vpop.eup %3754  ;;  %3310 = vmatprep.subr.bf16.mxu0 %v3589_v58  ;;  %v2038_v18 = vsel %vm809_vm0, %v4570_v28, %v3505_v6  ;;  %v2037_v14 = vsel %vm809_vm0, %v4566_v26, %v3504_v19  ;;  %v3519_v28 = vunpack.i.l.bf16 %v3518_v12  ;;  %v3805_v19 = vld [vmem:[%s4299_s29] sm:$0xff] }
 0xab4   : > { %v1843_v48 = vmul.f32 %v3755_v55, %v3739_v54  ;;  %v1849_v0 = vpack.c.bf16 %v1845_v4, %v1844_v5  ;;  %v3513_v25 = vpop.permute.xlu1 %3512 }
 0xab5   : > { %v3515_v21 = vunpack.i.h.bf16 %v3513_v25 }
 0xab6   : > { %v1848_v17 = vpack.c.bf16 %v1843_v48, %v1842_v53  ;;  %3311 = vmatpush3.bf16.msra.mxu0 %v3589_v58 }
 0xab7   : > { %3312 = vmatprep.subr.bf16.mxu0 %v3590_v9  ;;  %v2046_v27 = vsel %vm899_vm1, %v2038_v18, %v3515_v21 }
 0xab8   : > { %3304 = vmatprep.mubr.msk.bf16.mxu0 %vm899_vm1, %v1848_v17  ;;  %v3523_v61 = vpop.permute.xlu1 %3522 }
 0xab9   : > { %3305 = vmatmul.mubr.msk.bf16.gmra.mrb[36].mxu0 %vm899_vm1, %v1849_v0  ;;  %v3525_v17 = vunpack.i.h.bf16 %v3523_v61  ;;  %v3524_v0 = vunpack.i.l.bf16 %v3523_v61 }
 0xaba   : > { %3313 = vmatpush3.bf16.msra.mxu0 %v3590_v9 }
 0xabb   : > { %3314 = vmatprep.subr.bf16.mxu0 %v3591_v47 }
 0xabe   : > { %3315 = vmatpush3.bf16.msra.mxu0 %v3591_v47 }
 0xabf   : > { %3316 = vmatprep.subr.bf16.mxu0 %v3592_v37 }
 0xac2   : > { %3317 = vmatpush3.bf16.msra.mxu0 %v3592_v37 }
 0xac3   : > { %3318 = vmatprep.subr.bf16.mxu0 %v3593_v60 }
 0xac6   : > { %3319 = vmatpush3.bf16.msra.mxu0 %v3593_v60 }
 0xac7   : > { %3320 = vmatprep.subr.bf16.mxu0 %v3594_v44 }
 0xaca   : > { %3321 = vmatpush3.bf16.msra.mxu0 %v3594_v44  ;;  %v2040_v44 = vsel %vm809_vm0, %v4580_v35, %v3520_v33 }
 0xacb   : > { %3322 = vmatprep.subr.bf16.mxu0 %v3595_v63 }
 0xace   : > { %3323 = vmatpush3.bf16.msra.mxu0 %v3595_v63  ;;  %v2039_v63 = vsel %vm809_vm0, %v4576_v31, %v3519_v28  ;;  %v3811_v28 = vld [vmem:[%s4299_s29 + $0x38] sm:$0xff] }
 0xb84   : > { %v3302_v10 = vpop.f32.mrb[32].mxu0 }
 0xb85   : > { %v1908_v36 = vpop.f32.mrb[33].mxu0 }
 0xb86   : > { %v3303_v57 = vpop.f32.mrb[34].mxu0 }
 0xb87   : > { %v3526_v39 = vpack.i.bf16 %v3303_v57, %v3302_v10  ;;  %v1911_v59 = vpop.f32.mrb[35].mxu0  ;;  %v2041_v57 = vsel %vm809_vm0, %v4574_v30, %v3524_v0 }
 0xb88   : > { %v3531_v38 = vpack.i.bf16 %v1911_v59, %v1908_v36  ;;  %v2042_v36 = vsel %vm809_vm0, %v4578_v34, %v3525_v17 }
 0xb89   : > { %3527 = vrot.lane.b32.xlu1 %v3526_v39, %s4043_s22 }
 0xb8a   : > { %3532 = vrot.lane.b32.xlu0 %v3531_v38, %s4043_s22 }
 0xb8c   : > { %v3306_v54 = vpop.f32.mrb[36].mxu0 }
 0xb8d   : > { %3542 = vrot.lane.b32.xlu1 %v3541_v43, %s4044_s17  ;;  %v1924_v45 = vpop.f32.mrb[37].mxu0  ;;  %v3509_v43 = vunpack.i.l.bf16 %v3508_v2 }
 0xb8e   : > { %3537 = vrot.lane.b32.xlu0 %v3536_v50, %s4044_s17  ;;  %v3307_v8 = vpop.f32.mrb[38].mxu0  ;;  %v3514_v50 = vunpack.i.l.bf16 %v3513_v25  ;;  %v4987_v25 = vld [vmem:[%s5290_s1] sm:$0xff] }
 0xb8f   : > { %v3551_v62 = vpack.i.bf16 %v3307_v8, %v3306_v54  ;;  %v1927_v42 = vpop.f32.mrb[39].mxu0  ;;  %v2043_v41 = vsel %vm899_vm1, %v2035_v52, %v3509_v43  ;;  %v2083_v2 = vrot.slane %v4987_v25, %v526_v7  ;;  %v3806_v52 = vld [vmem:[%s4299_s29 + $0x8] sm:$0xff] }
 0xb90   : > { %v3546_v24 = vpack.i.bf16 %v1927_v42, %v1924_v45  ;;  %v2045_v40 = vsel %vm899_vm1, %v2037_v14, %v3514_v50 }
 0xb91   : > { %3552 = vrot.lane.b32.xlu1 %v3551_v62, %s4043_s22 }
 0xb92   : > { %3547 = vrot.lane.b32.xlu0 %v3546_v24, %s4043_s22 }
 0xbfb   : > { %v3528_v15 = vpop.permute.xlu1 %3527 }
 0xbfc   : > { %v3530_v56 = vunpack.i.h.bf16 %v3528_v15  ;;  %v3529_v22 = vunpack.i.l.bf16 %v3528_v15  ;;  %v3533_v20 = vpop.permute.xlu0 %3532 }
 0xbfd   : > { %v3535_v46 = vunpack.i.h.bf16 %v3533_v20  ;;  %v3534_v23 = vunpack.i.l.bf16 %v3533_v20 }
 0xbfe   : > { %v2054_v55 = vsel %vm2051_vm2, %v2045_v40, %v3529_v22  ;;  %v2055_v4 = vsel %vm2051_vm2, %v2046_v27, %v3530_v56  ;;  %v3808_v22 = vld [vmem:[%s4299_s29 + $0x18] sm:$0xff] }
 0xbff   : > { %v2061_v53 = vpack.c.bf16 %v2055_v4, %v2054_v55  ;;  %v3543_v48 = vpop.permute.xlu1 %3542  ;;  %v2052_v26 = vsel %vm2051_vm2, %v2043_v41, %v3534_v23  ;;  %v2053_v5 = vsel %vm2051_vm2, %v2044_v29, %v3535_v46  ;;  %v3809_v23 = vld [vmem:[%s4299_s29 + $0x28] sm:$0xff]  ;;  %v3810_v55 = vld [vmem:[%s4299_s29 + $0x20] sm:$0xff] }
 0xc00   : > { %v3538_v51 = vpop.permute.xlu0 %3537  ;;  %v2060_v58 = vpack.c.bf16 %v2053_v5, %v2052_v26  ;;  %v3545_v9 = vunpack.i.h.bf16 %v3543_v48  ;;  %v3544_v47 = vunpack.i.l.bf16 %v3543_v48  ;;  %v3812_v48 = vld [vmem:[%s4299_s29 + $0x30] sm:$0xff]  ;;  %v3596_v5 = vld [vmem:[#allocation8] sm:$0xff]   ;;  %s2816_s29 = scalar_lea.sflag [#allocation4], %s4293_s12 }
 0xc01   : > { %v3540_v37 = vunpack.i.h.bf16 %v3538_v51  ;;  %v3539_v60 = vunpack.i.l.bf16 %v3538_v51  ;;  %3332 = vmatprep.subr.bf16.mxu1 %v3596_v5 }
 0xc02   : > { %3324 = vmatprep.mubr.bf16.mxu0 %v2060_v58  ;;  %v2049_v54 = vsel %vm899_vm1, %v2041_v57, %v3544_v47  ;;  %v2050_v45 = vsel %vm899_vm1, %v2042_v36, %v3545_v9  ;;  %3333 = vmatpush3.bf16.msra.mxu1 %v3596_v5 }
 0xc03   : > { %v3553_v10 = vpop.permute.xlu1 %3552  ;;  %3325 = vmatmul.mubr.bf16.vlgmr.msra.gmra.mrb[40].mxu0 %v2061_v53  ;;  %v2048_v62 = vsel %vm899_vm1, %v2040_v44, %v3540_v37  ;;  %v2047_v31 = vsel %vm899_vm1, %v2039_v63, %v3539_v60 }
 0xc04   : > { %v3555_v39 = vunpack.i.h.bf16 %v3553_v10  ;;  %v3554_v59 = vunpack.i.l.bf16 %v3553_v10  ;;  %v3548_v38 = vpop.permute.xlu0 %3547 }
 0xc05   : > { %v3550_v8 = vunpack.i.h.bf16 %v3548_v38  ;;  %v3549_v35 = vunpack.i.l.bf16 %v3548_v38 }
 0xc06   : > { %v2058_v42 = vsel %vm2051_vm2, %v2049_v54, %v3554_v59  ;;  %v2059_v34 = vsel %vm2051_vm2, %v2050_v45, %v3555_v39 }
 0xc07   : > { %v2056_v30 = vsel %vm2051_vm2, %v2047_v31, %v3549_v35  ;;  %v2057_v24 = vsel %vm2051_vm2, %v2048_v62, %v3550_v8  ;;  %v2063_v32 = vpack.c.bf16 %v2059_v34, %v2058_v42 }
 0xc08   : > { %v2062_v1 = vpack.c.bf16 %v2057_v24, %v2056_v30 }
 0xc0a   : > { %3328 = vmatprep.mubr.bf16.mxu0 %v2062_v1 }
 0xc0b   : > { %3329 = vmatmul.mubr.bf16.gmra.mrb[44].mxu0 %v2063_v32 }
 0xcd6   : > { %v3326_v16 = vpop.f32.mrb[40].mxu0 }
 0xcd7   : > { %v2166_v11 = vpop.f32.mrb[41].mxu0  ;;  %v2175_v6 = vadd.f32 %v3326_v16, %v2083_v2 }
 0xcd8   : > { %v2167_v43 = vadd.f32 %v2166_v11, %v2083_v2  ;;  %v3327_v61 = vpop.f32.mrb[42].mxu0 }
 0xcd9   : > { %v2169_v12 = vpop.f32.mrb[43].mxu0  ;;  %v5000_v41 = vadd.f32 %v3807_v3, %v2175_v6  ;;  %v2178_v7 = vadd.f32 %v3327_v61, %v2083_v2  ;;  %v3597_v61 = vld [vmem:[#allocation8 + $0x8] sm:$0xff]   ;;  %v3599_v6 = vld [vmem:[#allocation8 + $0x18] sm:$0xff]  }
 0xcda   : > { %v4993_v21 = vadd.f32 %v3805_v19, %v2167_v43  ;;  %v2170_v50 = vadd.f32 %v2169_v12, %v2083_v2  ;;  %3334 = vmatprep.subr.bf16.mxu1 %v3597_v61  ;;  %v3598_v12 = vld [vmem:[#allocation8 + $0x10] sm:$0xff]   ;;  %v3600_v19 = vld [vmem:[#allocation8 + $0x20] sm:$0xff]   ;;  %v3603_v3 = vld [vmem:[#allocation8 + $0x38] sm:$0xff]  }
 0xcdb   : > { %v5005_v20 = vadd.f32 %v3808_v22, %v2178_v7  ;;  %3335 = vmatpush3.bf16.msra.mxu1 %v3597_v61 }
 0xcdc   : > { %v4996_v49 = vadd.f32 %v3806_v52, %v2170_v50  ;;  %2205 = vadd.xlane.f32.xlu0 %v4993_v21  ;;  %3336 = vmatprep.subr.bf16.mxu1 %v3598_v12  ;;  %v3601_v50 = vld [vmem:[#allocation8 + $0x28] sm:$0xff]   ;;  %v3602_v52 = vld [vmem:[#allocation8 + $0x30] sm:$0xff]  }
 0xcde   : > { %v3330_v15 = vpop.f32.mrb[44].mxu0  ;;  %2207 = vadd.xlane.f32.xlu1 %v4996_v49 }
 0xcdf   : > { %v2182_v18 = vpop.f32.mrb[45].mxu0  ;;  %v2191_v33 = vadd.f32 %v3330_v15, %v2083_v2  ;;  %3337 = vmatpush3.bf16.msra.mxu1 %v3598_v12 }
 0xce0   : > { %v3331_v14 = vpop.f32.mrb[46].mxu0  ;;  %2209 = vadd.xlane.f32.xlu0 %v5000_v41  ;;  %v2183_v40 = vadd.f32 %v2182_v18, %v2083_v2  ;;  %3338 = vmatprep.subr.bf16.mxu1 %v3599_v6 }
 0xce1   : > { %v2185_v56 = vpop.f32.mrb[47].mxu0  ;;  %v2194_v46 = vadd.f32 %v3331_v14, %v2083_v2  ;;  %v5020_v26 = vadd.f32 %v3812_v48, %v2191_v33 }
 0xce2   : > { %v2186_v27 = vadd.f32 %v2185_v56, %v2083_v2  ;;  %v5012_v4 = vadd.f32 %v3810_v55, %v2183_v40  ;;  %v2295_v55 = vsub.s32 3, %v4354_v13 }
 0xce3   : > { %v5016_v53 = vadd.f32 %v3811_v28, %v2194_v46  ;;  %3339 = vmatpush3.bf16.msra.mxu1 %v3599_v6 }
 0xce4   : > { %v5008_v29 = vadd.f32 %v3809_v23, %v2186_v27  ;;  %2211 = vadd.xlane.f32.xlu0 %v5005_v20  ;;  %3340 = vmatprep.subr.bf16.mxu1 %v3600_v19 }
 0xce6   : > { %2215 = vadd.xlane.f32.xlu1 %v5008_v29 }
 0xce7   : > { %3341 = vmatpush3.bf16.msra.mxu1 %v3600_v19 }
 0xce8   : > { %2213 = vadd.xlane.f32.xlu0 %v5012_v4  ;;  %3342 = vmatprep.subr.bf16.mxu1 %v3601_v50 }
 0xcea   : > { %2219 = vadd.xlane.f32.xlu1 %v5016_v53 }
 0xceb   : > { %3343 = vmatpush3.bf16.msra.mxu1 %v3601_v50 }
 0xcec   : > { %2217 = vadd.xlane.f32.xlu0 %v5020_v26  ;;  %3344 = vmatprep.subr.bf16.mxu1 %v3602_v52 }
 0xcef   : > { %3345 = vmatpush3.bf16.msra.mxu1 %v3602_v52 }
 0xcf0   : > { %3346 = vmatprep.subr.bf16.mxu1 %v3603_v3 }
 0xcf3   : > { %3347 = vmatpush3.bf16.msra.mxu1 %v3603_v3 }
 0xd69   : > { %v2206_v17 = vpop.xlane.xlu0 %2205 }
 0xd6a   : > { %v2221_v0 = vmul.f32 0.0078125, %v2206_v17 }
 0xd6b   : > { %v2208_v51 = vpop.xlane.xlu1 %2207 }
 0xd6c   : > { %v5025_v58 = vsub.f32 %v4993_v21, %v2221_v0  ;;  %v2222_v9 = vmul.f32 0.0078125, %v2208_v51  ;;  %v2296_v51 = vrot.slane %v4987_v25, %v2295_v55 }
 0xd6d   : > { %v2210_v47 = vpop.xlane.xlu0 %2209 }
 0xd6e   : > { %v5028_v37 = vsub.f32 %v4996_v49, %v2222_v9  ;;  %v2223_v60 = vmul.f32 0.0078125, %v2210_v47  ;;  %v2237_v44 = vmul.f32 %v5025_v58, %v5025_v58  ;;  %v2307_v9 = vsub.s32 4, %v4354_v13 }
 0xd70   : > { %v5033_v63 = vsub.f32 %v5000_v41, %v2223_v60  ;;  %2245 = vadd.xlane.f32.xlu0 %v2237_v44  ;;  %v2238_v10 = vmul.f32 %v5028_v37, %v5028_v37 }
 0xd71   : > { %v2212_v36 = vpop.xlane.xlu0 %2211 }
 0xd72   : > { %v2224_v57 = vmul.f32 0.0078125, %v2212_v36  ;;  %2247 = vadd.xlane.f32.xlu1 %v2238_v10  ;;  %v2239_v39 = vmul.f32 %v5033_v63, %v5033_v63 }
 0xd73   : > { %v2216_v59 = vpop.xlane.xlu1 %2215 }
 0xd74   : > { %v5040_v38 = vsub.f32 %v5005_v20, %v2224_v57  ;;  %v2226_v54 = vmul.f32 0.0078125, %v2216_v59  ;;  %2249 = vadd.xlane.f32.xlu0 %v2239_v39 }
 0xd75   : > { %v2214_v45 = vpop.xlane.xlu0 %2213 }
 0xd76   : > { %v5043_v8 = vsub.f32 %v5008_v29, %v2226_v54  ;;  %v2225_v35 = vmul.f32 0.0078125, %v2214_v45  ;;  %v2240_v62 = vmul.f32 %v5040_v38, %v5040_v38 }
 0xd77   : > { %v2220_v31 = vpop.xlane.xlu1 %2219 }
 0xd78   : > { %v5048_v42 = vsub.f32 %v5012_v4, %v2225_v35  ;;  %v2228_v34 = vmul.f32 0.0078125, %v2220_v31  ;;  %2251 = vadd.xlane.f32.xlu1 %v2240_v62  ;;  %v2242_v1 = vmul.f32 %v5043_v8, %v5043_v8  ;;  %v2308_v62 = vrot.slane %v4987_v25, %v2307_v9 }
 0xd79   : > { %v2218_v30 = vpop.xlane.xlu0 %2217  ;;  %v2339_v9 = vsub.s32 5, %v4354_v13 }
 0xd7a   : > { %v5051_v24 = vsub.f32 %v5016_v53, %v2228_v34  ;;  %v2227_v32 = vmul.f32 0.0078125, %v2218_v30  ;;  %v2241_v2 = vmul.f32 %v5048_v42, %v5048_v42 }
 0xd7c   : > { %v5058_v16 = vsub.f32 %v5020_v26, %v2227_v32  ;;  %2255 = vadd.xlane.f32.xlu1 %v2242_v1  ;;  %2253 = vadd.xlane.f32.xlu0 %v2241_v2  ;;  %v2244_v11 = vmul.f32 %v5051_v24, %v5051_v24 }
 0xd7e   : > { %v2243_v43 = vmul.f32 %v5058_v16, %v5058_v16 }
 0xd80   : > { %2259 = vadd.xlane.f32.xlu1 %v2244_v11  ;;  %2257 = vadd.xlane.f32.xlu0 %v2243_v43 }
 0xdfd   : > { %v2246_v7 = vpop.xlane.xlu0 %2245 }
 0xdfe   : > { %v2261_v15 = vmul.f32 0.0078125, %v2246_v7 }
 0xdff   : > { %v2248_v18 = vpop.xlane.xlu1 %2247 }
 0xe00   : > { %v2269_v14 = vadd.f32 1e-05, %v2261_v15  ;;  %v2262_v56 = vmul.f32 0.0078125, %v2248_v18 }
 0xe01   : > { %v2250_v22 = vpop.xlane.xlu0 %2249 }
 0xe02   : > { %3756 = vrsqrt.f32 %v2269_v14  ;;  %v2270_v40 = vadd.f32 1e-05, %v2262_v56  ;;  %v2263_v27 = vmul.f32 0.0078125, %v2250_v22 }
 0xe04   : > { %3758 = vrsqrt.f32 %v2270_v40  ;;  %v2271_v46 = vadd.f32 1e-05, %v2263_v27 }
 0xe05   : > { %v2252_v23 = vpop.xlane.xlu1 %2251 }
 0xe06   : > { %3760 = vrsqrt.f32 %v2271_v46  ;;  %v2264_v33 = vmul.f32 0.0078125, %v2252_v23 }
 0xe08   : > { %v2272_v28 = vadd.f32 1e-05, %v2264_v33 }
 0xe09   : > { %v2256_v48 = vpop.xlane.xlu1 %2255  ;;  %v2254_v5 = vpop.xlane.xlu0 %2253 }
 0xe0a   : > { %3762 = vrsqrt.f32 %v2272_v28  ;;  %v2266_v17 = vmul.f32 0.0078125, %v2256_v48  ;;  %v2265_v0 = vmul.f32 0.0078125, %v2254_v5  ;;  %v3605_v48 = vld [vmem:[#allocation10 + $0x8] sm:$0xff]   ;;  %v3606_v5 = vld [vmem:[#allocation10 + $0x10] sm:$0xff]  }
 0xe0c   : > { %v3757_v47 = vpop.eup %3756  ;;  %v2274_v60 = vadd.f32 1e-05, %v2266_v17  ;;  %v2273_v44 = vadd.f32 1e-05, %v2265_v0  ;;  %v3609_v17 = vld [vmem:[#allocation10 + $0x28] sm:$0xff]   ;;  %v3610_v0 = vld [vmem:[#allocation10 + $0x30] sm:$0xff]  }
 0xe0d   : > { %v2260_v10 = vpop.xlane.xlu1 %2259  ;;  %v2258_v36 = vpop.xlane.xlu0 %2257  ;;  %v2285_v57 = vmul.f32 %v3757_v47, %v5025_v58  ;;  %v5078_v47 = vrot.slane %v4987_v25, %v2339_v9 }
 0xe0e   : > { %v3759_v39 = vpop.eup %3758  ;;  %3764 = vrsqrt.f32 %v2274_v60  ;;  %v2268_v59 = vmul.f32 0.0078125, %v2260_v10  ;;  %v2267_v54 = vmul.f32 0.0078125, %v2258_v36 }
 0xe0f   : > { %3766 = vrsqrt.f32 %v2273_v44  ;;  %v2286_v45 = vmul.f32 %v3759_v39, %v5028_v37  ;;  %v2297_v35 = vmul.f32 %v2296_v51, %v2285_v57 }
 0xe10   : > { %v3761_v31 = vpop.eup %3760  ;;  %v2276_v34 = vadd.f32 1e-05, %v2268_v59  ;;  %v2275_v30 = vadd.f32 1e-05, %v2267_v54 }
 0xe11   : > { %v2287_v32 = vmul.f32 %v3761_v31, %v5033_v63  ;;  %v2298_v1 = vmul.f32 %v2296_v51, %v2286_v45  ;;  %v2309_v2 = vadd.f32 %v2308_v62, %v2297_v35 }
 0xe12   : > { %3768 = vrsqrt.f32 %v2276_v34 }
 0xe13   : > { %3770 = vrsqrt.f32 %v2275_v30  ;;  %v2310_v58 = vadd.f32 %v2308_v62, %v2298_v1  ;;  %v2299_v43 = vmul.f32 %v2296_v51, %v2287_v32 }
 0xe14   : > { %v3763_v11 = vpop.eup %3762 }
 0xe15   : > { %v2288_v61 = vmul.f32 %v3763_v11, %v5040_v38  ;;  %v2317_v12 = vpack.c.bf16 %v2310_v58, %v2309_v2  ;;  %v2311_v50 = vadd.f32 %v2308_v62, %v2299_v43 }
 0xe17   : > { %v2300_v6 = vmul.f32 %v2296_v51, %v2288_v61  ;;  %3348 = vmatprep.mubr.bf16.mxu1 %v2317_v12 }
 0xe18   : > { %v3765_v37 = vpop.eup %3764 }
 0xe19   : > { %v3767_v19 = vpop.eup %3766  ;;  %v2312_v52 = vadd.f32 %v2308_v62, %v2300_v6  ;;  %v2290_v3 = vmul.f32 %v3765_v37, %v5043_v8 }
 0xe1a   : > { %v2289_v63 = vmul.f32 %v3767_v19, %v5048_v42  ;;  %v3604_v42 = vld [vmem:[#allocation10] sm:$0xff]  }
 0xe1b   : > { %v2318_v7 = vpack.c.bf16 %v2312_v52, %v2311_v50  ;;  %v2302_v15 = vmul.f32 %v2296_v51, %v2290_v3  ;;  %3356 = vmatprep.subr.bf16.mxu0 %v3604_v42 }
 0xe1c   : > { %v3769_v18 = vpop.eup %3768  ;;  %v2301_v14 = vmul.f32 %v2296_v51, %v2289_v63  ;;  %3357 = vmatpush3.bf16.msra.mxu0 %v3604_v42 }
 0xe1d   : > { %v3771_v56 = vpop.eup %3770  ;;  %3349 = vmatmul.mubr.bf16.vlgmr.msra.gmra.mrb[48].mxu1 %v2318_v7  ;;  %v2314_v22 = vadd.f32 %v2308_v62, %v2302_v15  ;;  %v2292_v38 = vmul.f32 %v3769_v18, %v5051_v24  ;;  %3358 = vmatprep.subr.bf16.mxu0 %v3605_v48  ;;  %v3607_v24 = vld [vmem:[#allocation10 + $0x18] sm:$0xff]  }
 0xe1e   : > { %v2313_v40 = vadd.f32 %v2308_v62, %v2301_v14  ;;  %v2291_v27 = vmul.f32 %v3771_v56, %v5058_v16  ;;  %v3608_v16 = vld [vmem:[#allocation10 + $0x20] sm:$0xff]  }
 0xe1f   : > { %v2304_v46 = vmul.f32 %v2296_v51, %v2292_v38 }
 0xe20   : > { %v2319_v23 = vpack.c.bf16 %v2314_v22, %v2313_v40  ;;  %v2303_v33 = vmul.f32 %v2296_v51, %v2291_v27  ;;  %3359 = vmatpush3.bf16.msra.mxu0 %v3605_v48  ;;  %v3611_v51 = vld [vmem:[#allocation10 + $0x38] sm:$0xff]  }
 0xe21   : > { %v2316_v55 = vadd.f32 %v2308_v62, %v2304_v46  ;;  %3360 = vmatprep.subr.bf16.mxu0 %v3606_v5 }
 0xe22   : > { %3352 = vmatprep.mubr.bf16.mxu1 %v2319_v23  ;;  %v2315_v8 = vadd.f32 %v2308_v62, %v2303_v33 }
 0xe24   : > { %v2320_v28 = vpack.c.bf16 %v2316_v55, %v2315_v8  ;;  %3361 = vmatpush3.bf16.msra.mxu0 %v3606_v5  ;;  %v4046_v8 = vmov -1.0  }
 0xe25   : > { %3362 = vmatprep.subr.bf16.mxu0 %v3607_v24 }
 0xe26   : > { %3353 = vmatmul.mubr.bf16.gmra.mrb[52].mxu1 %v2320_v28 }
 0xe28   : > { %3363 = vmatpush3.bf16.msra.mxu0 %v3607_v24 }
 0xe29   : > { %3364 = vmatprep.subr.bf16.mxu0 %v3608_v16 }
 0xe2c   : > { %3365 = vmatpush3.bf16.msra.mxu0 %v3608_v16 }
 0xe2d   : > { %3366 = vmatprep.subr.bf16.mxu0 %v3609_v17 }
 0xe30   : > { %3367 = vmatpush3.bf16.msra.mxu0 %v3609_v17 }
 0xe31   : > { %3368 = vmatprep.subr.bf16.mxu0 %v3610_v0 }
 0xe34   : > { %3369 = vmatpush3.bf16.msra.mxu0 %v3610_v0 }
 0xe35   : > { %3370 = vmatprep.subr.bf16.mxu0 %v3611_v51 }
 0xe38   : > { %3371 = vmatpush3.bf16.msra.mxu0 %v3611_v51 }
 0xef0   : > { %v3350_v60 = vpop.f32.mrb[48].mxu1 }
 0xef1   : > { %v2432_v44 = vadd.f32 %v3350_v60, %v5078_v47  ;;  %v2423_v10 = vpop.f32.mrb[49].mxu1 }
 0xef2   : > { %v2424_v36 = vadd.f32 %v2423_v10, %v5078_v47  ;;  %v3351_v57 = vpop.f32.mrb[50].mxu1 }
 0xef3   : > { %v2464_v39 = vmul.f32 0.70710677, %v2432_v44  ;;  %v2435_v59 = vadd.f32 %v3351_v57, %v5078_v47  ;;  %v2426_v54 = vpop.f32.mrb[51].mxu1  ;;  %v5115_v23 = vmul.f32 0.5, %v2432_v44 }
 0xef4   : > { %v5083_v45 = vmul.f32 0.70710677, %v2424_v36  ;;  %v5088_v31 = vadd.f32 %v2426_v54, %v5078_v47  ;;  %v5117_v33 = vmul.f32 0.5, %v2424_v36 }
 0xef5   : > { %v2488_v35 = vand.u32 2147483647, %v2464_v39  ;;  %v5085_v62 = vmul.f32 0.70710677, %v2435_v59  ;;  %vm2472_vm3 = vcmp.ge.f32.partialorder %v2464_v39, 0.0  ;;  %v5123_v48 = vmul.f32 0.5, %v2435_v59 }
 0xef6   : > { %v2486_v34 = vand.u32 2147483647, %v5083_v45  ;;  %v5093_v58 = vmul.f32 0.70710677, %v5088_v31  ;;  %v5121_v28 = vsel %vm2472_vm3, 1.0, %v4046_v8  ;;  %vm2470_vm4 = vcmp.ge.f32.partialorder %v5083_v45, 0.0 }
 0xef7   : > { %v2496_v30 = vmul.f32 0.3275911, %v2488_v35  ;;  %v2489_v1 = vand.u32 2147483647, %v5085_v62  ;;  %v2592_v3 = vsub.f32 0.0, %v2488_v35  ;;  %vm2473_vm5 = vcmp.ge.f32.partialorder %v5085_v62, 0.0 }
 0xef8   : > { %v2494_v32 = vmul.f32 0.3275911, %v2486_v34  ;;  %v2487_v6 = vand.u32 2147483647, %v5093_v58  ;;  %v2590_v14 = vsub.f32 0.0, %v2486_v34  ;;  %vm2471_vm6 = vcmp.ge.f32.partialorder %v5093_v58, 0.0 }
 0xef9   : > { %v2504_v2 = vadd.f32 1.0, %v2496_v30  ;;  %v3354_v11 = vpop.f32.mrb[52].mxu1  ;;  %v2497_v61 = vmul.f32 0.3275911, %v2489_v1  ;;  %v2600_v38 = vmul.f32 %v2592_v3, %v2488_v35  ;;  %v2593_v40 = vsub.f32 0.0, %v2489_v1 }
 0xefa   : > { %v2502_v43 = vadd.f32 1.0, %v2494_v32  ;;  %v2439_v12 = vpop.f32.mrb[53].mxu1  ;;  %v2495_v52 = vmul.f32 0.3275911, %v2487_v6  ;;  %v5097_v63 = vadd.f32 %v3354_v11, %v5078_v47  ;;  %v2598_v42 = vmul.f32 %v2590_v14, %v2486_v34 }
 0xefb   : > { %3772 = vrcp.f32 %v2504_v2  ;;  %v3355_v37 = vpop.f32.mrb[54].mxu1  ;;  %v2505_v19 = vadd.f32 1.0, %v2497_v61  ;;  %v5100_v7 = vadd.f32 %v2439_v12, %v5078_v47  ;;  %v2591_v16 = vsub.f32 0.0, %v2487_v6 }
 0xefc   : > { %3774 = vrcp.f32 %v2502_v43  ;;  %v2442_v50 = vpop.f32.mrb[55].mxu1  ;;  %v2503_v15 = vadd.f32 1.0, %v2495_v52  ;;  %v5103_v18 = vadd.f32 %v3355_v37, %v5078_v47  ;;  %v5106_v56 = vmul.f32 0.70710677, %v5097_v63 }
 0xefd   : > { %3776 = vrcp.f32 %v2505_v19  ;;  %v5109_v22 = vmul.f32 0.70710677, %v5100_v7  ;;  %v2610_v60 = vmul.f32 1.442695, %v2600_v38  ;;  %v2601_v44 = vmul.f32 %v2593_v40, %v2489_v1 }
 0xefe   : > { %3778 = vrcp.f32 %v2503_v15  ;;  %v2492_v27 = vand.u32 2147483647, %v5106_v56  ;;  %v5113_v46 = vmul.f32 0.70710677, %v5103_v18  ;;  %v5137_v59 = vadd.f32 %v2442_v50, %v5078_v47 }
 0xeff   : > { %v2490_v55 = vand.u32 2147483647, %v5109_v22  ;;  %v2606_v35 = vmul.f32 1.442695, %v2598_v42  ;;  %v2599_v32 = vmul.f32 %v2591_v16, %v2487_v6  ;;  %v2612_v12 = vmul.f32 1.442695, %v2601_v44 }
 0xf00   : > { %v2500_v5 = vmul.f32 0.3275911, %v2492_v27  ;;  %v5129_v0 = vand.u32 2147483647, %v5113_v46  ;;  %v2596_v43 = vsub.f32 0.0, %v2492_v27  ;;  %v5154_v3 = vsel %vm2470_vm4, 1.0, %v4046_v8 }
 0xf01   : > { %v2498_v17 = vmul.f32 0.3275911, %v2490_v55  ;;  %v2594_v37 = vsub.f32 0.0, %v2490_v55  ;;  %v5148_v19 = vmul.f32 0.70710677, %v5137_v59  ;;  %vm2476_vm7 = vcmp.ge.f32.partialorder %v5106_v56, 0.0 }
 0xf02   : > { %v2508_v10 = vadd.f32 1.0, %v2500_v5  ;;  %v2501_v39 = vmul.f32 0.3275911, %v5129_v0  ;;  %v2608_v14 = vmul.f32 1.442695, %v2599_v32  ;;  %v2604_v5 = vmul.f32 %v2596_v43, %v2492_v27 }
 0xf03   : > { %v2506_v57 = vadd.f32 1.0, %v2498_v17  ;;  %v5162_v17 = vsel %vm2473_vm5, 1.0, %v4046_v8  ;;  %v5165_v45 = vand.u32 2147483647, %v5148_v19  ;;  %v2597_v27 = vsub.f32 0.0, %v5129_v0 }
 0xf04   : > { %3780 = vrcp.f32 %v2508_v10  ;;  %v2509_v1 = vadd.f32 1.0, %v2501_v39  ;;  %vm2477_vm8 = vcmp.ge.f32.partialorder %v5113_v46, 0.0  ;;  %vm2474_vm9 = vcmp.ge.f32.partialorder %v5109_v22, 0.0 }
 0xf05   : > { %v5125_v24 = vpop.eup %3772  ;;  %3782 = vrcp.f32 %v2506_v57  ;;  %v2499_v57 = vmul.f32 0.3275911, %v5165_v45  ;;  %vm2475_vm10 = vcmp.ge.f32.partialorder %v5148_v19, 0.0  ;;  %v2458_v22 = vmul.f32 0.5, %v5100_v7 }
 0xf06   : > { %v5131_v51 = vpop.eup %3774  ;;  %v2520_v9 = vmul.f32 1.0614054, %v5125_v24  ;;  %3784 = vpow2.f32 %v2610_v60  ;;  %v2684_v19 = vsub.s32 6, %v4354_v13 }
 0xf07   : > { %v2518_v36 = vmul.f32 1.0614054, %v5131_v51  ;;  %v5140_v34 = vpop.eup %3776  ;;  %3786 = vrcp.f32 %v2509_v1 }
 0xf08   : > { %v2528_v54 = vadd.f32 -1.4531521, %v2520_v9  ;;  %v2521_v11 = vmul.f32 1.0614054, %v5140_v34  ;;  %v5144_v61 = vpop.eup %3778  ;;  %3788 = vpow2.f32 %v2606_v35  ;;  %v2602_v9 = vmul.f32 %v2594_v37, %v2490_v55 }
 0xf09   : > { %v2526_v30 = vadd.f32 -1.4531521, %v2518_v36  ;;  %v2519_v6 = vmul.f32 1.0614054, %v5144_v61  ;;  %3790 = vpow2.f32 %v2612_v12  ;;  %v2618_v35 = vmul.f32 1.442695, %v2604_v5 }
 0xf0a   : > { %v2536_v2 = vmul.f32 %v5125_v24, %v2528_v54  ;;  %v2529_v52 = vadd.f32 -1.4531521, %v2521_v11  ;;  %3792 = vpow2.f32 %v2608_v14  ;;  %v2507_v11 = vadd.f32 1.0, %v2499_v57 }
 0xf0b   : > { %v2534_v47 = vmul.f32 %v5131_v51, %v2526_v30  ;;  %v2527_v42 = vadd.f32 -1.4531521, %v2519_v6 }
 0xf0c   : > { %v2544_v50 = vadd.f32 1.4214138, %v2536_v2  ;;  %v2537_v40 = vmul.f32 %v5140_v34, %v2529_v52  ;;  %v2614_v2 = vmul.f32 1.442695, %v2602_v9  ;;  %3794 = vrcp.f32 %v2507_v11 }
 0xf0d   : > { %v2542_v15 = vadd.f32 1.4214138, %v2534_v47  ;;  %v2535_v10 = vmul.f32 %v5144_v61, %v2527_v42  ;;  %3796 = vpow2.f32 %v2618_v35 }
 0xf0e   : > { %v2552_v38 = vmul.f32 %v5125_v24, %v2544_v50  ;;  %v2545_v44 = vadd.f32 1.4214138, %v2537_v40  ;;  %v5170_v39 = vpop.eup %3780 }
 0xf0f   : > { %v2550_v16 = vmul.f32 %v5131_v51, %v2542_v15  ;;  %v2543_v54 = vadd.f32 1.4214138, %v2535_v10  ;;  %v5175_v30 = vpop.eup %3782  ;;  %v2524_v1 = vmul.f32 1.0614054, %v5170_v39  ;;  %v2605_v15 = vmul.f32 %v2597_v27, %v5129_v0 }
 0xf10   : > { %v2560_v60 = vadd.f32 -0.28449672, %v2552_v38  ;;  %v2553_v55 = vmul.f32 %v5140_v34, %v2545_v44  ;;  %v3785_v43 = vpop.eup %3784  ;;  %v2522_v50 = vmul.f32 1.0614054, %v5175_v30 }
 0xf11   : > { %v2558_v36 = vadd.f32 -0.28449672, %v2550_v16  ;;  %v2551_v37 = vmul.f32 %v5144_v61, %v2543_v54  ;;  %v2532_v6 = vadd.f32 -1.4531521, %v2524_v1  ;;  %v5182_v14 = vpop.eup %3786 }
 0xf12   : > { %v2568_v62 = vmul.f32 %v5125_v24, %v2560_v60  ;;  %v2561_v12 = vadd.f32 -0.28449672, %v2553_v55  ;;  %v2530_v5 = vadd.f32 -1.4531521, %v2522_v50  ;;  %v3789_v16 = vpop.eup %3788  ;;  %v2525_v44 = vmul.f32 1.0614054, %v5182_v14 }
 0xf13   : > { %v2566_v32 = vmul.f32 %v5131_v51, %v2558_v36  ;;  %v2559_v42 = vadd.f32 -0.28449672, %v2551_v37  ;;  %v2540_v60 = vmul.f32 %v5170_v39, %v2532_v6  ;;  %v2620_v55 = vmul.f32 1.442695, %v2605_v15  ;;  %v3791_v54 = vpop.eup %3790 }
 0xf14   : > { %v2576_v47 = vadd.f32 0.2548296, %v2568_v62  ;;  %v2569_v40 = vmul.f32 %v5140_v34, %v2561_v12  ;;  %v2538_v27 = vmul.f32 %v5175_v30, %v2530_v5  ;;  %v2533_v62 = vadd.f32 -1.4531521, %v2525_v44 }
 0xf15   : > { %v2574_v52 = vadd.f32 0.2548296, %v2566_v32  ;;  %v2567_v0 = vmul.f32 %v5144_v61, %v2559_v42  ;;  %v2595_v37 = vsub.f32 0.0, %v5165_v45  ;;  %3798 = vpow2.f32 %v2620_v55 }
 0xf16   : > { %v2584_v38 = vmul.f32 %v5125_v24, %v2576_v47  ;;  %v2577_v36 = vadd.f32 0.2548296, %v2569_v40  ;;  %v2548_v24 = vadd.f32 1.4214138, %v2540_v60  ;;  %v2546_v11 = vadd.f32 1.4214138, %v2538_v27  ;;  %v3793_v47 = vpop.eup %3792 }
 0xf17   : > { %v2582_v9 = vmul.f32 %v5131_v51, %v2574_v52  ;;  %v2575_v51 = vadd.f32 0.2548296, %v2567_v0  ;;  %v3795_v60 = vpop.eup %3794  ;;  %3800 = vpow2.f32 %v2614_v2  ;;  %v2603_v44 = vmul.f32 %v2595_v37, %v5165_v45 }
 0xf18   : > { %v2624_v10 = vmul.f32 %v3785_v43, %v2584_v38  ;;  %v2585_v1 = vmul.f32 %v5140_v34, %v2577_v36  ;;  %v2556_v12 = vmul.f32 %v5170_v39, %v2548_v24  ;;  %v2541_v43 = vmul.f32 %v5182_v14, %v2533_v62  ;;  %v3797_v27 = vpop.eup %3796 }
 0xf19   : > { %v2622_v57 = vmul.f32 %v3789_v16, %v2582_v9  ;;  %v2583_v6 = vmul.f32 %v5144_v61, %v2575_v51  ;;  %v2554_v15 = vmul.f32 %v5175_v30, %v2546_v11  ;;  %v2479_v34 = vsel %vm2471_vm6, 1.0, %v4046_v8 }
 0xf1a   : > { %v2632_v32 = vsub.f32 1.0, %v2624_v10  ;;  %v2625_v52 = vmul.f32 %v3791_v54, %v2585_v1  ;;  %v2564_v38 = vadd.f32 -0.28449672, %v2556_v12  ;;  %v2549_v40 = vadd.f32 1.4214138, %v2541_v43 }
 0xf1b   : > { %v2630_v35 = vsub.f32 1.0, %v2622_v57  ;;  %v2623_v16 = vmul.f32 %v3793_v47, %v2583_v6  ;;  %v2562_v9 = vadd.f32 -0.28449672, %v2554_v15  ;;  %v2523_v24 = vmul.f32 1.0614054, %v3795_v60 }
 0xf1c   : > { %v2640_v50 = vmul.f32 %v2632_v32, %v5121_v28  ;;  %v2633_v5 = vsub.f32 1.0, %v2625_v52  ;;  %v2572_v28 = vmul.f32 %v5170_v39, %v2564_v38  ;;  %v2557_v61 = vmul.f32 %v5182_v14, %v2549_v40 }
 0xf1d   : > { %v2638_v42 = vmul.f32 %v2630_v35, %v5154_v3  ;;  %v2631_v36 = vsub.f32 1.0, %v2623_v16  ;;  %v2570_v0 = vmul.f32 %v5175_v30, %v2562_v9  ;;  %v2455_v54 = vmul.f32 0.5, %v5088_v31 }
 0xf1e   : > { %v2648_v10 = vadd.f32 1.0, %v2640_v50  ;;  %v2641_v58 = vmul.f32 %v2633_v5, %v5162_v17  ;;  %v2580_v57 = vadd.f32 0.2548296, %v2572_v28  ;;  %v2565_v3 = vadd.f32 -0.28449672, %v2557_v61 }
 0xf1f   : > { %v2646_v62 = vadd.f32 1.0, %v2638_v42  ;;  %v2639_v32 = vmul.f32 %v2631_v36, %v2479_v34  ;;  %v2578_v1 = vadd.f32 0.2548296, %v2570_v0  ;;  %v2531_v51 = vadd.f32 -1.4531521, %v2523_v24 }
 0xf20   : > { %v2649_v55 = vadd.f32 1.0, %v2641_v58  ;;  %v2588_v2 = vmul.f32 %v5170_v39, %v2580_v57  ;;  %v2573_v45 = vmul.f32 %v5182_v14, %v2565_v3  ;;  %v2656_v17 = vmul.f32 %v2648_v10, %v5115_v23  ;;  %v3799_v39 = vpop.eup %3798 }
 0xf21   : > { %v2647_v47 = vadd.f32 1.0, %v2639_v32  ;;  %v2616_v35 = vmul.f32 1.442695, %v2603_v44  ;;  %v2539_v37 = vmul.f32 %v3795_v60, %v2531_v51  ;;  %v2654_v31 = vmul.f32 %v2646_v62, %v5117_v33  ;;  %v3801_v40 = vpop.eup %3800 }
 0xf22   : > { %v2657_v11 = vmul.f32 %v2649_v55, %v5123_v48  ;;  %v2628_v12 = vmul.f32 %v3797_v27, %v2588_v2  ;;  %v2581_v43 = vadd.f32 0.2548296, %v2573_v45  ;;  %v2586_v15 = vmul.f32 %v5175_v30, %v2578_v1 }
 0xf23   : > { %v2655_v52 = vmul.f32 %v2647_v47, %v2455_v54  ;;  %v2547_v23 = vadd.f32 1.4214138, %v2539_v37  ;;  %v2484_v48 = vsel %vm2476_vm7, 1.0, %v4046_v8  ;;  %3802 = vpow2.f32 %v2616_v35 }
 0xf24   : > { %v2663_v50 = vpack.c.bf16 %v2657_v11, %v2656_v17  ;;  %v2636_v6 = vsub.f32 1.0, %v2628_v12  ;;  %v2589_v34 = vmul.f32 %v5182_v14, %v2581_v43  ;;  %v2626_v33 = vmul.f32 %v3801_v40, %v2586_v15 }
 0xf25   : > { %v2662_v38 = vpack.c.bf16 %v2655_v52, %v2654_v31  ;;  %v2555_v5 = vmul.f32 %v3795_v60, %v2547_v23  ;;  %v2485_v30 = vsel %vm2477_vm8, 1.0, %v4046_v8  ;;  %v2460_v44 = vmul.f32 0.5, %v5097_v63 }
 0xf26   : > { %v2644_v56 = vmul.f32 %v2636_v6, %v2484_v48  ;;  %v2629_v42 = vmul.f32 %v3799_v39, %v2589_v34  ;;  %v2461_v10 = vmul.f32 0.5, %v5103_v18  ;;  %v2634_v58 = vsub.f32 1.0, %v2626_v33 }
 0xf27   : > { %3372 = vmatprep.mubr.bf16.mxu0 %v2662_v38  ;;  %v2563_v9 = vadd.f32 -0.28449672, %v2555_v5  ;;  %v2482_v24 = vsel %vm2474_vm9, 1.0, %v4046_v8  ;;  %v2483_v63 = vsel %vm2475_vm10, 1.0, %v4046_v8  ;;  %v2459_v1 = vmul.f32 0.5, %v5137_v59 }
 0xf28   : > { %v2637_v16 = vsub.f32 1.0, %v2629_v42  ;;  %3373 = vmatmul.mubr.bf16.vlgmr.msra.gmra.mrb[48].mxu0 %v2663_v50  ;;  %v2652_v28 = vadd.f32 1.0, %v2644_v56  ;;  %v2642_v62 = vmul.f32 %v2634_v58, %v2482_v24  ;;  %v2685_v11 = vrot.slane %v4987_v25, %v2684_v19 }
 0xf29   : > { %v2571_v61 = vmul.f32 %v3795_v60, %v2563_v9 }
 0xf2a   : > { %v2645_v14 = vmul.f32 %v2637_v16, %v2485_v30  ;;  %v2660_v0 = vmul.f32 %v2652_v28, %v2460_v44  ;;  %v2650_v18 = vadd.f32 1.0, %v2642_v62 }
 0xf2b   : > { %v2579_v36 = vadd.f32 0.2548296, %v2571_v61 }
 0xf2c   : > { %v2653_v46 = vadd.f32 1.0, %v2645_v14  ;;  %v2658_v51 = vmul.f32 %v2650_v18, %v2458_v22 }
 0xf2d   : > { %v2587_v57 = vmul.f32 %v3795_v60, %v2579_v36  ;;  %v3803_v3 = vpop.eup %3802 }
 0xf2e   : > { %v2661_v27 = vmul.f32 %v2653_v46, %v2461_v10 }
 0xf2f   : > { %v2627_v55 = vmul.f32 %v3803_v3, %v2587_v57 }
 0xf30   : > { %v2665_v54 = vpack.c.bf16 %v2661_v27, %v2660_v0 }
 0xf31   : > { %v2635_v32 = vsub.f32 1.0, %v2627_v55 }
 0xf33   : > { %v2643_v2 = vmul.f32 %v2635_v32, %v2483_v63 }
 0xf35   : > { %v2651_v45 = vadd.f32 1.0, %v2643_v2 }
 0xf37   : > { %v2659_v60 = vmul.f32 %v2651_v45, %v2459_v1 }
 0xf39   : > { %v2664_v17 = vpack.c.bf16 %v2659_v60, %v2658_v51 }
 0xf3b   : > { %3376 = vmatprep.mubr.bf16.mxu0 %v2664_v17 }
 0xf3c   : > { %3377 = vmatmul.mubr.bf16.gmra.mrb[52].mxu0 %v2665_v54 }
 0xffb   : > { %v3374_v47 = vpop.f32.mrb[48].mxu0 }
 0xffc   : > { %v2777_v35 = vadd.f32 %v3374_v47, %v2685_v11  ;;  %v2768_v8 = vpop.f32.mrb[49].mxu0 }
 0xffd   : > { %v2769_v12 = vadd.f32 %v2768_v8, %v2685_v11  ;;  %v3375_v43 = vpop.f32.mrb[50].mxu0 }
 0xffe   : > { %v2801_v7 = vadd.f32 %v2777_v35, %v5000_v41  ;;  %v2780_v37 = vadd.f32 %v3375_v43, %v2685_v11  ;;  %v2771_v59 = vpop.f32.mrb[51].mxu0 }
 0xfff   : > { %v2799_v31 = vadd.f32 %v2769_v12, %v4993_v21  ;;  %v2772_v50 = vadd.f32 %v2771_v59, %v2685_v11 }
0x1000   : > { %2809 = vst [vmem:[%s354_s19 + $0x10] sm:$0xff] %v2801_v7  ;;  %v2802_v13 = vadd.f32 %v2780_v37, %v5005_v20 }
0x1001   : > { %2807 = vst [vmem:[%s354_s19] sm:$0xff] %v2799_v31  ;;  %v2800_v25 = vadd.f32 %v2772_v50, %v4996_v49 }
0x1002   : > { %2810 = vst [vmem:[%s354_s19 + $0x18] sm:$0xff] %v2802_v13 }
0x1003   : > { %2808 = vst [vmem:[%s354_s19 + $0x8] sm:$0xff] %v2800_v25 }
0x100f   : > { %v3378_v52 = vpop.f32.mrb[52].mxu0 }
0x1010   : > { %v2793_v39 = vadd.f32 %v3378_v52, %v2685_v11  ;;  %v2784_v41 = vpop.f32.mrb[53].mxu0 }
0x1011   : > { %v2785_v6 = vadd.f32 %v2784_v41, %v2685_v11  ;;  %v3379_v15 = vpop.f32.mrb[54].mxu0 }
0x1012   : > { %v2805_v21 = vadd.f32 %v2793_v39, %v5020_v26  ;;  %v2796_v34 = vadd.f32 %v3379_v15, %v2685_v11  ;;  %v2787_v23 = vpop.f32.mrb[55].mxu0 }
0x1013   : > { %v2803_v49 = vadd.f32 %v2785_v6, %v5012_v4  ;;  %v2788_v20 = vadd.f32 %v2787_v23, %v2685_v11 }
0x1014   : > { %2813 = vst [vmem:[%s354_s19 + $0x30] sm:$0xff] %v2805_v21  ;;  %v2806_v48 = vadd.f32 %v2796_v34, %v5016_v53 }
0x1015   : > { %2811 = vst [vmem:[%s354_s19 + $0x20] sm:$0xff] %v2803_v49  ;;  %v2804_v26 = vadd.f32 %v2788_v20, %v5008_v29 }
0x1016   : > { %2814 = vst [vmem:[%s354_s19 + $0x38] sm:$0xff] %v2806_v48 }
0x1017   : > { %2812 = vst [vmem:[%s354_s19 + $0x28] sm:$0xff] %v2804_v26 }
0x1018   : > { %3968 = shalt.err (!%p3965_p13)
}
0x1019   : > { %s3969_s22 = scalar_lea.hbm %s5244_s28, 1024  ;;  %s3973_s10 = scalar_lea.hbm %s5296_s7, 2048 }
0x101a   : > { %p3970_p0 = scmp.ne.s32.totalorder %s5244_s28, %s3969_s22  ;;  %p3974_p1 = scmp.lt.u32.totalorder %s5244_s28, %s5296_s7 }
0x101b   : > { %p3975_p2 = scmp.lt.u32.totalorder %s3973_s10, %s3969_s22  ;;  %p3977_p8 = scmp.lt.u32.totalorder %s3969_s22, %s5244_s28 }
0x101c   : > { %p3971_p5 = pnand %p3970_p0, %p4241_p6 }
0x101d   : > { %p3976_p4 = por %p3975_p2, %p3974_p1 }
0x101e   : > { %p3972_p11 = pneg %p3971_p5 }
0x101f   : > { %p3978_p10 = por %p3977_p8, %p3976_p4 }
0x1021   : > { %p3979_p12 = pnand %p3978_p10, %p3972_p11 }
0x1023   : > { %3982 = shalt.err (!%p3979_p12)
}
0x1024   : > { %s4048_s14 = smov 128   ;;  %s4049_s11 = smov 8  }
0x1025   : > { %3414 = dma.vmem_to_hbm [thread:$0]  (%p4241_p6), %s5237_s23, 1024, %s5244_s28, %s2816_s29, %s4048_s14, %s4048_s14, %s4049_s11  }
0x1026 PF: > { %s5318_s16 = sld [smem:[#allocation16_spill]]  ;;  %s5319_s30 = sld [smem:[#allocation17_spill]] }
0x1027   : > { %p5321_p7 = scmp.ge.s32.totalorder %s4029_s27, 2 }
0x102c   : > { %s2844_s9 = sand.u32 1, %s5318_s16   ;;  %p5320_p3 = scmp.ne.s32.totalorder %s5319_s30, 0 }
0x102d   : > { %s2845_s18 = scalar_lea.sflag [#allocation4], %s2844_s9 }
0x102e   : > { %p3434_p9 = pnand %p5321_p7, %p5320_p3 }
0x1030   : > { %4012 = dma.done.wait (!%p3434_p9), %s2845_s18, 1024  }
0x1031   : > { %4014 = vsyncadd (!%p3434_p9), %s2845_s18, 4294966272  ;;  %p22_p13 = scmp.ge.s32.totalorder %s4231_s20, 4   ;;  %s5322_s24 = smov %s4021_s25 }
0x1032   : > { %s5323_s25 = smov %s4025_s26  ;;  %s5324_s26 = smov %s4247_s13 }
0x1033   : > { %s5325_s27 = smov %s4231_s20  ;;  %24 = sbr.rel (!%p22_p13) target bundleno = 7 (0x7), region = 109 }
0x103a   :  { %2850 = vsyncpa [#allocation3], 1 }
0x103b   :  { %2852 = vsyncpa [#allocation3 + $0x1], 1 }
0x103c   :  { %2853 = vsyncpa [#allocation6], 1 }
0x103d   :  { %2854 = vsyncpa [#allocation9], 1 }
0x103e   :  { %2855 = vsyncpa [#allocation4], 1 }
0x103f   :  { %2857 = vsyncpa [#allocation4 + $0x1], 1 }

</bundles_post_ra>
